<compile_context>
chip_gen: v7x
topology: tpu7x:2x2x1
jax: 0.10.0
libtpu: 0.0.40
codegen_flags: <defaults>
</compile_context>

<pallas_src>
import functools
import math

import jax
import jax.numpy as jnp
from jax.experimental import pallas as pl
from jax.experimental.pallas import tpu as pltpu


_LANE = 128          # TPU lane width
_MAX_TILE = 512      # tile size for large K / N dimensions
_GELU_C = 0.7978845608028654  # sqrt(2/pi)


def _round_up(v, m):
    return ((v + m - 1) // m) * m


def _pad_and_tile(dim):
    """Pad `dim` to a lane-friendly size and pick a tile that divides it."""
    padded = _round_up(dim, _LANE)
    if padded <= 1024:
        return padded, padded            # single tile along this axis
    padded = _round_up(dim, _MAX_TILE)
    return padded, _MAX_TILE


# ----------------------------------------------------------------------------
# Pallas kernel: fused matmul + bias + (optional batch-stat BN) + (optional GELU)
# Grid = (n_tiles, k_tiles). Blocks:
#   x:(M,TK) bf16, w:(TK,TN) bf16, b/gamma/beta:(1,TN) f32,
#   o:(M,TN) out_dtype, acc:(M,TN) f32 scratch (resident across the k axis).
# ----------------------------------------------------------------------------
def _fused_kernel(*refs, apply_bn, apply_gelu, eps):
    if apply_bn:
        x_ref, w_ref, b_ref, g_ref, be_ref, o_ref, acc_ref = refs
    else:
        x_ref, w_ref, b_ref, o_ref, acc_ref = refs
        g_ref = be_ref = None

    k = pl.program_id(1)

    @pl.when(k == 0)
    def _init():
        acc_ref[...] = jnp.zeros_like(acc_ref)

    # bf16 x bf16 -> f32 accumulate on the MXU.
    acc_ref[...] += jnp.dot(x_ref[...], w_ref[...],
                            preferred_element_type=jnp.float32)

    @pl.when(k == pl.num_programs(1) - 1)
    def _finalize():
        acc = acc_ref[...] + b_ref[...]                 # f32 epilogue
        if apply_bn:
            # Training-mode BatchNorm over the row (N*OH*OW) axis.
            # One-pass stats: E[x^2] - E[x]^2, biased variance, affine.
            inv_m = 1.0 / acc.shape[0]
            mean = jnp.sum(acc, axis=0, keepdims=True) * inv_m
            mean_sq = jnp.sum(acc * acc, axis=0, keepdims=True) * inv_m
            var = jnp.maximum(mean_sq - mean * mean, 0.0)
            acc = (acc - mean) * jax.lax.rsqrt(var + eps)
            acc = acc * g_ref[...] + be_ref[...]
        if apply_gelu:
            # TODO(synk): PyTorch nn.GELU() default is the exact erf form;
            # tanh approximation used for robust Mosaic (EUP) lowering.
            acc = 0.5 * acc * (1.0 + jnp.tanh(
                _GELU_C * (acc + 0.044715 * acc * acc * acc)))
        o_ref[...] = acc.astype(o_ref.dtype)


def fused_matmul(x, w, b, gamma=None, beta=None, *, apply_bn, apply_gelu,
                 out_dtype=jnp.bfloat16, eps=1e-5):
    """y = act(BN(x @ w + b)). x:(M,K), w:(K,N), b/gamma/beta:(N,). Returns (M,N)."""
    M, K = x.shape
    K2, N = w.shape
    assert K == K2, (K, K2)

    Kp, TK = _pad_and_tile(K)
    Np, TN = _pad_and_tile(N)

    # Zero-pad K / N to lane-aligned sizes (mathematically free in the matmul).
    xp = jnp.pad(x.astype(jnp.bfloat16), ((0, 0), (0, Kp - K)))
    wp = jnp.pad(w.astype(jnp.bfloat16), ((0, Kp - K), (0, Np - N)))
    bp = jnp.pad(b.astype(jnp.float32).reshape(1, N), ((0, 0), (0, Np - N)))

    inputs = [xp, wp, bp]
    in_specs = [
        pl.BlockSpec((M, TK), lambda n, k: (0, k)),   # M full -> BN over all rows
        pl.BlockSpec((TK, TN), lambda n, k: (k, n)),
        pl.BlockSpec((1, TN), lambda n, k: (0, n)),
    ]
    if apply_bn:
        gp = jnp.pad(gamma.astype(jnp.float32).reshape(1, N),
                     ((0, 0), (0, Np - N)))
        bep = jnp.pad(beta.astype(jnp.float32).reshape(1, N),
                      ((0, 0), (0, Np - N)))
        inputs += [gp, bep]
        in_specs += [pl.BlockSpec((1, TN), lambda n, k: (0, n)),
                     pl.BlockSpec((1, TN), lambda n, k: (0, n))]

    kernel = functools.partial(_fused_kernel, apply_bn=apply_bn,
                               apply_gelu=apply_gelu, eps=eps)

    out = pl.pallas_call(
        kernel,
        out_shape=jax.ShapeDtypeStruct((M, Np), out_dtype),
        grid_spec=pltpu.PrefetchScalarGridSpec(
            num_scalar_prefetch=0,
            grid=(Np // TN, Kp // TK),
            in_specs=in_specs,
            out_specs=pl.BlockSpec((M, TN), lambda n, k: (0, n)),
            scratch_shapes=[pltpu.VMEM((M, TN), jnp.float32)]),
        compiler_params=pltpu.CompilerParams(
            # N axis parallel (megacore on v7x), K reduction arbitrary/innermost.
            dimension_semantics=("parallel", "arbitrary"),
            vmem_limit_bytes=32 * 1024 * 1024),
    )(*inputs)

    return out if Np == N else out[:, :N]


# ----------------------------------------------------------------------------
# Glue: im2col (NHWC, bf16), parameter init, full encoder forward
# ----------------------------------------------------------------------------
def im2col(x_nhwc, k, stride, pad):
    """Returns (patches:(N*OH*OW, k*k*C) ordered (kh, kw, c), OH, OW)."""
    # TODO(synk): gather the 5x5 patch rows inside the kernel (manual DMA from
    # an NHWC HBM ref) to avoid materializing the k*k-inflated patch matrix.
    N, H, W, C = x_nhwc.shape
    xp = jnp.pad(x_nhwc, ((0, 0), (pad, pad), (pad, pad), (0, 0)))
    OH = (H + 2 * pad - k) // stride + 1
    OW = (W + 2 * pad - k) // stride + 1
    cols = []
    for kh in range(k):
        for kw in range(k):
            cols.append(xp[:, kh:kh + stride * (OH - 1) + 1:stride,
                           kw:kw + stride * (OW - 1) + 1:stride, :])
    patches = jnp.stack(cols, axis=3).reshape(N, OH, OW, k * k * C)
    return patches.reshape(N * OH * OW, k * k * C), OH, OW


def _conv_out(h, k=5, s=2, p=1):
    return (h + 2 * p - k) // s + 1


def init_params(key, *, in_ch, base_filters, spatial, hidden, latent_dim):
    chans = [in_ch, base_filters, base_filters * 2,
             base_filters * 4, base_filters * 8]
    keys = iter(jax.random.split(key, 32))
    params = {"convs": []}
    h = spatial
    for i in range(4):
        ic, oc = chans[i], chans[i + 1]
        fan_in = 5 * 5 * ic
        w = jax.random.normal(next(keys), (oc, ic, 5, 5),
                              jnp.float32) / math.sqrt(fan_in)
        b = 0.01 * jax.random.normal(next(keys), (oc,), jnp.float32)
        # (OC, IC, KH, KW) -> (KH, KW, IC, OC) -> (KH*KW*IC, OC) to match im2col.
        w_mat = jnp.transpose(w, (2, 3, 1, 0)).reshape(5 * 5 * ic, oc)
        if i > 0:
            gamma = 1.0 + 0.1 * jax.random.normal(next(keys), (oc,), jnp.float32)
            beta = 0.1 * jax.random.normal(next(keys), (oc,), jnp.float32)
        else:
            gamma = jnp.ones((oc,), jnp.float32)    # unused (first block has no BN)
            beta = jnp.zeros((oc,), jnp.float32)
        params["convs"].append(dict(w=w_mat, b=b, gamma=gamma, beta=beta))
        h = _conv_out(h)

    flat = chans[-1] * h * h  # actual flattened size (module's stated
    # in_features=input_dim*input_dim*base_filters is inconsistent; use real size)
    params["flat"] = jnp.int32(flat)  # informational only
    params["fc1_w"] = jax.random.normal(next(keys), (flat, hidden),
                                        jnp.float32) / math.sqrt(flat)
    params["fc1_b"] = 0.01 * jax.random.normal(next(keys), (hidden,), jnp.float32)
    params["fc1_gamma"] = 1.0 + 0.1 * jax.random.normal(next(keys), (hidden,),
                                                        jnp.float32)
    params["fc1_beta"] = 0.1 * jax.random.normal(next(keys), (hidden,), jnp.float32)
    params["fc2_w"] = jax.random.normal(next(keys), (hidden, latent_dim),
                                        jnp.float32) / math.sqrt(hidden)
    params["fc2_b"] = 0.01 * jax.random.normal(next(keys), (latent_dim,),
                                               jnp.float32)
    return params


def encoder_forward(x_nchw, params):
    N = x_nchw.shape[0]
    # NCHW -> NHWC, cast activations to bf16 (matmuls accumulate in f32).
    x = jnp.transpose(x_nchw, (0, 2, 3, 1)).astype(jnp.bfloat16)
    for i, cp in enumerate(params["convs"]):
        use_bn = i > 0                      # static: first conv block has no BN
        patches, OH, OW = im2col(x, k=5, stride=2, pad=1)
        y = fused_matmul(patches, cp["w"], cp["b"],
                         cp["gamma"] if use_bn else None,
                         cp["beta"] if use_bn else None,
                         apply_bn=use_bn, apply_gelu=True,
                         out_dtype=jnp.bfloat16)
        x = y.reshape(N, OH, OW, -1)
    # Flatten in PyTorch (NCHW) channel-major order.
    feat = jnp.transpose(x, (0, 3, 1, 2)).reshape(N, -1)
    # Linear -> BatchNorm1d (module's BatchNorm2d on flat features reinterpreted
    # as BatchNorm1d) -> GELU
    h = fused_matmul(feat, params["fc1_w"], params["fc1_b"],
                     params["fc1_gamma"], params["fc1_beta"],
                     apply_bn=True, apply_gelu=True, out_dtype=jnp.bfloat16)
    # Final Linear to latent_dim (no BN / activation), f32 output.
    # TODO(synk): fc1+fc2 could be fused into a single pallas_call to save a
    # launch + HBM round trip at these latency-bound sizes.
    z = fused_matmul(h, params["fc2_w"], params["fc2_b"],
                     apply_bn=False, apply_gelu=False, out_dtype=jnp.float32)
    return z


if __name__ == "__main__":
    key = jax.random.PRNGKey(0)
    k_x, k_p = jax.random.split(key)

    BATCH, IN_CH, SPATIAL = 2, 3, 32
    BASE_FILTERS, HIDDEN, LATENT_DIM = 3, 4096, 128

    x = jax.random.normal(k_x, (BATCH, IN_CH, SPATIAL, SPATIAL), jnp.float32)
    params = init_params(k_p, in_ch=IN_CH, base_filters=BASE_FILTERS,
                         spatial=SPATIAL, hidden=HIDDEN, latent_dim=LATENT_DIM)

    z = jax.jit(encoder_forward)(x, params)
    z = jax.block_until_ready(z)

    assert z.shape == (BATCH, LATENT_DIM), z.shape
    assert bool(jnp.all(jnp.isfinite(z)))
    print("KERNEL_OK")
</pallas_src>

<mosaic_0001>
module attributes {stable_mosaic.version = 11 : i64} {
  func.func @_fused_kernel(%arg0: i32, %arg1: i32, %arg2: memref<450x128xbf16, #tpu.memory_space<vmem>>, %arg3: memref<128x128xbf16, #tpu.memory_space<vmem>>, %arg4: memref<1x128xf32, #tpu.memory_space<vmem>>, %arg5: memref<450x128xbf16, #tpu.memory_space<vmem>>, %arg6: memref<450x128xf32, #tpu.memory_space<vmem>>) attributes {dimension_semantics = [#tpu.dimension_semantics<parallel>, #tpu.dimension_semantics<arbitrary>], iteration_bounds = array<i64: 1, 1>, scalar_prefetch = 0 : i64, scratch_operands = 1 : i64, tpu.core_type = #tpu.core_type<tc>, window_params = [{transform_indices = @transform_0, window_bounds = array<i64: 450, 128>}, {transform_indices = @transform_1, window_bounds = array<i64: 128, 128>}, {transform_indices = @transform_2, window_bounds = array<i64: 1, 128>}, {transform_indices = @transform_3, window_bounds = array<i64: 450, 128>}]} {
    %c0_i32 = arith.constant 0 : i32
    %0 = arith.cmpi eq, %arg1, %c0_i32 : i32
    %1 = arith.extui %0 : i1 to i32
    %c0_i32_0 = arith.constant 0 : i32
    %2 = arith.cmpi ne, %1, %c0_i32_0 : i32
    scf.if %2 {
      %cst_10 = arith.constant 0.000000e+00 : f32
      %12 = vector.broadcast %cst_10 : f32 to vector<450x128xf32>
      %c0_11 = arith.constant 0 : index
      %c0_12 = arith.constant 0 : index
      %13 = vector.load %arg6[%c0_11, %c0_12] : memref<450x128xf32, #tpu.memory_space<vmem>>, vector<450x128xf32>
      tpu.vector_store %arg6[%c0_11, %c0_12], %12 {strides = array<i32>} : memref<450x128xf32, #tpu.memory_space<vmem>>, vector<450x128xf32>,
    } else {
    }
    %c0 = arith.constant 0 : index
    %c0_1 = arith.constant 0 : index
    %3 = vector.load %arg6[%c0, %c0_1] : memref<450x128xf32, #tpu.memory_space<vmem>>, vector<450x128xf32>
    %c0_2 = arith.constant 0 : index
    %c0_3 = arith.constant 0 : index
    %4 = vector.load %arg2[%c0_2, %c0_3] : memref<450x128xbf16, #tpu.memory_space<vmem>>, vector<450x128xbf16>
    %c0_4 = arith.constant 0 : index
    %c0_5 = arith.constant 0 : index
    %5 = vector.load %arg3[%c0_4, %c0_5] : memref<128x128xbf16, #tpu.memory_space<vmem>>, vector<128x128xbf16>
    %cst = arith.constant dense<0.000000e+00> : vector<450x128xf32>
    %6 = tpu.matmul %4, %5, %cst {dimension_numbers = #tpu.dot_dimension_numbers<[1], [0], [0], [1], [0, 0, 1, 1], [], []>} : vector<450x128xbf16>, vector<128x128xbf16>, vector<450x128xf32> -> vector<450x128xf32>
    %7 = arith.addf %3, %6 : vector<450x128xf32>
    %c0_6 = arith.constant 0 : index
    %c0_7 = arith.constant 0 : index
    %8 = vector.load %arg6[%c0_6, %c0_7] : memref<450x128xf32, #tpu.memory_space<vmem>>, vector<450x128xf32>
    tpu.vector_store %arg6[%c0_6, %c0_7], %7 {strides = array<i32>} : memref<450x128xf32, #tpu.memory_space<vmem>>, vector<450x128xf32>,
    %c0_i32_8 = arith.constant 0 : i32
    %9 = arith.cmpi eq, %arg1, %c0_i32_8 : i32
    %10 = arith.extui %9 : i1 to i32
    %c0_i32_9 = arith.constant 0 : i32
    %11 = arith.cmpi ne, %10, %c0_i32_9 : i32
    scf.if %11 {
      %c0_10 = arith.constant 0 : index
      %c0_11 = arith.constant 0 : index
      %12 = vector.load %arg6[%c0_10, %c0_11] : memref<450x128xf32, #tpu.memory_space<vmem>>, vector<450x128xf32>
      %c0_12 = arith.constant 0 : index
      %c0_13 = arith.constant 0 : index
      %13 = vector.load %arg4[%c0_12, %c0_13] : memref<1x128xf32, #tpu.memory_space<vmem>>, vector<1x128xf32>
      %14 = vector.broadcast %13 : vector<1x128xf32> to vector<450x128xf32>
      %15 = arith.addf %12, %14 : vector<450x128xf32>
      %cst_14 = arith.constant 5.000000e-01 : f32
      %16 = vector.broadcast %cst_14 : f32 to vector<450x128xf32>
      %17 = arith.mulf %16, %15 : vector<450x128xf32>
      %cst_15 = arith.constant 4.471500e-02 : f32
      %18 = vector.broadcast %cst_15 : f32 to vector<450x128xf32>
      %19 = arith.mulf %18, %15 : vector<450x128xf32>
      %20 = arith.mulf %19, %15 : vector<450x128xf32>
      %21 = arith.mulf %20, %15 : vector<450x128xf32>
      %22 = arith.addf %15, %21 : vector<450x128xf32>
      %cst_16 = arith.constant 0.797884583 : f32
      %23 = vector.broadcast %cst_16 : f32 to vector<450x128xf32>
      %24 = arith.mulf %23, %22 : vector<450x128xf32>
      %25 = math.tanh %24 : vector<450x128xf32>
      %cst_17 = arith.constant 1.000000e+00 : f32
      %26 = vector.broadcast %cst_17 : f32 to vector<450x128xf32>
      %27 = arith.addf %26, %25 : vector<450x128xf32>
      %28 = arith.mulf %17, %27 : vector<450x128xf32>
      %29 = arith.truncf %28 : vector<450x128xf32> to vector<450x128xbf16>
      %c0_18 = arith.constant 0 : index
      %c0_19 = arith.constant 0 : index
      %30 = vector.load %arg5[%c0_18, %c0_19] : memref<450x128xbf16, #tpu.memory_space<vmem>>, vector<450x128xbf16>
      tpu.vector_store %arg5[%c0_18, %c0_19], %29 {strides = array<i32>} : memref<450x128xbf16, #tpu.memory_space<vmem>>, vector<450x128xbf16>,
    } else {
    }
    return
  }
  func.func @transform_0(%arg0: i32, %arg1: i32) -> (i32, i32) {
    %c0_i32 = arith.constant 0 : i32
    %c0_i32_0 = arith.constant 0 : i32
    return %c0_i32, %arg1 : i32, i32
  }
  func.func @transform_1(%arg0: i32, %arg1: i32) -> (i32, i32) {
    %c0_i32 = arith.constant 0 : i32
    return %arg1, %arg0 : i32, i32
  }
  func.func @transform_2(%arg0: i32, %arg1: i32) -> (i32, i32) {
    %c0_i32 = arith.constant 0 : i32
    %c0_i32_0 = arith.constant 0 : i32
    return %c0_i32, %arg0 : i32, i32
  }
  func.func @transform_3(%arg0: i32, %arg1: i32) -> (i32, i32) {
    %c0_i32 = arith.constant 0 : i32
    %c0_i32_0 = arith.constant 0 : i32
    return %c0_i32, %arg0 : i32, i32
  }
}

module attributes {stable_mosaic.version = 11 : i64} {
  func.func @_fused_kernel(%arg0: i32, %arg1: i32, %arg2: memref<98x128xbf16, #tpu.memory_space<vmem>>, %arg3: memref<128x128xbf16, #tpu.memory_space<vmem>>, %arg4: memref<1x128xf32, #tpu.memory_space<vmem>>, %arg5: memref<1x128xf32, #tpu.memory_space<vmem>>, %arg6: memref<1x128xf32, #tpu.memory_space<vmem>>, %arg7: memref<98x128xbf16, #tpu.memory_space<vmem>>, %arg8: memref<98x128xf32, #tpu.memory_space<vmem>>) attributes {dimension_semantics = [#tpu.dimension_semantics<parallel>, #tpu.dimension_semantics<arbitrary>], iteration_bounds = array<i64: 1, 1>, scalar_prefetch = 0 : i64, scratch_operands = 1 : i64, tpu.core_type = #tpu.core_type<tc>, window_params = [{transform_indices = @transform_0, window_bounds = array<i64: 98, 128>}, {transform_indices = @transform_1, window_bounds = array<i64: 128, 128>}, {transform_indices = @transform_2, window_bounds = array<i64: 1, 128>}, {transform_indices = @transform_3, window_bounds = array<i64: 1, 128>}, {transform_indices = @transform_4, window_bounds = array<i64: 1, 128>}, {transform_indices = @transform_5, window_bounds = array<i64: 98, 128>}]} {
    %c0_i32 = arith.constant 0 : i32
    %0 = arith.cmpi eq, %arg1, %c0_i32 : i32
    %1 = arith.extui %0 : i1 to i32
    %c0_i32_0 = arith.constant 0 : i32
    %2 = arith.cmpi ne, %1, %c0_i32_0 : i32
    scf.if %2 {
      %cst_10 = arith.constant 0.000000e+00 : f32
      %12 = vector.broadcast %cst_10 : f32 to vector<98x128xf32>
      %c0_11 = arith.constant 0 : index
      %c0_12 = arith.constant 0 : index
      %13 = vector.load %arg8[%c0_11, %c0_12] : memref<98x128xf32, #tpu.memory_space<vmem>>, vector<98x128xf32>
      tpu.vector_store %arg8[%c0_11, %c0_12], %12 {strides = array<i32>} : memref<98x128xf32, #tpu.memory_space<vmem>>, vector<98x128xf32>,
    } else {
    }
    %c0 = arith.constant 0 : index
    %c0_1 = arith.constant 0 : index
    %3 = vector.load %arg8[%c0, %c0_1] : memref<98x128xf32, #tpu.memory_space<vmem>>, vector<98x128xf32>
    %c0_2 = arith.constant 0 : index
    %c0_3 = arith.constant 0 : index
    %4 = vector.load %arg2[%c0_2, %c0_3] : memref<98x128xbf16, #tpu.memory_space<vmem>>, vector<98x128xbf16>
    %c0_4 = arith.constant 0 : index
    %c0_5 = arith.constant 0 : index
    %5 = vector.load %arg3[%c0_4, %c0_5] : memref<128x128xbf16, #tpu.memory_space<vmem>>, vector<128x128xbf16>
    %cst = arith.constant dense<0.000000e+00> : vector<98x128xf32>
    %6 = tpu.matmul %4, %5, %cst {dimension_numbers = #tpu.dot_dimension_numbers<[1], [0], [0], [1], [0, 0, 1, 1], [], []>} : vector<98x128xbf16>, vector<128x128xbf16>, vector<98x128xf32> -> vector<98x128xf32>
    %7 = arith.addf %3, %6 : vector<98x128xf32>
    %c0_6 = arith.constant 0 : index
    %c0_7 = arith.constant 0 : index
    %8 = vector.load %arg8[%c0_6, %c0_7] : memref<98x128xf32, #tpu.memory_space<vmem>>, vector<98x128xf32>
    tpu.vector_store %arg8[%c0_6, %c0_7], %7 {strides = array<i32>} : memref<98x128xf32, #tpu.memory_space<vmem>>, vector<98x128xf32>,
    %c0_i32_8 = arith.constant 0 : i32
    %9 = arith.cmpi eq, %arg1, %c0_i32_8 : i32
    %10 = arith.extui %9 : i1 to i32
    %c0_i32_9 = arith.constant 0 : i32
    %11 = arith.cmpi ne, %10, %c0_i32_9 : i32
    scf.if %11 {
      %c0_10 = arith.constant 0 : index
      %c0_11 = arith.constant 0 : index
      %12 = vector.load %arg8[%c0_10, %c0_11] : memref<98x128xf32, #tpu.memory_space<vmem>>, vector<98x128xf32>
      %c0_12 = arith.constant 0 : index
      %c0_13 = arith.constant 0 : index
      %13 = vector.load %arg4[%c0_12, %c0_13] : memref<1x128xf32, #tpu.memory_space<vmem>>, vector<1x128xf32>
      %14 = vector.broadcast %13 : vector<1x128xf32> to vector<98x128xf32>
      %15 = arith.addf %12, %14 : vector<98x128xf32>
      %cst_14 = arith.constant dense<0.000000e+00> : vector<128xf32>
      %16 = vector.multi_reduction <add>, %15, %cst_14 [0] : vector<98x128xf32> to vector<128xf32>
      %17 = vector.shape_cast %16 : vector<128xf32> to vector<1x128xf32>
      %cst_15 = arith.constant 0.0102040814 : f32
      %18 = vector.broadcast %cst_15 : f32 to vector<1x128xf32>
      %19 = arith.mulf %17, %18 : vector<1x128xf32>
      %20 = arith.mulf %15, %15 : vector<98x128xf32>
      %cst_16 = arith.constant dense<0.000000e+00> : vector<128xf32>
      %21 = vector.multi_reduction <add>, %20, %cst_16 [0] : vector<98x128xf32> to vector<128xf32>
      %22 = vector.shape_cast %21 : vector<128xf32> to vector<1x128xf32>
      %cst_17 = arith.constant 0.0102040814 : f32
      %23 = vector.broadcast %cst_17 : f32 to vector<1x128xf32>
      %24 = arith.mulf %22, %23 : vector<1x128xf32>
      %25 = arith.mulf %19, %19 : vector<1x128xf32>
      %26 = arith.subf %24, %25 : vector<1x128xf32>
      %cst_18 = arith.constant 0.000000e+00 : f32
      %27 = vector.broadcast %cst_18 : f32 to vector<1x128xf32>
      %28 = arith.maximumf %26, %27 : vector<1x128xf32>
      %29 = vector.broadcast %19 : vector<1x128xf32> to vector<98x128xf32>
      %30 = arith.subf %15, %29 : vector<98x128xf32>
      %cst_19 = arith.constant 9.99999974E-6 : f32
      %31 = vector.broadcast %cst_19 : f32 to vector<1x128xf32>
      %32 = arith.addf %28, %31 : vector<1x128xf32>
      %33 = math.rsqrt %32 : vector<1x128xf32>
      %34 = vector.broadcast %33 : vector<1x128xf32> to vector<98x128xf32>
      %35 = arith.mulf %30, %34 : vector<98x128xf32>
      %c0_20 = arith.constant 0 : index
      %c0_21 = arith.constant 0 : index
      %36 = vector.load %arg5[%c0_20, %c0_21] : memref<1x128xf32, #tpu.memory_space<vmem>>, vector<1x128xf32>
      %37 = vector.broadcast %36 : vector<1x128xf32> to vector<98x128xf32>
      %38 = arith.mulf %35, %37 : vector<98x128xf32>
      %c0_22 = arith.constant 0 : index
      %c0_23 = arith.constant 0 : index
      %39 = vector.load %arg6[%c0_22, %c0_23] : memref<1x128xf32, #tpu.memory_space<vmem>>, vector<1x128xf32>
      %40 = vector.broadcast %39 : vector<1x128xf32> to vector<98x128xf32>
      %41 = arith.addf %38, %40 : vector<98x128xf32>
      %cst_24 = arith.constant 5.000000e-01 : f32
      %42 = vector.broadcast %cst_24 : f32 to vector<98x128xf32>
      %43 = arith.mulf %42, %41 : vector<98x128xf32>
      %cst_25 = arith.constant 4.471500e-02 : f32
      %44 = vector.broadcast %cst_25 : f32 to vector<98x128xf32>
      %45 = arith.mulf %44, %41 : vector<98x128xf32>
      %46 = arith.mulf %45, %41 : vector<98x128xf32>
      %47 = arith.mulf %46, %41 : vector<98x128xf32>
      %48 = arith.addf %41, %47 : vector<98x128xf32>
      %cst_26 = arith.constant 0.797884583 : f32
      %49 = vector.broadcast %cst_26 : f32 to vector<98x128xf32>
      %50 = arith.mulf %49, %48 : vector<98x128xf32>
      %51 = math.tanh %50 : vector<98x128xf32>
      %cst_27 = arith.constant 1.000000e+00 : f32
      %52 = vector.broadcast %cst_27 : f32 to vector<98x128xf32>
      %53 = arith.addf %52, %51 : vector<98x128xf32>
      %54 = arith.mulf %43, %53 : vector<98x128xf32>
      %55 = arith.truncf %54 : vector<98x128xf32> to vector<98x128xbf16>
      %c0_28 = arith.constant 0 : index
      %c0_29 = arith.constant 0 : index
      %56 = vector.load %arg7[%c0_28, %c0_29] : memref<98x128xbf16, #tpu.memory_space<vmem>>, vector<98x128xbf16>
      tpu.vector_store %arg7[%c0_28, %c0_29], %55 {strides = array<i32>} : memref<98x128xbf16, #tpu.memory_space<vmem>>, vector<98x128xbf16>,
    } else {
    }
    return
  }
  func.func @transform_0(%arg0: i32, %arg1: i32) -> (i32, i32) {
    %c0_i32 = arith.constant 0 : i32
    %c0_i32_0 = arith.constant 0 : i32
    return %c0_i32, %arg1 : i32, i32
  }
  func.func @transform_1(%arg0: i32, %arg1: i32) -> (i32, i32) {
    %c0_i32 = arith.constant 0 : i32
    return %arg1, %arg0 : i32, i32
  }
  func.func @transform_2(%arg0: i32, %arg1: i32) -> (i32, i32) {
    %c0_i32 = arith.constant 0 : i32
    %c0_i32_0 = arith.constant 0 : i32
    return %c0_i32, %arg0 : i32, i32
  }
  func.func @transform_3(%arg0: i32, %arg1: i32) -> (i32, i32) {
    %c0_i32 = arith.constant 0 : i32
    %c0_i32_0 = arith.constant 0 : i32
    return %c0_i32, %arg0 : i32, i32
  }
  func.func @transform_4(%arg0: i32, %arg1: i32) -> (i32, i32) {
    %c0_i32 = arith.constant 0 : i32
    %c0_i32_0 = arith.constant 0 : i32
    return %c0_i32, %arg0 : i32, i32
  }
  func.func @transform_5(%arg0: i32, %arg1: i32) -> (i32, i32) {
    %c0_i32 = arith.constant 0 : i32
    %c0_i32_0 = arith.constant 0 : i32
    return %c0_i32, %arg0 : i32, i32
  }
}

module attributes {stable_mosaic.version = 11 : i64} {
  func.func @_fused_kernel(%arg0: i32, %arg1: i32, %arg2: memref<18x256xbf16, #tpu.memory_space<vmem>>, %arg3: memref<256x128xbf16, #tpu.memory_space<vmem>>, %arg4: memref<1x128xf32, #tpu.memory_space<vmem>>, %arg5: memref<1x128xf32, #tpu.memory_space<vmem>>, %arg6: memref<1x128xf32, #tpu.memory_space<vmem>>, %arg7: memref<18x128xbf16, #tpu.memory_space<vmem>>, %arg8: memref<18x128xf32, #tpu.memory_space<vmem>>) attributes {dimension_semantics = [#tpu.dimension_semantics<parallel>, #tpu.dimension_semantics<arbitrary>], iteration_bounds = array<i64: 1, 1>, scalar_prefetch = 0 : i64, scratch_operands = 1 : i64, tpu.core_type = #tpu.core_type<tc>, window_params = [{transform_indices = @transform_0, window_bounds = array<i64: 18, 256>}, {transform_indices = @transform_1, window_bounds = array<i64: 256, 128>}, {transform_indices = @transform_2, window_bounds = array<i64: 1, 128>}, {transform_indices = @transform_3, window_bounds = array<i64: 1, 128>}, {transform_indices = @transform_4, window_bounds = array<i64: 1, 128>}, {transform_indices = @transform_5, window_bounds = array<i64: 18, 128>}]} {
    %c0_i32 = arith.constant 0 : i32
    %0 = arith.cmpi eq, %arg1, %c0_i32 : i32
    %1 = arith.extui %0 : i1 to i32
    %c0_i32_0 = arith.constant 0 : i32
    %2 = arith.cmpi ne, %1, %c0_i32_0 : i32
    scf.if %2 {
      %cst_10 = arith.constant 0.000000e+00 : f32
      %12 = vector.broadcast %cst_10 : f32 to vector<18x128xf32>
      %c0_11 = arith.constant 0 : index
      %c0_12 = arith.constant 0 : index
      %13 = vector.load %arg8[%c0_11, %c0_12] : memref<18x128xf32, #tpu.memory_space<vmem>>, vector<18x128xf32>
      tpu.vector_store %arg8[%c0_11, %c0_12], %12 {strides = array<i32>} : memref<18x128xf32, #tpu.memory_space<vmem>>, vector<18x128xf32>,
    } else {
    }
    %c0 = arith.constant 0 : index
    %c0_1 = arith.constant 0 : index
    %3 = vector.load %arg8[%c0, %c0_1] : memref<18x128xf32, #tpu.memory_space<vmem>>, vector<18x128xf32>
    %c0_2 = arith.constant 0 : index
    %c0_3 = arith.constant 0 : index
    %4 = vector.load %arg2[%c0_2, %c0_3] : memref<18x256xbf16, #tpu.memory_space<vmem>>, vector<18x256xbf16>
    %c0_4 = arith.constant 0 : index
    %c0_5 = arith.constant 0 : index
    %5 = vector.load %arg3[%c0_4, %c0_5] : memref<256x128xbf16, #tpu.memory_space<vmem>>, vector<256x128xbf16>
    %cst = arith.constant dense<0.000000e+00> : vector<18x128xf32>
    %6 = tpu.matmul %4, %5, %cst {dimension_numbers = #tpu.dot_dimension_numbers<[1], [0], [0], [1], [0, 0, 1, 1], [], []>} : vector<18x256xbf16>, vector<256x128xbf16>, vector<18x128xf32> -> vector<18x128xf32>
    %7 = arith.addf %3, %6 : vector<18x128xf32>
    %c0_6 = arith.constant 0 : index
    %c0_7 = arith.constant 0 : index
    %8 = vector.load %arg8[%c0_6, %c0_7] : memref<18x128xf32, #tpu.memory_space<vmem>>, vector<18x128xf32>
    tpu.vector_store %arg8[%c0_6, %c0_7], %7 {strides = array<i32>} : memref<18x128xf32, #tpu.memory_space<vmem>>, vector<18x128xf32>,
    %c0_i32_8 = arith.constant 0 : i32
    %9 = arith.cmpi eq, %arg1, %c0_i32_8 : i32
    %10 = arith.extui %9 : i1 to i32
    %c0_i32_9 = arith.constant 0 : i32
    %11 = arith.cmpi ne, %10, %c0_i32_9 : i32
    scf.if %11 {
      %c0_10 = arith.constant 0 : index
      %c0_11 = arith.constant 0 : index
      %12 = vector.load %arg8[%c0_10, %c0_11] : memref<18x128xf32, #tpu.memory_space<vmem>>, vector<18x128xf32>
      %c0_12 = arith.constant 0 : index
      %c0_13 = arith.constant 0 : index
      %13 = vector.load %arg4[%c0_12, %c0_13] : memref<1x128xf32, #tpu.memory_space<vmem>>, vector<1x128xf32>
      %14 = vector.broadcast %13 : vector<1x128xf32> to vector<18x128xf32>
      %15 = arith.addf %12, %14 : vector<18x128xf32>
      %cst_14 = arith.constant dense<0.000000e+00> : vector<128xf32>
      %16 = vector.multi_reduction <add>, %15, %cst_14 [0] : vector<18x128xf32> to vector<128xf32>
      %17 = vector.shape_cast %16 : vector<128xf32> to vector<1x128xf32>
      %cst_15 = arith.constant 0.055555556 : f32
      %18 = vector.broadcast %cst_15 : f32 to vector<1x128xf32>
      %19 = arith.mulf %17, %18 : vector<1x128xf32>
      %20 = arith.mulf %15, %15 : vector<18x128xf32>
      %cst_16 = arith.constant dense<0.000000e+00> : vector<128xf32>
      %21 = vector.multi_reduction <add>, %20, %cst_16 [0] : vector<18x128xf32> to vector<128xf32>
      %22 = vector.shape_cast %21 : vector<128xf32> to vector<1x128xf32>
      %cst_17 = arith.constant 0.055555556 : f32
      %23 = vector.broadcast %cst_17 : f32 to vector<1x128xf32>
      %24 = arith.mulf %22, %23 : vector<1x128xf32>
      %25 = arith.mulf %19, %19 : vector<1x128xf32>
      %26 = arith.subf %24, %25 : vector<1x128xf32>
      %cst_18 = arith.constant 0.000000e+00 : f32
      %27 = vector.broadcast %cst_18 : f32 to vector<1x128xf32>
      %28 = arith.maximumf %26, %27 : vector<1x128xf32>
      %29 = vector.broadcast %19 : vector<1x128xf32> to vector<18x128xf32>
      %30 = arith.subf %15, %29 : vector<18x128xf32>
      %cst_19 = arith.constant 9.99999974E-6 : f32
      %31 = vector.broadcast %cst_19 : f32 to vector<1x128xf32>
      %32 = arith.addf %28, %31 : vector<1x128xf32>
      %33 = math.rsqrt %32 : vector<1x128xf32>
      %34 = vector.broadcast %33 : vector<1x128xf32> to vector<18x128xf32>
      %35 = arith.mulf %30, %34 : vector<18x128xf32>
      %c0_20 = arith.constant 0 : index
      %c0_21 = arith.constant 0 : index
      %36 = vector.load %arg5[%c0_20, %c0_21] : memref<1x128xf32, #tpu.memory_space<vmem>>, vector<1x128xf32>
      %37 = vector.broadcast %36 : vector<1x128xf32> to vector<18x128xf32>
      %38 = arith.mulf %35, %37 : vector<18x128xf32>
      %c0_22 = arith.constant 0 : index
      %c0_23 = arith.constant 0 : index
      %39 = vector.load %arg6[%c0_22, %c0_23] : memref<1x128xf32, #tpu.memory_space<vmem>>, vector<1x128xf32>
      %40 = vector.broadcast %39 : vector<1x128xf32> to vector<18x128xf32>
      %41 = arith.addf %38, %40 : vector<18x128xf32>
      %cst_24 = arith.constant 5.000000e-01 : f32
      %42 = vector.broadcast %cst_24 : f32 to vector<18x128xf32>
      %43 = arith.mulf %42, %41 : vector<18x128xf32>
      %cst_25 = arith.constant 4.471500e-02 : f32
      %44 = vector.broadcast %cst_25 : f32 to vector<18x128xf32>
      %45 = arith.mulf %44, %41 : vector<18x128xf32>
      %46 = arith.mulf %45, %41 : vector<18x128xf32>
      %47 = arith.mulf %46, %41 : vector<18x128xf32>
      %48 = arith.addf %41, %47 : vector<18x128xf32>
      %cst_26 = arith.constant 0.797884583 : f32
      %49 = vector.broadcast %cst_26 : f32 to vector<18x128xf32>
      %50 = arith.mulf %49, %48 : vector<18x128xf32>
      %51 = math.tanh %50 : vector<18x128xf32>
      %cst_27 = arith.constant 1.000000e+00 : f32
      %52 = vector.broadcast %cst_27 : f32 to vector<18x128xf32>
      %53 = arith.addf %52, %51 : vector<18x128xf32>
      %54 = arith.mulf %43, %53 : vector<18x128xf32>
      %55 = arith.truncf %54 : vector<18x128xf32> to vector<18x128xbf16>
      %c0_28 = arith.constant 0 : index
      %c0_29 = arith.constant 0 : index
      %56 = vector.load %arg7[%c0_28, %c0_29] : memref<18x128xbf16, #tpu.memory_space<vmem>>, vector<18x128xbf16>
      tpu.vector_store %arg7[%c0_28, %c0_29], %55 {strides = array<i32>} : memref<18x128xbf16, #tpu.memory_space<vmem>>, vector<18x128xbf16>,
    } else {
    }
    return
  }
  func.func @transform_0(%arg0: i32, %arg1: i32) -> (i32, i32) {
    %c0_i32 = arith.constant 0 : i32
    %c0_i32_0 = arith.constant 0 : i32
    return %c0_i32, %arg1 : i32, i32
  }
  func.func @transform_1(%arg0: i32, %arg1: i32) -> (i32, i32) {
    %c0_i32 = arith.constant 0 : i32
    return %arg1, %arg0 : i32, i32
  }
  func.func @transform_2(%arg0: i32, %arg1: i32) -> (i32, i32) {
    %c0_i32 = arith.constant 0 : i32
    %c0_i32_0 = arith.constant 0 : i32
    return %c0_i32, %arg0 : i32, i32
  }
  func.func @transform_3(%arg0: i32, %arg1: i32) -> (i32, i32) {
    %c0_i32 = arith.constant 0 : i32
    %c0_i32_0 = arith.constant 0 : i32
    return %c0_i32, %arg0 : i32, i32
  }
  func.func @transform_4(%arg0: i32, %arg1: i32) -> (i32, i32) {
    %c0_i32 = arith.constant 0 : i32
    %c0_i32_0 = arith.constant 0 : i32
    return %c0_i32, %arg0 : i32, i32
  }
  func.func @transform_5(%arg0: i32, %arg1: i32) -> (i32, i32) {
    %c0_i32 = arith.constant 0 : i32
    %c0_i32_0 = arith.constant 0 : i32
    return %c0_i32, %arg0 : i32, i32
  }
}

module attributes {stable_mosaic.version = 11 : i64} {
  func.func @_fused_kernel(%arg0: i32, %arg1: i32, %arg2: memref<2x384xbf16, #tpu.memory_space<vmem>>, %arg3: memref<384x128xbf16, #tpu.memory_space<vmem>>, %arg4: memref<1x128xf32, #tpu.memory_space<vmem>>, %arg5: memref<1x128xf32, #tpu.memory_space<vmem>>, %arg6: memref<1x128xf32, #tpu.memory_space<vmem>>, %arg7: memref<2x128xbf16, #tpu.memory_space<vmem>>, %arg8: memref<2x128xf32, #tpu.memory_space<vmem>>) attributes {dimension_semantics = [#tpu.dimension_semantics<parallel>, #tpu.dimension_semantics<arbitrary>], iteration_bounds = array<i64: 1, 1>, scalar_prefetch = 0 : i64, scratch_operands = 1 : i64, tpu.core_type = #tpu.core_type<tc>, window_params = [{transform_indices = @transform_0, window_bounds = array<i64: 2, 384>}, {transform_indices = @transform_1, window_bounds = array<i64: 384, 128>}, {transform_indices = @transform_2, window_bounds = array<i64: 1, 128>}, {transform_indices = @transform_3, window_bounds = array<i64: 1, 128>}, {transform_indices = @transform_4, window_bounds = array<i64: 1, 128>}, {transform_indices = @transform_5, window_bounds = array<i64: 2, 128>}]} {
    %c0_i32 = arith.constant 0 : i32
    %0 = arith.cmpi eq, %arg1, %c0_i32 : i32
    %1 = arith.extui %0 : i1 to i32
    %c0_i32_0 = arith.constant 0 : i32
    %2 = arith.cmpi ne, %1, %c0_i32_0 : i32
    scf.if %2 {
      %cst_10 = arith.constant 0.000000e+00 : f32
      %12 = vector.broadcast %cst_10 : f32 to vector<2x128xf32>
      %c0_11 = arith.constant 0 : index
      %c0_12 = arith.constant 0 : index
      %13 = vector.load %arg8[%c0_11, %c0_12] : memref<2x128xf32, #tpu.memory_space<vmem>>, vector<2x128xf32>
      tpu.vector_store %arg8[%c0_11, %c0_12], %12 {strides = array<i32>} : memref<2x128xf32, #tpu.memory_space<vmem>>, vector<2x128xf32>,
    } else {
    }
    %c0 = arith.constant 0 : index
    %c0_1 = arith.constant 0 : index
    %3 = vector.load %arg8[%c0, %c0_1] : memref<2x128xf32, #tpu.memory_space<vmem>>, vector<2x128xf32>
    %c0_2 = arith.constant 0 : index
    %c0_3 = arith.constant 0 : index
    %4 = vector.load %arg2[%c0_2, %c0_3] : memref<2x384xbf16, #tpu.memory_space<vmem>>, vector<2x384xbf16>
    %c0_4 = arith.constant 0 : index
    %c0_5 = arith.constant 0 : index
    %5 = vector.load %arg3[%c0_4, %c0_5] : memref<384x128xbf16, #tpu.memory_space<vmem>>, vector<384x128xbf16>
    %cst = arith.constant dense<0.000000e+00> : vector<2x128xf32>
    %6 = tpu.matmul %4, %5, %cst {dimension_numbers = #tpu.dot_dimension_numbers<[1], [0], [0], [1], [0, 0, 1, 1], [], []>} : vector<2x384xbf16>, vector<384x128xbf16>, vector<2x128xf32> -> vector<2x128xf32>
    %7 = arith.addf %3, %6 : vector<2x128xf32>
    %c0_6 = arith.constant 0 : index
    %c0_7 = arith.constant 0 : index
    %8 = vector.load %arg8[%c0_6, %c0_7] : memref<2x128xf32, #tpu.memory_space<vmem>>, vector<2x128xf32>
    tpu.vector_store %arg8[%c0_6, %c0_7], %7 {strides = array<i32>} : memref<2x128xf32, #tpu.memory_space<vmem>>, vector<2x128xf32>,
    %c0_i32_8 = arith.constant 0 : i32
    %9 = arith.cmpi eq, %arg1, %c0_i32_8 : i32
    %10 = arith.extui %9 : i1 to i32
    %c0_i32_9 = arith.constant 0 : i32
    %11 = arith.cmpi ne, %10, %c0_i32_9 : i32
    scf.if %11 {
      %c0_10 = arith.constant 0 : index
      %c0_11 = arith.constant 0 : index
      %12 = vector.load %arg8[%c0_10, %c0_11] : memref<2x128xf32, #tpu.memory_space<vmem>>, vector<2x128xf32>
      %c0_12 = arith.constant 0 : index
      %c0_13 = arith.constant 0 : index
      %13 = vector.load %arg4[%c0_12, %c0_13] : memref<1x128xf32, #tpu.memory_space<vmem>>, vector<1x128xf32>
      %14 = vector.broadcast %13 : vector<1x128xf32> to vector<2x128xf32>
      %15 = arith.addf %12, %14 : vector<2x128xf32>
      %cst_14 = arith.constant dense<0.000000e+00> : vector<128xf32>
      %16 = vector.multi_reduction <add>, %15, %cst_14 [0] : vector<2x128xf32> to vector<128xf32>
      %17 = vector.shape_cast %16 : vector<128xf32> to vector<1x128xf32>
      %cst_15 = arith.constant 5.000000e-01 : f32
      %18 = vector.broadcast %cst_15 : f32 to vector<1x128xf32>
      %19 = arith.mulf %17, %18 : vector<1x128xf32>
      %20 = arith.mulf %15, %15 : vector<2x128xf32>
      %cst_16 = arith.constant dense<0.000000e+00> : vector<128xf32>
      %21 = vector.multi_reduction <add>, %20, %cst_16 [0] : vector<2x128xf32> to vector<128xf32>
      %22 = vector.shape_cast %21 : vector<128xf32> to vector<1x128xf32>
      %cst_17 = arith.constant 5.000000e-01 : f32
      %23 = vector.broadcast %cst_17 : f32 to vector<1x128xf32>
      %24 = arith.mulf %22, %23 : vector<1x128xf32>
      %25 = arith.mulf %19, %19 : vector<1x128xf32>
      %26 = arith.subf %24, %25 : vector<1x128xf32>
      %cst_18 = arith.constant 0.000000e+00 : f32
      %27 = vector.broadcast %cst_18 : f32 to vector<1x128xf32>
      %28 = arith.maximumf %26, %27 : vector<1x128xf32>
      %29 = vector.broadcast %19 : vector<1x128xf32> to vector<2x128xf32>
      %30 = arith.subf %15, %29 : vector<2x128xf32>
      %cst_19 = arith.constant 9.99999974E-6 : f32
      %31 = vector.broadcast %cst_19 : f32 to vector<1x128xf32>
      %32 = arith.addf %28, %31 : vector<1x128xf32>
      %33 = math.rsqrt %32 : vector<1x128xf32>
      %34 = vector.broadcast %33 : vector<1x128xf32> to vector<2x128xf32>
      %35 = arith.mulf %30, %34 : vector<2x128xf32>
      %c0_20 = arith.constant 0 : index
      %c0_21 = arith.constant 0 : index
      %36 = vector.load %arg5[%c0_20, %c0_21] : memref<1x128xf32, #tpu.memory_space<vmem>>, vector<1x128xf32>
      %37 = vector.broadcast %36 : vector<1x128xf32> to vector<2x128xf32>
      %38 = arith.mulf %35, %37 : vector<2x128xf32>
      %c0_22 = arith.constant 0 : index
      %c0_23 = arith.constant 0 : index
      %39 = vector.load %arg6[%c0_22, %c0_23] : memref<1x128xf32, #tpu.memory_space<vmem>>, vector<1x128xf32>
      %40 = vector.broadcast %39 : vector<1x128xf32> to vector<2x128xf32>
      %41 = arith.addf %38, %40 : vector<2x128xf32>
      %cst_24 = arith.constant 5.000000e-01 : f32
      %42 = vector.broadcast %cst_24 : f32 to vector<2x128xf32>
      %43 = arith.mulf %42, %41 : vector<2x128xf32>
      %cst_25 = arith.constant 4.471500e-02 : f32
      %44 = vector.broadcast %cst_25 : f32 to vector<2x128xf32>
      %45 = arith.mulf %44, %41 : vector<2x128xf32>
      %46 = arith.mulf %45, %41 : vector<2x128xf32>
      %47 = arith.mulf %46, %41 : vector<2x128xf32>
      %48 = arith.addf %41, %47 : vector<2x128xf32>
      %cst_26 = arith.constant 0.797884583 : f32
      %49 = vector.broadcast %cst_26 : f32 to vector<2x128xf32>
      %50 = arith.mulf %49, %48 : vector<2x128xf32>
      %51 = math.tanh %50 : vector<2x128xf32>
      %cst_27 = arith.constant 1.000000e+00 : f32
      %52 = vector.broadcast %cst_27 : f32 to vector<2x128xf32>
      %53 = arith.addf %52, %51 : vector<2x128xf32>
      %54 = arith.mulf %43, %53 : vector<2x128xf32>
      %55 = arith.truncf %54 : vector<2x128xf32> to vector<2x128xbf16>
      %c0_28 = arith.constant 0 : index
      %c0_29 = arith.constant 0 : index
      %56 = vector.load %arg7[%c0_28, %c0_29] : memref<2x128xbf16, #tpu.memory_space<vmem>>, vector<2x128xbf16>
      tpu.vector_store %arg7[%c0_28, %c0_29], %55 {strides = array<i32>} : memref<2x128xbf16, #tpu.memory_space<vmem>>, vector<2x128xbf16>,
    } else {
    }
    return
  }
  func.func @transform_0(%arg0: i32, %arg1: i32) -> (i32, i32) {
    %c0_i32 = arith.constant 0 : i32
    %c0_i32_0 = arith.constant 0 : i32
    return %c0_i32, %arg1 : i32, i32
  }
  func.func @transform_1(%arg0: i32, %arg1: i32) -> (i32, i32) {
    %c0_i32 = arith.constant 0 : i32
    return %arg1, %arg0 : i32, i32
  }
  func.func @transform_2(%arg0: i32, %arg1: i32) -> (i32, i32) {
    %c0_i32 = arith.constant 0 : i32
    %c0_i32_0 = arith.constant 0 : i32
    return %c0_i32, %arg0 : i32, i32
  }
  func.func @transform_3(%arg0: i32, %arg1: i32) -> (i32, i32) {
    %c0_i32 = arith.constant 0 : i32
    %c0_i32_0 = arith.constant 0 : i32
    return %c0_i32, %arg0 : i32, i32
  }
  func.func @transform_4(%arg0: i32, %arg1: i32) -> (i32, i32) {
    %c0_i32 = arith.constant 0 : i32
    %c0_i32_0 = arith.constant 0 : i32
    return %c0_i32, %arg0 : i32, i32
  }
  func.func @transform_5(%arg0: i32, %arg1: i32) -> (i32, i32) {
    %c0_i32 = arith.constant 0 : i32
    %c0_i32_0 = arith.constant 0 : i32
    return %c0_i32, %arg0 : i32, i32
  }
}

module attributes {stable_mosaic.version = 11 : i64} {
  func.func @_fused_kernel(%arg0: i32, %arg1: i32, %arg2: memref<2x128xbf16, #tpu.memory_space<vmem>>, %arg3: memref<128x512xbf16, #tpu.memory_space<vmem>>, %arg4: memref<1x512xf32, #tpu.memory_space<vmem>>, %arg5: memref<1x512xf32, #tpu.memory_space<vmem>>, %arg6: memref<1x512xf32, #tpu.memory_space<vmem>>, %arg7: memref<2x512xbf16, #tpu.memory_space<vmem>>, %arg8: memref<2x512xf32, #tpu.memory_space<vmem>>) attributes {dimension_semantics = [#tpu.dimension_semantics<parallel>, #tpu.dimension_semantics<arbitrary>], iteration_bounds = array<i64: 8, 1>, scalar_prefetch = 0 : i64, scratch_operands = 1 : i64, tpu.core_type = #tpu.core_type<tc>, window_params = [{transform_indices = @transform_0, window_bounds = array<i64: 2, 128>}, {transform_indices = @transform_1, window_bounds = array<i64: 128, 512>}, {transform_indices = @transform_2, window_bounds = array<i64: 1, 512>}, {transform_indices = @transform_3, window_bounds = array<i64: 1, 512>}, {transform_indices = @transform_4, window_bounds = array<i64: 1, 512>}, {transform_indices = @transform_5, window_bounds = array<i64: 2, 512>}]} {
    %c0_i32 = arith.constant 0 : i32
    %0 = arith.cmpi eq, %arg1, %c0_i32 : i32
    %1 = arith.extui %0 : i1 to i32
    %c0_i32_0 = arith.constant 0 : i32
    %2 = arith.cmpi ne, %1, %c0_i32_0 : i32
    scf.if %2 {
      %cst_10 = arith.constant 0.000000e+00 : f32
      %12 = vector.broadcast %cst_10 : f32 to vector<2x512xf32>
      %c0_11 = arith.constant 0 : index
      %c0_12 = arith.constant 0 : index
      %13 = vector.load %arg8[%c0_11, %c0_12] : memref<2x512xf32, #tpu.memory_space<vmem>>, vector<2x512xf32>
      tpu.vector_store %arg8[%c0_11, %c0_12], %12 {strides = array<i32>} : memref<2x512xf32, #tpu.memory_space<vmem>>, vector<2x512xf32>,
    } else {
    }
    %c0 = arith.constant 0 : index
    %c0_1 = arith.constant 0 : index
    %3 = vector.load %arg8[%c0, %c0_1] : memref<2x512xf32, #tpu.memory_space<vmem>>, vector<2x512xf32>
    %c0_2 = arith.constant 0 : index
    %c0_3 = arith.constant 0 : index
    %4 = vector.load %arg2[%c0_2, %c0_3] : memref<2x128xbf16, #tpu.memory_space<vmem>>, vector<2x128xbf16>
    %c0_4 = arith.constant 0 : index
    %c0_5 = arith.constant 0 : index
    %5 = vector.load %arg3[%c0_4, %c0_5] : memref<128x512xbf16, #tpu.memory_space<vmem>>, vector<128x512xbf16>
    %cst = arith.constant dense<0.000000e+00> : vector<2x512xf32>
    %6 = tpu.matmul %4, %5, %cst {dimension_numbers = #tpu.dot_dimension_numbers<[1], [0], [0], [1], [0, 0, 1, 1], [], []>} : vector<2x128xbf16>, vector<128x512xbf16>, vector<2x512xf32> -> vector<2x512xf32>
    %7 = arith.addf %3, %6 : vector<2x512xf32>
    %c0_6 = arith.constant 0 : index
    %c0_7 = arith.constant 0 : index
    %8 = vector.load %arg8[%c0_6, %c0_7] : memref<2x512xf32, #tpu.memory_space<vmem>>, vector<2x512xf32>
    tpu.vector_store %arg8[%c0_6, %c0_7], %7 {strides = array<i32>} : memref<2x512xf32, #tpu.memory_space<vmem>>, vector<2x512xf32>,
    %c0_i32_8 = arith.constant 0 : i32
    %9 = arith.cmpi eq, %arg1, %c0_i32_8 : i32
    %10 = arith.extui %9 : i1 to i32
    %c0_i32_9 = arith.constant 0 : i32
    %11 = arith.cmpi ne, %10, %c0_i32_9 : i32
    scf.if %11 {
      %c0_10 = arith.constant 0 : index
      %c0_11 = arith.constant 0 : index
      %12 = vector.load %arg8[%c0_10, %c0_11] : memref<2x512xf32, #tpu.memory_space<vmem>>, vector<2x512xf32>
      %c0_12 = arith.constant 0 : index
      %c0_13 = arith.constant 0 : index
      %13 = vector.load %arg4[%c0_12, %c0_13] : memref<1x512xf32, #tpu.memory_space<vmem>>, vector<1x512xf32>
      %14 = vector.broadcast %13 : vector<1x512xf32> to vector<2x512xf32>
      %15 = arith.addf %12, %14 : vector<2x512xf32>
      %cst_14 = arith.constant dense<0.000000e+00> : vector<512xf32>
      %16 = vector.multi_reduction <add>, %15, %cst_14 [0] : vector<2x512xf32> to vector<512xf32>
      %17 = vector.shape_cast %16 : vector<512xf32> to vector<1x512xf32>
      %cst_15 = arith.constant 5.000000e-01 : f32
      %18 = vector.broadcast %cst_15 : f32 to vector<1x512xf32>
      %19 = arith.mulf %17, %18 : vector<1x512xf32>
      %20 = arith.mulf %15, %15 : vector<2x512xf32>
      %cst_16 = arith.constant dense<0.000000e+00> : vector<512xf32>
      %21 = vector.multi_reduction <add>, %20, %cst_16 [0] : vector<2x512xf32> to vector<512xf32>
      %22 = vector.shape_cast %21 : vector<512xf32> to vector<1x512xf32>
      %cst_17 = arith.constant 5.000000e-01 : f32
      %23 = vector.broadcast %cst_17 : f32 to vector<1x512xf32>
      %24 = arith.mulf %22, %23 : vector<1x512xf32>
      %25 = arith.mulf %19, %19 : vector<1x512xf32>
      %26 = arith.subf %24, %25 : vector<1x512xf32>
      %cst_18 = arith.constant 0.000000e+00 : f32
      %27 = vector.broadcast %cst_18 : f32 to vector<1x512xf32>
      %28 = arith.maximumf %26, %27 : vector<1x512xf32>
      %29 = vector.broadcast %19 : vector<1x512xf32> to vector<2x512xf32>
      %30 = arith.subf %15, %29 : vector<2x512xf32>
      %cst_19 = arith.constant 9.99999974E-6 : f32
      %31 = vector.broadcast %cst_19 : f32 to vector<1x512xf32>
      %32 = arith.addf %28, %31 : vector<1x512xf32>
      %33 = math.rsqrt %32 : vector<1x512xf32>
      %34 = vector.broadcast %33 : vector<1x512xf32> to vector<2x512xf32>
      %35 = arith.mulf %30, %34 : vector<2x512xf32>
      %c0_20 = arith.constant 0 : index
      %c0_21 = arith.constant 0 : index
      %36 = vector.load %arg5[%c0_20, %c0_21] : memref<1x512xf32, #tpu.memory_space<vmem>>, vector<1x512xf32>
      %37 = vector.broadcast %36 : vector<1x512xf32> to vector<2x512xf32>
      %38 = arith.mulf %35, %37 : vector<2x512xf32>
      %c0_22 = arith.constant 0 : index
      %c0_23 = arith.constant 0 : index
      %39 = vector.load %arg6[%c0_22, %c0_23] : memref<1x512xf32, #tpu.memory_space<vmem>>, vector<1x512xf32>
      %40 = vector.broadcast %39 : vector<1x512xf32> to vector<2x512xf32>
      %41 = arith.addf %38, %40 : vector<2x512xf32>
      %cst_24 = arith.constant 5.000000e-01 : f32
      %42 = vector.broadcast %cst_24 : f32 to vector<2x512xf32>
      %43 = arith.mulf %42, %41 : vector<2x512xf32>
      %cst_25 = arith.constant 4.471500e-02 : f32
      %44 = vector.broadcast %cst_25 : f32 to vector<2x512xf32>
      %45 = arith.mulf %44, %41 : vector<2x512xf32>
      %46 = arith.mulf %45, %41 : vector<2x512xf32>
      %47 = arith.mulf %46, %41 : vector<2x512xf32>
      %48 = arith.addf %41, %47 : vector<2x512xf32>
      %cst_26 = arith.constant 0.797884583 : f32
      %49 = vector.broadcast %cst_26 : f32 to vector<2x512xf32>
      %50 = arith.mulf %49, %48 : vector<2x512xf32>
      %51 = math.tanh %50 : vector<2x512xf32>
      %cst_27 = arith.constant 1.000000e+00 : f32
      %52 = vector.broadcast %cst_27 : f32 to vector<2x512xf32>
      %53 = arith.addf %52, %51 : vector<2x512xf32>
      %54 = arith.mulf %43, %53 : vector<2x512xf32>
      %55 = arith.truncf %54 : vector<2x512xf32> to vector<2x512xbf16>
      %c0_28 = arith.constant 0 : index
      %c0_29 = arith.constant 0 : index
      %56 = vector.load %arg7[%c0_28, %c0_29] : memref<2x512xbf16, #tpu.memory_space<vmem>>, vector<2x512xbf16>
      tpu.vector_store %arg7[%c0_28, %c0_29], %55 {strides = array<i32>} : memref<2x512xbf16, #tpu.memory_space<vmem>>, vector<2x512xbf16>,
    } else {
    }
    return
  }
  func.func @transform_0(%arg0: i32, %arg1: i32) -> (i32, i32) {
    %c0_i32 = arith.constant 0 : i32
    %c0_i32_0 = arith.constant 0 : i32
    return %c0_i32, %arg1 : i32, i32
  }
  func.func @transform_1(%arg0: i32, %arg1: i32) -> (i32, i32) {
    %c0_i32 = arith.constant 0 : i32
    return %arg1, %arg0 : i32, i32
  }
  func.func @transform_2(%arg0: i32, %arg1: i32) -> (i32, i32) {
    %c0_i32 = arith.constant 0 : i32
    %c0_i32_0 = arith.constant 0 : i32
    return %c0_i32, %arg0 : i32, i32
  }
  func.func @transform_3(%arg0: i32, %arg1: i32) -> (i32, i32) {
    %c0_i32 = arith.constant 0 : i32
    %c0_i32_0 = arith.constant 0 : i32
    return %c0_i32, %arg0 : i32, i32
  }
  func.func @transform_4(%arg0: i32, %arg1: i32) -> (i32, i32) {
    %c0_i32 = arith.constant 0 : i32
    %c0_i32_0 = arith.constant 0 : i32
    return %c0_i32, %arg0 : i32, i32
  }
  func.func @transform_5(%arg0: i32, %arg1: i32) -> (i32, i32) {
    %c0_i32 = arith.constant 0 : i32
    %c0_i32_0 = arith.constant 0 : i32
    return %c0_i32, %arg0 : i32, i32
  }
}

module attributes {stable_mosaic.version = 11 : i64} {
  func.func @_fused_kernel(%arg0: i32, %arg1: i32, %arg2: memref<2x512xbf16, #tpu.memory_space<vmem>>, %arg3: memref<512x128xbf16, #tpu.memory_space<vmem>>, %arg4: memref<1x128xf32, #tpu.memory_space<vmem>>, %arg5: memref<2x128xf32, #tpu.memory_space<vmem>>, %arg6: memref<2x128xf32, #tpu.memory_space<vmem>>) attributes {dimension_semantics = [#tpu.dimension_semantics<parallel>, #tpu.dimension_semantics<arbitrary>], iteration_bounds = array<i64: 1, 8>, scalar_prefetch = 0 : i64, scratch_operands = 1 : i64, tpu.core_type = #tpu.core_type<tc>, window_params = [{transform_indices = @transform_0, window_bounds = array<i64: 2, 512>}, {transform_indices = @transform_1, window_bounds = array<i64: 512, 128>}, {transform_indices = @transform_2, window_bounds = array<i64: 1, 128>}, {transform_indices = @transform_3, window_bounds = array<i64: 2, 128>}]} {
    %c0_i32 = arith.constant 0 : i32
    %0 = arith.cmpi eq, %arg1, %c0_i32 : i32
    %1 = arith.extui %0 : i1 to i32
    %c0_i32_0 = arith.constant 0 : i32
    %2 = arith.cmpi ne, %1, %c0_i32_0 : i32
    scf.if %2 {
      %cst_9 = arith.constant 0.000000e+00 : f32
      %12 = vector.broadcast %cst_9 : f32 to vector<2x128xf32>
      %c0_10 = arith.constant 0 : index
      %c0_11 = arith.constant 0 : index
      %13 = vector.load %arg6[%c0_10, %c0_11] : memref<2x128xf32, #tpu.memory_space<vmem>>, vector<2x128xf32>
      tpu.vector_store %arg6[%c0_10, %c0_11], %12 {strides = array<i32>} : memref<2x128xf32, #tpu.memory_space<vmem>>, vector<2x128xf32>,
    } else {
    }
    %c0 = arith.constant 0 : index
    %c0_1 = arith.constant 0 : index
    %3 = vector.load %arg6[%c0, %c0_1] : memref<2x128xf32, #tpu.memory_space<vmem>>, vector<2x128xf32>
    %c0_2 = arith.constant 0 : index
    %c0_3 = arith.constant 0 : index
    %4 = vector.load %arg2[%c0_2, %c0_3] : memref<2x512xbf16, #tpu.memory_space<vmem>>, vector<2x512xbf16>
    %c0_4 = arith.constant 0 : index
    %c0_5 = arith.constant 0 : index
    %5 = vector.load %arg3[%c0_4, %c0_5] : memref<512x128xbf16, #tpu.memory_space<vmem>>, vector<512x128xbf16>
    %cst = arith.constant dense<0.000000e+00> : vector<2x128xf32>
    %6 = tpu.matmul %4, %5, %cst {dimension_numbers = #tpu.dot_dimension_numbers<[1], [0], [0], [1], [0, 0, 1, 1], [], []>} : vector<2x512xbf16>, vector<512x128xbf16>, vector<2x128xf32> -> vector<2x128xf32>
    %7 = arith.addf %3, %6 : vector<2x128xf32>
    %c0_6 = arith.constant 0 : index
    %c0_7 = arith.constant 0 : index
    %8 = vector.load %arg6[%c0_6, %c0_7] : memref<2x128xf32, #tpu.memory_space<vmem>>, vector<2x128xf32>
    tpu.vector_store %arg6[%c0_6, %c0_7], %7 {strides = array<i32>} : memref<2x128xf32, #tpu.memory_space<vmem>>, vector<2x128xf32>,
    %c7_i32 = arith.constant 7 : i32
    %9 = arith.cmpi eq, %arg1, %c7_i32 : i32
    %10 = arith.extui %9 : i1 to i32
    %c0_i32_8 = arith.constant 0 : i32
    %11 = arith.cmpi ne, %10, %c0_i32_8 : i32
    scf.if %11 {
      %c0_9 = arith.constant 0 : index
      %c0_10 = arith.constant 0 : index
      %12 = vector.load %arg6[%c0_9, %c0_10] : memref<2x128xf32, #tpu.memory_space<vmem>>, vector<2x128xf32>
      %c0_11 = arith.constant 0 : index
      %c0_12 = arith.constant 0 : index
      %13 = vector.load %arg4[%c0_11, %c0_12] : memref<1x128xf32, #tpu.memory_space<vmem>>, vector<1x128xf32>
      %14 = vector.broadcast %13 : vector<1x128xf32> to vector<2x128xf32>
      %15 = arith.addf %12, %14 : vector<2x128xf32>
      %c0_13 = arith.constant 0 : index
      %c0_14 = arith.constant 0 : index
      %16 = vector.load %arg5[%c0_13, %c0_14] : memref<2x128xf32, #tpu.memory_space<vmem>>, vector<2x128xf32>
      tpu.vector_store %arg5[%c0_13, %c0_14], %15 {strides = array<i32>} : memref<2x128xf32, #tpu.memory_space<vmem>>, vector<2x128xf32>,
    } else {
    }
    return
  }
  func.func @transform_0(%arg0: i32, %arg1: i32) -> (i32, i32) {
    %c0_i32 = arith.constant 0 : i32
    %c0_i32_0 = arith.constant 0 : i32
    return %c0_i32, %arg1 : i32, i32
  }
  func.func @transform_1(%arg0: i32, %arg1: i32) -> (i32, i32) {
    %c0_i32 = arith.constant 0 : i32
    return %arg1, %arg0 : i32, i32
  }
  func.func @transform_2(%arg0: i32, %arg1: i32) -> (i32, i32) {
    %c0_i32 = arith.constant 0 : i32
    %c0_i32_0 = arith.constant 0 : i32
    return %c0_i32, %arg0 : i32, i32
  }
  func.func @transform_3(%arg0: i32, %arg1: i32) -> (i32, i32) {
    %c0_i32 = arith.constant 0 : i32
    %c0_i32_0 = arith.constant 0 : i32
    return %c0_i32, %arg0 : i32, i32
  }
}

</mosaic_0001>

<bundles_post_ra>
// kernel: encoder_forward.6
= control target key start
LH: loop header
LB: loop body
LE: loop exit
PB: predicated region body
PF: predicated region fallthrough
CT: control target
= control target key end

     0   :  { %v2389_v0 = vmov 0.0   ;;  %vm2390_vm0 = vmmov 0   ;;  %s3252_s1 = inlined_call_operand.vmem [shape: bf16[128,128], index: 1, kind: input, shape index: {}]   ;;  %s3253_s0 = inlined_call_operand.vmem [shape: bf16[450,128], index: 0, kind: input, shape index: {}]   ;;  %s3254_s2 = inlined_call_operand.vmem [shape: f32[1,128], index: 2, kind: input, shape index: {}]   ;;  %s3255_s3 = inlined_call_operand.vmem [shape: bf16[450,128], index: 3, kind: output, shape index: {}]  }
   0x1   :  { %2087 = vmatprep.subr.bf16.mxu0 %v2389_v0  ;;  %75 = vst [vmem:[#allocation2 + $0x1c0] sm:$0x3] %v2389_v0  ;;  %2219 = vmatprep.subr.bf16.mxu1 %v2389_v0  ;;  %v2237_v1 = vld [vmem:[%s3252_s1] sm:$0xff]   ;;  %v2238_v2 = vld [vmem:[%s3252_s1 + $0x8] sm:$0xff]   ;;  %v2239_v3 = vld [vmem:[%s3252_s1 + $0x10] sm:$0xff]  }
   0x2   :  { %2103 = vmatprep.mubr.msk.bf16.mxu0 %vm2390_vm0, %v2389_v0  ;;  %2163 = vmatprep.mubr.msk.bf16.mxu1 %vm2390_vm0, %v2389_v0  ;;  %v2240_v4 = vld [vmem:[%s3252_s1 + $0x18] sm:$0xff]   ;;  %v2241_v5 = vld [vmem:[%s3252_s1 + $0x20] sm:$0xff]   ;;  %v2242_v6 = vld [vmem:[%s3252_s1 + $0x28] sm:$0xff]  }
   0x3   :  { %2088 = vmatpush3.bf16.msra.mxu0 %v2237_v1  ;;  %2227 = vmatpush3.bf16.msra.mxu1 %v2237_v1  ;;  %v2243_v7 = vld [vmem:[%s3252_s1 + $0x30] sm:$0xff]   ;;  %v2244_v8 = vld [vmem:[%s3252_s1 + $0x38] sm:$0xff]   ;;  %v2245_v9 = vld [vmem:[%s3253_s0] sm:$0xff]  }
   0x4   :  { %2089 = vmatprep.subr.bf16.mxu0 %v2389_v0  ;;  %2220 = vmatprep.subr.bf16.mxu1 %v2389_v0  ;;  %v2246_v10 = vld [vmem:[%s3253_s0 + $0x78] sm:$0xff]   ;;  %v2247_v11 = vld [vmem:[%s3253_s0 + $0x8] sm:$0xff]   ;;  %v2248_v12 = vld [vmem:[%s3253_s0 + $0x80] sm:$0xff]  }
   0x5   :  { %v2249_v13 = vld [vmem:[%s3253_s0 + $0x10] sm:$0xff]   ;;  %v2250_v14 = vld [vmem:[%s3253_s0 + $0x88] sm:$0xff]   ;;  %v2251_v15 = vld [vmem:[%s3253_s0 + $0x18] sm:$0xff]  }
   0x6   :  { %v2252_v16 = vld [vmem:[%s3253_s0 + $0x90] sm:$0xff]   ;;  %v2253_v17 = vld [vmem:[%s3253_s0 + $0x20] sm:$0xff]   ;;  %v2254_v18 = vld [vmem:[%s3253_s0 + $0x98] sm:$0xff]  }
   0x7   :  { %2090 = vmatpush3.bf16.msra.mxu0 %v2238_v2  ;;  %2228 = vmatpush3.bf16.msra.mxu1 %v2238_v2  ;;  %v2255_v19 = vld [vmem:[%s3253_s0 + $0x28] sm:$0xff]   ;;  %v2256_v20 = vld [vmem:[%s3253_s0 + $0xa0] sm:$0xff]   ;;  %v2257_v21 = vld [vmem:[%s3253_s0 + $0x30] sm:$0xff]  }
   0x8   :  { %2091 = vmatprep.subr.bf16.mxu0 %v2389_v0  ;;  %2221 = vmatprep.subr.bf16.mxu1 %v2389_v0  ;;  %v2258_v22 = vld [vmem:[%s3253_s0 + $0xa8] sm:$0xff]   ;;  %v2259_v23 = vld [vmem:[%s3253_s0 + $0x38] sm:$0xff]   ;;  %v2260_v24 = vld [vmem:[%s3253_s0 + $0xb0] sm:$0xff]  }
   0x9   :  { %v2261_v25 = vld [vmem:[%s3253_s0 + $0x40] sm:$0xff]   ;;  %v2262_v26 = vld [vmem:[%s3253_s0 + $0xb8] sm:$0xff]   ;;  %v2263_v27 = vld [vmem:[%s3253_s0 + $0x48] sm:$0xff]  }
   0xa   :  { %v2264_v28 = vld [vmem:[%s3253_s0 + $0xc0] sm:$0xff]   ;;  %v2265_v29 = vld [vmem:[%s3253_s0 + $0x50] sm:$0xff]   ;;  %v2266_v30 = vld [vmem:[%s3253_s0 + $0xc8] sm:$0xff]  }
   0xb   :  { %2092 = vmatpush3.bf16.msra.mxu0 %v2239_v3  ;;  %2229 = vmatpush3.bf16.msra.mxu1 %v2239_v3  ;;  %v2267_v31 = vld [vmem:[%s3253_s0 + $0x58] sm:$0xff]   ;;  %v2268_v32 = vld [vmem:[%s3253_s0 + $0xd0] sm:$0xff]   ;;  %v2269_v33 = vld [vmem:[%s3253_s0 + $0x60] sm:$0xff]  }
   0xc   :  { %2093 = vmatprep.subr.bf16.mxu0 %v2389_v0  ;;  %2222 = vmatprep.subr.bf16.mxu1 %v2389_v0  ;;  %v2270_v34 = vld [vmem:[%s3253_s0 + $0xd8] sm:$0xff]   ;;  %v2271_v35 = vld [vmem:[%s3253_s0 + $0x68] sm:$0xff]   ;;  %v2272_v36 = vld [vmem:[%s3253_s0 + $0xe0] ss:$0 sps:$4 sm:$0x11]  }
   0xd   :  { %v2273_v37 = vld [vmem:[%s3253_s0 + $0x70] sm:$0xff]   ;;  %v2600_v39 = vld [vmem:[%s3254_s2] ss:$0 sm:$0xff] }
   0xf   :  { %2094 = vmatpush3.bf16.msra.mxu0 %v2240_v4  ;;  %2230 = vmatpush3.bf16.msra.mxu1 %v2240_v4 }
  0x10   :  { %2095 = vmatprep.subr.bf16.mxu0 %v2389_v0  ;;  %2223 = vmatprep.subr.bf16.mxu1 %v2389_v0 }
  0x13   :  { %2096 = vmatpush3.bf16.msra.mxu0 %v2241_v5  ;;  %2231 = vmatpush3.bf16.msra.mxu1 %v2241_v5 }
  0x14   :  { %2097 = vmatprep.subr.bf16.mxu0 %v2389_v0  ;;  %2224 = vmatprep.subr.bf16.mxu1 %v2389_v0 }
  0x17   :  { %2098 = vmatpush3.bf16.msra.mxu0 %v2242_v6  ;;  %2232 = vmatpush3.bf16.msra.mxu1 %v2242_v6 }
  0x18   :  { %2099 = vmatprep.subr.bf16.mxu0 %v2389_v0  ;;  %2225 = vmatprep.subr.bf16.mxu1 %v2389_v0 }
  0x1b   :  { %2100 = vmatpush3.bf16.msra.mxu0 %v2243_v7  ;;  %2233 = vmatpush3.bf16.msra.mxu1 %v2243_v7 }
  0x1c   :  { %2101 = vmatprep.subr.bf16.mxu0 %v2389_v0  ;;  %2226 = vmatprep.subr.bf16.mxu1 %v2389_v0 }
  0x1f   :  { %2102 = vmatpush3.bf16.msra.mxu0 %v2244_v8  ;;  %2234 = vmatpush3.bf16.msra.mxu1 %v2244_v8 }
  0x22   :  { %2104 = vmatmul.mubr.bf16.vlgmr.msra.gmra.mrb[0].mxu0 %v2245_v9  ;;  %2164 = vmatmul.mubr.bf16.vlgmr.msra.gmra.mrb[0].mxu1 %v2246_v10 }
  0x23   :  { %2107 = vmatprep.mubr.msk.bf16.mxu0 %vm2390_vm0, %v2389_v0  ;;  %2167 = vmatprep.mubr.msk.bf16.mxu1 %vm2390_vm0, %v2389_v0 }
  0x2a   :  { %2108 = vmatmul.mubr.bf16.gmra.mrb[4].mxu0 %v2247_v11  ;;  %2168 = vmatmul.mubr.bf16.gmra.mrb[4].mxu1 %v2248_v12 }
  0x2b   :  { %2111 = vmatprep.mubr.msk.bf16.mxu0 %vm2390_vm0, %v2389_v0  ;;  %2171 = vmatprep.mubr.msk.bf16.mxu1 %vm2390_vm0, %v2389_v0 }
  0x32   :  { %2112 = vmatmul.mubr.bf16.gmra.mrb[8].mxu0 %v2249_v13  ;;  %2172 = vmatmul.mubr.bf16.gmra.mrb[8].mxu1 %v2250_v14 }
  0x33   :  { %2115 = vmatprep.mubr.msk.bf16.mxu0 %vm2390_vm0, %v2389_v0  ;;  %2175 = vmatprep.mubr.msk.bf16.mxu1 %vm2390_vm0, %v2389_v0 }
  0x3a   :  { %2116 = vmatmul.mubr.bf16.gmra.mrb[12].mxu0 %v2251_v15  ;;  %2176 = vmatmul.mubr.bf16.gmra.mrb[12].mxu1 %v2252_v16 }
  0x3b   :  { %2119 = vmatprep.mubr.msk.bf16.mxu0 %vm2390_vm0, %v2389_v0  ;;  %2179 = vmatprep.mubr.msk.bf16.mxu1 %vm2390_vm0, %v2389_v0 }
  0x42   :  { %2120 = vmatmul.mubr.bf16.gmra.mrb[16].mxu0 %v2253_v17  ;;  %2180 = vmatmul.mubr.bf16.gmra.mrb[16].mxu1 %v2254_v18 }
  0x43   :  { %2123 = vmatprep.mubr.msk.bf16.mxu0 %vm2390_vm0, %v2389_v0  ;;  %2183 = vmatprep.mubr.msk.bf16.mxu1 %vm2390_vm0, %v2389_v0 }
  0x4a   :  { %2124 = vmatmul.mubr.bf16.gmra.mrb[20].mxu0 %v2255_v19  ;;  %2184 = vmatmul.mubr.bf16.gmra.mrb[20].mxu1 %v2256_v20 }
  0x4b   :  { %2127 = vmatprep.mubr.msk.bf16.mxu0 %vm2390_vm0, %v2389_v0  ;;  %2187 = vmatprep.mubr.msk.bf16.mxu1 %vm2390_vm0, %v2389_v0 }
  0x52   :  { %2128 = vmatmul.mubr.bf16.gmra.mrb[24].mxu0 %v2257_v21  ;;  %2188 = vmatmul.mubr.bf16.gmra.mrb[24].mxu1 %v2258_v22 }
  0x53   :  { %2131 = vmatprep.mubr.msk.bf16.mxu0 %vm2390_vm0, %v2389_v0  ;;  %2191 = vmatprep.mubr.msk.bf16.mxu1 %vm2390_vm0, %v2389_v0 }
  0x5a   :  { %2132 = vmatmul.mubr.bf16.gmra.mrb[28].mxu0 %v2259_v23  ;;  %2192 = vmatmul.mubr.bf16.gmra.mrb[28].mxu1 %v2260_v24 }
  0x5b   :  { %2135 = vmatprep.mubr.msk.bf16.mxu0 %vm2390_vm0, %v2389_v0  ;;  %2195 = vmatprep.mubr.msk.bf16.mxu1 %vm2390_vm0, %v2389_v0 }
  0x62   :  { %2136 = vmatmul.mubr.bf16.gmra.mrb[32].mxu0 %v2261_v25  ;;  %2196 = vmatmul.mubr.bf16.gmra.mrb[32].mxu1 %v2262_v26 }
  0x63   :  { %2139 = vmatprep.mubr.msk.bf16.mxu0 %vm2390_vm0, %v2389_v0  ;;  %2199 = vmatprep.mubr.msk.bf16.mxu1 %vm2390_vm0, %v2389_v0 }
  0x6a   :  { %2140 = vmatmul.mubr.bf16.gmra.mrb[36].mxu0 %v2263_v27  ;;  %2200 = vmatmul.mubr.bf16.gmra.mrb[36].mxu1 %v2264_v28 }
  0x6b   :  { %2143 = vmatprep.mubr.msk.bf16.mxu0 %vm2390_vm0, %v2389_v0  ;;  %2203 = vmatprep.mubr.msk.bf16.mxu1 %vm2390_vm0, %v2389_v0 }
  0x72   :  { %2144 = vmatmul.mubr.bf16.gmra.mrb[40].mxu0 %v2265_v29  ;;  %2204 = vmatmul.mubr.bf16.gmra.mrb[40].mxu1 %v2266_v30 }
  0x73   :  { %2147 = vmatprep.mubr.msk.bf16.mxu0 %vm2390_vm0, %v2389_v0  ;;  %2207 = vmatprep.mubr.msk.bf16.mxu1 %vm2390_vm0, %v2389_v0 }
  0x7a   :  { %2148 = vmatmul.mubr.bf16.gmra.mrb[44].mxu0 %v2267_v31  ;;  %2208 = vmatmul.mubr.bf16.gmra.mrb[44].mxu1 %v2268_v32 }
  0x7b   :  { %2151 = vmatprep.mubr.msk.bf16.mxu0 %vm2390_vm0, %v2389_v0  ;;  %2211 = vmatprep.mubr.msk.bf16.mxu1 %vm2390_vm0, %v2389_v0 }
  0x82   :  { %2152 = vmatmul.mubr.bf16.gmra.mrb[48].mxu0 %v2269_v33  ;;  %2212 = vmatmul.mubr.bf16.gmra.mrb[48].mxu1 %v2270_v34 }
  0x83   :  { %2155 = vmatprep.mubr.msk.bf16.mxu0 %vm2390_vm0, %v2389_v0  ;;  %2215 = vmatprep.mubr.msk.bf16.mxu1 %vm2390_vm0, %v2389_v0 }
  0x8a   :  { %2156 = vmatmul.mubr.bf16.gmra.mrb[52].mxu0 %v2271_v35  ;;  %2216 = vmatmul.mubr.bf16.gmra.mrb[52].mxu1 %v2272_v36 }
  0x8b   :  { %2159 = vmatprep.mubr.msk.bf16.mxu0 %vm2390_vm0, %v2389_v0 }
  0x92   :  { %2160 = vmatmul.mubr.bf16.gmra.mrb[56].mxu0 %v2273_v37 }
  0xf5   :  { %v460_v38 = vpop.f32.mrb[0].mxu0  ;;  %v580_v40 = vpop.f32.mrb[0].mxu1 }
  0xf6   :  { %v2105_v41 = vpop.f32.mrb[1].mxu0  ;;  %v2165_v42 = vpop.f32.mrb[1].mxu1  ;;  %v871_v45 = vadd.f32 %v2600_v39, %v460_v38  ;;  %v2604_v46 = vadd.f32 %v2600_v39, %v580_v40 }
  0xf7   :  { %v463_v43 = vpop.f32.mrb[2].mxu0  ;;  %v583_v44 = vpop.f32.mrb[2].mxu1 }
  0xf8   :  { %v2106_v47 = vpop.f32.mrb[3].mxu0  ;;  %v2166_v48 = vpop.f32.mrb[3].mxu1  ;;  %v985_v49 = vmul.f32 0.044715, %v871_v45  ;;  %v1015_v50 = vmul.f32 0.044715, %v2604_v46  ;;  %v872_v51 = vadd.f32 %v2600_v39, %v463_v43  ;;  %v2609_v52 = vadd.f32 %v2600_v39, %v583_v44 }
  0xf9   :  { %v928_v31 = vmul.f32 0.5, %v871_v45  ;;  %v958_v43 = vmul.f32 0.5, %v2604_v46 }
  0xfa   :  { %v1042_v53 = vmul.f32 %v985_v49, %v871_v45  ;;  %v1072_v54 = vmul.f32 %v1015_v50, %v2604_v46  ;;  %v986_v55 = vmul.f32 0.044715, %v872_v51  ;;  %v1016_v56 = vmul.f32 0.044715, %v2609_v52 }
  0xfb   :  { %v929_v48 = vmul.f32 0.5, %v872_v51 }
  0xfc   :  { %v1099_v57 = vmul.f32 %v1042_v53, %v871_v45  ;;  %v1129_v58 = vmul.f32 %v1072_v54, %v2604_v46  ;;  %v1043_v61 = vmul.f32 %v986_v55, %v872_v51  ;;  %v1073_v62 = vmul.f32 %v1016_v56, %v2609_v52 }
  0xfd   :  { %v468_v59 = vpop.f32.mrb[4].mxu0  ;;  %v588_v60 = vpop.f32.mrb[4].mxu1 }
  0xfe   :  { %v2109_v63 = vpop.f32.mrb[5].mxu0  ;;  %v2169_v0 = vpop.f32.mrb[5].mxu1  ;;  %v1156_v1 = vadd.f32 %v1099_v57, %v871_v45  ;;  %v1186_v2 = vadd.f32 %v1129_v58, %v2604_v46  ;;  %v1100_v5 = vmul.f32 %v1043_v61, %v872_v51  ;;  %v1130_v6 = vmul.f32 %v1073_v62, %v2609_v52 }
  0xff   :  { %v471_v3 = vpop.f32.mrb[6].mxu0  ;;  %v591_v4 = vpop.f32.mrb[6].mxu1  ;;  %v2618_v7 = vadd.f32 %v2600_v39, %v468_v59  ;;  %v2621_v8 = vadd.f32 %v2600_v39, %v588_v60  ;;  %v959_v59 = vmul.f32 0.5, %v2609_v52 }
 0x100   :  { %v2110_v9 = vpop.f32.mrb[7].mxu0  ;;  %v2170_v10 = vpop.f32.mrb[7].mxu1  ;;  %v1213_v11 = vmul.f32 0.7978846, %v1156_v1  ;;  %v1243_v12 = vmul.f32 0.7978846, %v1186_v2  ;;  %v1157_v13 = vadd.f32 %v1100_v5, %v872_v51  ;;  %v1187_v14 = vadd.f32 %v1130_v6, %v2609_v52 }
 0x101   :  { %v987_v15 = vmul.f32 0.044715, %v2618_v7  ;;  %v1017_v16 = vmul.f32 0.044715, %v2621_v8  ;;  %v2627_v17 = vadd.f32 %v2600_v39, %v471_v3  ;;  %v2633_v25 = vadd.f32 %v2600_v39, %v591_v4 }
 0x102   :  { %2274 = vtanh.f32 %v1213_v11  ;;  %v1214_v18 = vmul.f32 0.7978846, %v1157_v13  ;;  %v1244_v19 = vmul.f32 0.7978846, %v1187_v14  ;;  %v930_v14 = vmul.f32 0.5, %v2618_v7 }
 0x103   :  { %2276 = vtanh.f32 %v1243_v12  ;;  %v1044_v20 = vmul.f32 %v987_v15, %v2618_v7  ;;  %v1074_v23 = vmul.f32 %v1017_v16, %v2621_v8  ;;  %v988_v24 = vmul.f32 0.044715, %v2627_v17 }
 0x104   :  { %2278 = vtanh.f32 %v1214_v18  ;;  %v1018_v37 = vmul.f32 0.044715, %v2633_v25 }
 0x105   :  { %v476_v21 = vpop.f32.mrb[8].mxu0  ;;  %v596_v22 = vpop.f32.mrb[8].mxu1  ;;  %v1101_v28 = vmul.f32 %v1044_v20, %v2618_v7  ;;  %2280 = vtanh.f32 %v1244_v19  ;;  %v1131_v32 = vmul.f32 %v1074_v23, %v2621_v8  ;;  %v1045_v33 = vmul.f32 %v988_v24, %v2627_v17 }
 0x106   :  { %v2113_v26 = vpop.f32.mrb[9].mxu0  ;;  %v2173_v27 = vpop.f32.mrb[9].mxu1  ;;  %v2641_v38 = vadd.f32 %v2600_v39, %v476_v21  ;;  %v2644_v40 = vadd.f32 %v2600_v39, %v596_v22  ;;  %v1075_v45 = vmul.f32 %v1018_v37, %v2633_v25 }
 0x107   :  { %v479_v29 = vpop.f32.mrb[10].mxu0  ;;  %v599_v30 = vpop.f32.mrb[10].mxu1  ;;  %v1158_v36 = vadd.f32 %v1101_v28, %v2618_v7  ;;  %v1188_v41 = vadd.f32 %v1131_v32, %v2621_v8  ;;  %v1102_v42 = vmul.f32 %v1045_v33, %v2627_v17 }
 0x108   :  { %v2114_v34 = vpop.f32.mrb[11].mxu0  ;;  %v2174_v35 = vpop.f32.mrb[11].mxu1  ;;  %v989_v47 = vmul.f32 0.044715, %v2641_v38  ;;  %v1019_v53 = vmul.f32 0.044715, %v2644_v40  ;;  %v1132_v54 = vmul.f32 %v1075_v45, %v2633_v25  ;;  %v2656_v56 = vadd.f32 %v2600_v39, %v479_v29 }
 0x109   :  { %v1215_v44 = vmul.f32 0.7978846, %v1158_v36  ;;  %v1245_v49 = vmul.f32 0.7978846, %v1188_v41  ;;  %v1159_v50 = vadd.f32 %v1102_v42, %v2627_v17  ;;  %v2663_v3 = vadd.f32 %v2600_v39, %v599_v30 }
 0x10a   :  { %v1046_v55 = vmul.f32 %v989_v47, %v2641_v38  ;;  %v1076_v60 = vmul.f32 %v1019_v53, %v2644_v40  ;;  %v1189_v1 = vadd.f32 %v1132_v54, %v2633_v25  ;;  %v990_v9 = vmul.f32 0.044715, %v2656_v56 }
 0x10b   :  { %2282 = vtanh.f32 %v1215_v44  ;;  %v1216_v51 = vmul.f32 0.7978846, %v1159_v50  ;;  %v1020_v26 = vmul.f32 0.044715, %v2663_v3  ;;  %v960_v50 = vmul.f32 0.5, %v2621_v8 }
 0x10c   :  { %v2275_v58 = vpop.eup %2274  ;;  %2284 = vtanh.f32 %v1245_v49  ;;  %v1103_v2 = vmul.f32 %v1046_v55, %v2641_v38  ;;  %v1133_v52 = vmul.f32 %v1076_v60, %v2644_v40  ;;  %v1246_v15 = vmul.f32 0.7978846, %v1189_v1 }
 0x10d   :  { %v484_v46 = vpop.f32.mrb[12].mxu0  ;;  %v604_v57 = vpop.f32.mrb[12].mxu1  ;;  %v1327_v0 = vadd.f32 1.0, %v2275_v58  ;;  %2286 = vtanh.f32 %v1216_v51  ;;  %v1047_v22 = vmul.f32 %v990_v9, %v2656_v56  ;;  %v1077_v30 = vmul.f32 %v1020_v26, %v2663_v3 }
 0x10e   :  { %v2117_v61 = vpop.f32.mrb[13].mxu0  ;;  %v2177_v62 = vpop.f32.mrb[13].mxu1  ;;  %v1160_v16 = vadd.f32 %v1103_v2, %v2641_v38  ;;  %v1190_v21 = vadd.f32 %v1133_v52, %v2644_v40  ;;  %2288 = vtanh.f32 %v1246_v15  ;;  %v2680_v35 = vadd.f32 %v2600_v39, %v484_v46 }
 0x10f   :  { %v2277_v63 = vpop.eup %2276  ;;  %v487_v4 = vpop.f32.mrb[14].mxu0  ;;  %v1384_v13 = vmul.f32 %v1327_v0, %v928_v31  ;;  %v1104_v29 = vmul.f32 %v1047_v22, %v2656_v56  ;;  %v2684_v44 = vadd.f32 %v2600_v39, %v604_v57  ;;  %v931_v55 = vmul.f32 0.5, %v2627_v17 }
 0x110   :  { %v2665_v5 = vpop.f32.mrb[14].mxu1  ;;  %v1357_v6 = vadd.f32 1.0, %v2277_v63  ;;  %v2118_v10 = vpop.f32.mrb[15].mxu0  ;;  %v1217_v24 = vmul.f32 0.7978846, %v1160_v16  ;;  %v961_v46 = vmul.f32 0.5, %v2633_v25  ;;  %v2705_v62 = vadd.f32 %v2600_v39, %v487_v4 }
 0x111   :  { %v2178_v11 = vpop.f32.mrb[15].mxu1  ;;  %v2279_v12 = vpop.eup %2278  ;;  %v1247_v28 = vmul.f32 0.7978846, %v1190_v21  ;;  %v1161_v34 = vadd.f32 %v1104_v29, %v2656_v56  ;;  %v991_v54 = vmul.f32 0.044715, %v2680_v35  ;;  %v932_v8 = vmul.f32 0.5, %v2641_v38 }
 0x112   :  { %v2281_v18 = vpop.eup %2280  ;;  %v1414_v19 = vmul.f32 %v1357_v6, %v958_v43  ;;  %v1328_v20 = vadd.f32 1.0, %v2279_v12  ;;  %2290 = vtanh.f32 %v1217_v24  ;;  %v1134_v43 = vmul.f32 %v1077_v30, %v2663_v3 }
 0x113   :  { %v1358_v23 = vadd.f32 1.0, %v2281_v18  ;;  %2292 = vtanh.f32 %v1247_v28  ;;  %v1218_v53 = vmul.f32 0.7978846, %v1161_v34  ;;  %v1021_v58 = vmul.f32 0.044715, %v2684_v44 }
 0x114   :  { %v1385_v27 = vmul.f32 %v1328_v20, %v929_v48  ;;  %v1191_v57 = vadd.f32 %v1134_v43, %v2663_v3  ;;  %v1048_v61 = vmul.f32 %v991_v54, %v2680_v35  ;;  %v992_v6 = vmul.f32 0.044715, %v2705_v62 }
 0x115   :  { %v1415_v7 = vmul.f32 %v1358_v23, %v959_v59  ;;  %v492_v31 = vpop.f32.mrb[16].mxu0  ;;  %v2676_v32 = vpop.f32.mrb[16].mxu1  ;;  %2294 = vtanh.f32 %v1218_v53  ;;  %v1078_v25 = vmul.f32 %v1021_v58, %v2684_v44  ;;  %v962_v30 = vmul.f32 0.5, %v2644_v40 }
 0x116   :  { %v1886_v33 = vpack.c.bf16 %v1385_v27, %v1384_v13  ;;  %v2121_v36 = vpop.f32.mrb[17].mxu0  ;;  %v2181_v37 = vpop.f32.mrb[17].mxu1  ;;  %v1248_v17 = vmul.f32 0.7978846, %v1191_v57  ;;  %v1105_v2 = vmul.f32 %v1048_v61, %v2680_v35  ;;  %v1049_v13 = vmul.f32 %v992_v6, %v2705_v62 }
 0x117   :  { %v2283_v41 = vpop.eup %2282  ;;  %v1961_v42 = vpack.c.bf16 %v1415_v7, %v1414_v19  ;;  %v2686_v45 = vpop.f32.mrb[18].mxu0  ;;  %v1135_v38 = vmul.f32 %v1078_v25, %v2684_v44  ;;  %v2726_v29 = vadd.f32 %v2600_v39, %v492_v31  ;;  %v963_v43 = vmul.f32 0.5, %v2663_v3 }
 0x118   :  { %v2688_v47 = vpop.f32.mrb[18].mxu1  ;;  %v2285_v48 = vpop.eup %2284  ;;  %1887 = vst [vmem:[%s3255_s3] sm:$0xff] %v1886_v33   ;;  %v1329_v49 = vadd.f32 1.0, %v2283_v41  ;;  %2296 = vtanh.f32 %v1248_v17  ;;  %v1162_v12 = vadd.f32 %v1105_v2, %v2680_v35  ;;  %v1106_v28 = vmul.f32 %v1049_v13, %v2705_v62 }
 0x119   :  { %2037 = vst [vmem:[%s3255_s3 + $0x78] sm:$0xff] %v1961_v42   ;;  %v2122_v59 = vpop.f32.mrb[19].mxu0  ;;  %v2182_v51 = vpop.f32.mrb[19].mxu1  ;;  %v1359_v63 = vadd.f32 1.0, %v2285_v48  ;;  %v1192_v21 = vadd.f32 %v1135_v38, %v2684_v44  ;;  %v933_v33 = vmul.f32 0.5, %v2656_v56 }
 0x11a   :  { %v2287_v60 = vpop.eup %2286  ;;  %v1386_v1 = vmul.f32 %v1329_v49, %v930_v14  ;;  %v2717_v14 = vadd.f32 %v2600_v39, %v2665_v5  ;;  %v1219_v27 = vmul.f32 0.7978846, %v1162_v12  ;;  %v1163_v42 = vadd.f32 %v1106_v28, %v2705_v62 }
 0x11b   :  { %v1330_v0 = vadd.f32 1.0, %v2287_v60  ;;  %v2289_v52 = vpop.eup %2288  ;;  %v1416_v19 = vmul.f32 %v1359_v63, %v960_v50  ;;  %v1249_v34 = vmul.f32 0.7978846, %v1192_v21  ;;  %v993_v56 = vmul.f32 0.044715, %v2726_v29 }
 0x11c   :  { %v1360_v4 = vadd.f32 1.0, %v2289_v52  ;;  %v2291_v18 = vpop.eup %2290  ;;  %v1022_v36 = vmul.f32 0.044715, %v2717_v14  ;;  %2298 = vtanh.f32 %v1219_v27  ;;  %v1220_v40 = vmul.f32 0.7978846, %v1163_v42 }
 0x11d   :  { %v1387_v9 = vmul.f32 %v1330_v0, %v931_v55  ;;  %v500_v10 = vpop.f32.mrb[20].mxu0  ;;  %v2711_v11 = vpop.f32.mrb[20].mxu1  ;;  %v1331_v41 = vadd.f32 1.0, %v2291_v18  ;;  %2300 = vtanh.f32 %v1249_v34  ;;  %v2743_v50 = vadd.f32 %v2600_v39, %v2676_v32 }
 0x11e   :  { %v2125_v15 = vpop.f32.mrb[21].mxu0  ;;  %v2185_v16 = vpop.f32.mrb[21].mxu1  ;;  %v1417_v26 = vmul.f32 %v1360_v4, %v961_v46  ;;  %v1079_v48 = vmul.f32 %v1022_v36, %v2717_v14  ;;  %2302 = vtanh.f32 %v1220_v40  ;;  %v1050_v57 = vmul.f32 %v993_v56, %v2726_v29 }
 0x11f   :  { %v1891_v20 = vpack.c.bf16 %v1387_v9, %v1386_v1  ;;  %v2720_v22 = vpop.f32.mrb[22].mxu0  ;;  %v2722_v23 = vpop.f32.mrb[22].mxu1  ;;  %v1388_v46 = vmul.f32 %v1331_v41, %v932_v8  ;;  %v1023_v58 = vmul.f32 0.044715, %v2743_v50  ;;  %v2755_v63 = vadd.f32 %v2600_v39, %v2686_v45 }
 0x120   :  { %v2293_v24 = vpop.eup %2292  ;;  %v2126_v5 = vpop.f32.mrb[23].mxu0  ;;  %v1966_v37 = vpack.c.bf16 %v1417_v26, %v1416_v19  ;;  %v1136_v54 = vmul.f32 %v1079_v48, %v2717_v14  ;;  %v2759_v0 = vadd.f32 %v2600_v39, %v2688_v47  ;;  %v1107_v1 = vmul.f32 %v1050_v57, %v2726_v29 }
 0x121   :  { %v2186_v7 = vpop.f32.mrb[23].mxu1  ;;  %2023 = vst [vmem:[%s3255_s3 + $0x8] sm:$0xff] %v1891_v20   ;;  %v1361_v31 = vadd.f32 1.0, %v2293_v24  ;;  %v2295_v49 = vpop.eup %2294  ;;  %v1080_v2 = vmul.f32 %v1023_v58, %v2743_v50  ;;  %v2768_v6 = vadd.f32 %v2600_v39, %v500_v10  ;;  %v994_v4 = vmul.f32 0.044715, %v2755_v63 }
 0x122   :  { %2038 = vst [vmem:[%s3255_s3 + $0x80] sm:$0xff] %v1966_v37   ;;  %v1332_v53 = vadd.f32 1.0, %v2295_v49  ;;  %v2297_v60 = vpop.eup %2296  ;;  %v1193_v32 = vadd.f32 %v1136_v54, %v2717_v14  ;;  %v1164_v13 = vadd.f32 %v1107_v1, %v2726_v29  ;;  %v934_v16 = vmul.f32 0.5, %v2680_v35 }
 0x123   :  { %v1362_v25 = vadd.f32 1.0, %v2297_v60  ;;  %v1418_v47 = vmul.f32 %v1361_v31, %v962_v30  ;;  %v1137_v15 = vmul.f32 %v1080_v2, %v2743_v50  ;;  %v1051_v10 = vmul.f32 %v994_v4, %v2755_v63 }
 0x124   :  { %v1389_v61 = vmul.f32 %v1332_v53, %v933_v33  ;;  %v1250_v38 = vmul.f32 0.7978846, %v1193_v32  ;;  %v1024_v18 = vmul.f32 0.044715, %v2759_v0  ;;  %v1221_v21 = vmul.f32 0.7978846, %v1164_v13 }
 0x125   :  { %v2746_v55 = vpop.f32.mrb[24].mxu0  ;;  %v2748_v3 = vpop.f32.mrb[24].mxu1  ;;  %v1419_v12 = vmul.f32 %v1362_v25, %v963_v43  ;;  %v1194_v24 = vadd.f32 %v1137_v15, %v2743_v50  ;;  %v995_v26 = vmul.f32 0.044715, %v2768_v6  ;;  %v1108_v5 = vmul.f32 %v1051_v10, %v2755_v63 }
 0x126   :  { %v2129_v59 = vpop.f32.mrb[25].mxu0  ;;  %v2189_v51 = vpop.f32.mrb[25].mxu1  ;;  %v1896_v45 = vpack.c.bf16 %v1389_v61, %v1388_v46  ;;  %2304 = vtanh.f32 %v1250_v38  ;;  %v1081_v7 = vmul.f32 %v1024_v18, %v2759_v0  ;;  %v964_v33 = vmul.f32 0.5, %v2684_v44 }
 0x127   :  { %v2761_v8 = vpop.f32.mrb[26].mxu0  ;;  %v2763_v17 = vpop.f32.mrb[26].mxu1  ;;  %v1971_v20 = vpack.c.bf16 %v1419_v12, %v1418_v47  ;;  %2306 = vtanh.f32 %v1221_v21  ;;  %v1251_v34 = vmul.f32 0.7978846, %v1194_v24  ;;  %v1052_v36 = vmul.f32 %v995_v26, %v2768_v6 }
 0x128   :  { %v2130_v52 = vpop.f32.mrb[27].mxu0  ;;  %v2190_v9 = vpop.f32.mrb[27].mxu1  ;;  %2024 = vst [vmem:[%s3255_s3 + $0x10] sm:$0xff] %v1896_v45   ;;  %v935_v42 = vmul.f32 0.5, %v2705_v62  ;;  %v1165_v31 = vadd.f32 %v1108_v5, %v2755_v63  ;;  %v1138_v43 = vmul.f32 %v1081_v7, %v2759_v0  ;;  %v2797_v48 = vadd.f32 %v2600_v39, %v2711_v11 }
 0x129   :  { %v2299_v19 = vpop.eup %2298  ;;  %2039 = vst [vmem:[%s3255_s3 + $0x88] sm:$0xff] %v1971_v20   ;;  %2308 = vtanh.f32 %v1251_v34  ;;  %v1109_v53 = vmul.f32 %v1052_v36, %v2768_v6  ;;  %v2809_v60 = vadd.f32 %v2600_v39, %v2720_v22  ;;  %v965_v25 = vmul.f32 0.5, %v2717_v14 }
 0x12a   :  { %v2301_v27 = vpop.eup %2300  ;;  %v1333_v28 = vadd.f32 1.0, %v2299_v19  ;;  %v1222_v58 = vmul.f32 0.7978846, %v1165_v31  ;;  %v1195_v59 = vadd.f32 %v1138_v43, %v2759_v0  ;;  %v1025_v11 = vmul.f32 0.044715, %v2797_v48 }
 0x12b   :  { %v2303_v44 = vpop.eup %2302  ;;  %v1363_v56 = vadd.f32 1.0, %v2301_v27  ;;  %v1166_v51 = vadd.f32 %v1109_v53, %v2768_v6  ;;  %v996_v52 = vmul.f32 0.044715, %v2809_v60  ;;  %v2816_v38 = vadd.f32 %v2600_v39, %v2722_v23 }
 0x12c   :  { %v1390_v62 = vmul.f32 %v1333_v28, %v934_v16  ;;  %v1334_v57 = vadd.f32 1.0, %v2303_v44  ;;  %2310 = vtanh.f32 %v1222_v58  ;;  %v1252_v32 = vmul.f32 0.7978846, %v1195_v59 }
 0x12d   :  { %v2783_v30 = vpop.f32.mrb[28].mxu0  ;;  %v2785_v35 = vpop.f32.mrb[28].mxu1  ;;  %v1223_v1 = vmul.f32 0.7978846, %v1166_v51  ;;  %v1082_v2 = vmul.f32 %v1025_v11, %v2797_v48  ;;  %v2820_v22 = vadd.f32 %v2600_v39, %v2746_v55  ;;  %v936_v12 = vmul.f32 0.5, %v2726_v29 }
 0x12e   :  { %v2133_v37 = vpop.f32.mrb[29].mxu0  ;;  %v2193_v41 = vpop.f32.mrb[29].mxu1  ;;  %v1391_v61 = vmul.f32 %v1334_v57, %v935_v42  ;;  %2312 = vtanh.f32 %v1252_v32  ;;  %v1053_v15 = vmul.f32 %v996_v52, %v2809_v60  ;;  %v1420_v18 = vmul.f32 %v1363_v56, %v964_v33 }
 0x12f   :  { %v2799_v49 = vpop.f32.mrb[30].mxu0  ;;  %v2801_v40 = vpop.f32.mrb[30].mxu1  ;;  %v1139_v13 = vmul.f32 %v1082_v2, %v2797_v48  ;;  %2314 = vtanh.f32 %v1223_v1  ;;  %v1026_v23 = vmul.f32 0.044715, %v2816_v38  ;;  %v997_v55 = vmul.f32 0.044715, %v2820_v22 }
 0x130   :  { %v2134_v54 = vpop.f32.mrb[31].mxu0  ;;  %v2194_v46 = vpop.f32.mrb[31].mxu1  ;;  %v1901_v45 = vpack.c.bf16 %v1391_v61, %v1390_v62  ;;  %v1110_v21 = vmul.f32 %v1053_v15, %v2809_v60  ;;  %v966_v27 = vmul.f32 0.5, %v2743_v50  ;;  %v2846_v42 = vadd.f32 %v2600_v39, %v2748_v3 }
 0x131   :  { %v2305_v9 = vpop.eup %2304  ;;  %v1196_v29 = vadd.f32 %v1139_v13, %v2797_v48  ;;  %v1083_v28 = vmul.f32 %v1026_v23, %v2816_v38  ;;  %v1054_v5 = vmul.f32 %v997_v55, %v2820_v22  ;;  %v937_v43 = vmul.f32 0.5, %v2755_v63 }
 0x132   :  { %v1364_v14 = vadd.f32 1.0, %v2305_v9  ;;  %2025 = vst [vmem:[%s3255_s3 + $0x18] sm:$0xff] %v1901_v45   ;;  %v2307_v19 = vpop.eup %2306  ;;  %v1167_v41 = vadd.f32 %v1110_v21, %v2809_v60  ;;  %v967_v56 = vmul.f32 0.5, %v2759_v0  ;;  %v1027_v54 = vmul.f32 0.044715, %v2846_v42 }
 0x133   :  { %v2309_v34 = vpop.eup %2308  ;;  %v1253_v37 = vmul.f32 0.7978846, %v1196_v29  ;;  %v1335_v31 = vadd.f32 1.0, %v2307_v19  ;;  %v1140_v50 = vmul.f32 %v1083_v28, %v2816_v38  ;;  %v1111_v44 = vmul.f32 %v1054_v5, %v2820_v22 }
 0x134   :  { %v1421_v20 = vmul.f32 %v1364_v14, %v965_v25  ;;  %v1224_v53 = vmul.f32 0.7978846, %v1167_v41  ;;  %v1365_v3 = vadd.f32 1.0, %v2309_v34  ;;  %v2860_v57 = vadd.f32 %v2600_v39, %v2761_v8 }
 0x135   :  { %v2822_v4 = vpop.f32.mrb[32].mxu0  ;;  %v2824_v47 = vpop.f32.mrb[32].mxu1  ;;  %2316 = vtanh.f32 %v1253_v37  ;;  %v1197_v62 = vadd.f32 %v1140_v50, %v2816_v38  ;;  %v1168_v63 = vadd.f32 %v1111_v44, %v2820_v22  ;;  %v1084_v0 = vmul.f32 %v1027_v54, %v2846_v42 }
 0x136   :  { %v2137_v16 = vpop.f32.mrb[33].mxu0  ;;  %v2197_v10 = vpop.f32.mrb[33].mxu1  ;;  %v1976_v36 = vpack.c.bf16 %v1421_v20, %v1420_v18  ;;  %2318 = vtanh.f32 %v1224_v53  ;;  %v1392_v25 = vmul.f32 %v1335_v31, %v936_v12  ;;  %v998_v14 = vmul.f32 0.044715, %v2860_v57 }
 0x137   :  { %v2836_v24 = vpop.f32.mrb[34].mxu0  ;;  %v2838_v26 = vpop.f32.mrb[34].mxu1  ;;  %v1254_v1 = vmul.f32 0.7978846, %v1197_v62  ;;  %v1225_v2 = vmul.f32 0.7978846, %v1168_v63  ;;  %v1141_v8 = vmul.f32 %v1084_v0, %v2846_v42  ;;  %v1422_v10 = vmul.f32 %v1365_v3, %v966_v27 }
 0x138   :  { %v2138_v7 = vpop.f32.mrb[35].mxu0  ;;  %v2198_v33 = vpop.f32.mrb[35].mxu1  ;;  %2040 = vst [vmem:[%s3255_s3 + $0x90] sm:$0xff] %v1976_v36   ;;  %v2875_v18 = vadd.f32 %v2600_v39, %v2763_v17  ;;  %v2879_v12 = vadd.f32 %v2600_v39, %v2783_v30  ;;  %v938_v29 = vmul.f32 0.5, %v2768_v6  ;;  %v968_v21 = vmul.f32 0.5, %v2797_v48 }
 0x139   :  { %v2311_v46 = vpop.eup %2310  ;;  %2320 = vtanh.f32 %v1254_v1  ;;  %v1198_v20 = vadd.f32 %v1141_v8, %v2846_v42  ;;  %v1055_v27 = vmul.f32 %v998_v14, %v2860_v57  ;;  %v939_v37 = vmul.f32 0.5, %v2809_v60 }
 0x13a   :  { %v1336_v51 = vadd.f32 1.0, %v2311_v46  ;;  %v2313_v32 = vpop.eup %2312  ;;  %2322 = vtanh.f32 %v1225_v2  ;;  %v1028_v28 = vmul.f32 0.044715, %v2875_v18  ;;  %v999_v7 = vmul.f32 0.044715, %v2879_v12 }
 0x13b   :  { %v1366_v45 = vadd.f32 1.0, %v2313_v32  ;;  %v2315_v16 = vpop.eup %2314  ;;  %v1255_v5 = vmul.f32 0.7978846, %v1198_v20  ;;  %v1112_v33 = vmul.f32 %v1055_v27, %v2860_v57  ;;  %v969_v50 = vmul.f32 0.5, %v2816_v38 }
 0x13c   :  { %v1393_v9 = vmul.f32 %v1336_v51, %v937_v43  ;;  %v1337_v30 = vadd.f32 1.0, %v2315_v16  ;;  %v1085_v34 = vmul.f32 %v1028_v28, %v2875_v18  ;;  %v1056_v41 = vmul.f32 %v999_v7, %v2879_v12 }
 0x13d   :  { %v2862_v58 = vpop.f32.mrb[36].mxu0  ;;  %v2864_v59 = vpop.f32.mrb[36].mxu1  ;;  %v1423_v19 = vmul.f32 %v1366_v45, %v967_v56  ;;  %v1169_v44 = vadd.f32 %v1112_v33, %v2860_v57  ;;  %v2906_v53 = vadd.f32 %v2600_v39, %v2785_v35  ;;  %2324 = vtanh.f32 %v1255_v5 }
 0x13e   :  { %v2141_v11 = vpop.f32.mrb[37].mxu0  ;;  %v2201_v61 = vpop.f32.mrb[37].mxu1  ;;  %v1906_v55 = vpack.c.bf16 %v1393_v9, %v1392_v25  ;;  %v1142_v56 = vmul.f32 %v1085_v34, %v2875_v18  ;;  %v1394_v60 = vmul.f32 %v1337_v30, %v938_v29  ;;  %v1113_v62 = vmul.f32 %v1056_v41, %v2879_v12 }
 0x13f   :  { %v2867_v52 = vpop.f32.mrb[38].mxu0  ;;  %v2871_v13 = vpop.f32.mrb[38].mxu1  ;;  %v1981_v17 = vpack.c.bf16 %v1423_v19, %v1422_v10  ;;  %v2915_v38 = vadd.f32 %v2600_v39, %v2799_v49  ;;  %v1226_v61 = vmul.f32 0.7978846, %v1169_v44  ;;  %v1029_v25 = vmul.f32 0.044715, %v2906_v53 }
 0x140   :  { %v2142_v15 = vpop.f32.mrb[39].mxu0  ;;  %v2202_v23 = vpop.f32.mrb[39].mxu1  ;;  %2026 = vst [vmem:[%s3255_s3 + $0x20] sm:$0xff] %v1906_v55   ;;  %v1199_v35 = vadd.f32 %v1142_v56, %v2875_v18  ;;  %v1170_v32 = vadd.f32 %v1113_v62, %v2879_v12  ;;  %v2922_v1 = vadd.f32 %v2600_v39, %v2801_v40  ;;  %v2926_v2 = vadd.f32 %v2600_v39, %v2822_v4 }
 0x141   :  { %v2317_v36 = vpop.eup %2316  ;;  %2041 = vst [vmem:[%s3255_s3 + $0x98] sm:$0xff] %v1981_v17   ;;  %2326 = vtanh.f32 %v1226_v61  ;;  %v1000_v8 = vmul.f32 0.044715, %v2915_v38  ;;  %v940_v16 = vmul.f32 0.5, %v2820_v22  ;;  %v1086_v23 = vmul.f32 %v1029_v25, %v2906_v53 }
 0x142   :  { %v2319_v3 = vpop.eup %2318  ;;  %v1367_v0 = vadd.f32 1.0, %v2317_v36  ;;  %v1256_v45 = vmul.f32 0.7978846, %v1199_v35  ;;  %v1227_v10 = vmul.f32 0.7978846, %v1170_v32  ;;  %v2932_v40 = vmul.f32 0.5, %v2846_v42 }
 0x143   :  { %v1338_v11 = vadd.f32 1.0, %v2319_v3  ;;  %v2321_v49 = vpop.eup %2320  ;;  %v1057_v39 = vmul.f32 %v1000_v8, %v2915_v38  ;;  %v1143_v27 = vmul.f32 %v1086_v23, %v2906_v53  ;;  %v1030_v22 = vmul.f32 0.044715, %v2922_v1 }
 0x144   :  { %v2323_v14 = vpop.eup %2322  ;;  %v1368_v15 = vadd.f32 1.0, %v2321_v49  ;;  %2328 = vtanh.f32 %v1256_v45  ;;  %v1424_v20 = vmul.f32 %v1367_v0, %v968_v21  ;;  %v1001_v5 = vmul.f32 0.044715, %v2926_v2 }
 0x145   :  { %v2892_v6 = vpop.f32.mrb[40].mxu0  ;;  %v2894_v48 = vpop.f32.mrb[40].mxu1  ;;  %v1395_v9 = vmul.f32 %v1338_v11, %v939_v37  ;;  %v1339_v42 = vadd.f32 1.0, %v2323_v14  ;;  %2330 = vtanh.f32 %v1227_v10  ;;  %v1114_v30 = vmul.f32 %v1057_v39, %v2915_v38 }
 0x146   :  { %v2145_v31 = vpop.f32.mrb[41].mxu0  ;;  %v2205_v43 = vpop.f32.mrb[41].mxu1  ;;  %v1425_v29 = vmul.f32 %v1368_v15, %v969_v50  ;;  %v1200_v34 = vadd.f32 %v1143_v27, %v2906_v53  ;;  %v1087_v36 = vmul.f32 %v1030_v22, %v2922_v1  ;;  %v1058_v50 = vmul.f32 %v1001_v5, %v2926_v2 }
 0x147   :  { %v2908_v54 = vpop.f32.mrb[42].mxu0  ;;  %v2910_v46 = vpop.f32.mrb[42].mxu1  ;;  %v1911_v55 = vpack.c.bf16 %v1395_v9, %v1394_v60  ;;  %v941_v31 = vmul.f32 0.5, %v2860_v57  ;;  %v1171_v43 = vadd.f32 %v1114_v30, %v2915_v38  ;;  %v2962_v60 = vld [vmem:[%s3254_s2] ss:$0 sm:$0xff]  ;;  %v971_v62 = vmul.f32 0.5, %v2875_v18 }
 0x148   :  { %v2146_v63 = vpop.f32.mrb[43].mxu0  ;;  %v2206_v51 = vpop.f32.mrb[43].mxu1  ;;  %v1986_v33 = vpack.c.bf16 %v1425_v29, %v1424_v20  ;;  %v1257_v56 = vmul.f32 0.7978846, %v1200_v34  ;;  %v1144_v3 = vmul.f32 %v1087_v36, %v2922_v1  ;;  %v2966_v57 = vadd.f32 %v2962_v60, %v2824_v47 }
 0x149   :  { %2027 = vst [vmem:[%s3255_s3 + $0x28] sm:$0xff] %v1911_v55   ;;  %v2325_v44 = vpop.eup %2324  ;;  %v1228_v63 = vmul.f32 0.7978846, %v1171_v43  ;;  %v1115_v51 = vmul.f32 %v1058_v50, %v2926_v2  ;;  %v2972_v0 = vadd.f32 %v2962_v60, %v2836_v24  ;;  %v1396_v11 = vmul.f32 %v1339_v42, %v940_v16 }
 0x14a   :  { %2042 = vst [vmem:[%s3255_s3 + $0xa0] sm:$0xff] %v1986_v33   ;;  %2332 = vtanh.f32 %v1257_v56  ;;  %v1201_v61 = vadd.f32 %v1144_v3, %v2922_v1  ;;  %v1031_v35 = vmul.f32 0.044715, %v2966_v57  ;;  %v1369_v25 = vadd.f32 1.0, %v2325_v44 }
 0x14b   :  { %v2327_v32 = vpop.eup %2326  ;;  %2334 = vtanh.f32 %v1228_v63  ;;  %v1172_v47 = vadd.f32 %v1115_v51, %v2926_v2  ;;  %v1002_v18 = vmul.f32 0.044715, %v2972_v0  ;;  %v2985_v14 = vadd.f32 %v2962_v60, %v2838_v26 }
 0x14c   :  { %v1340_v45 = vadd.f32 1.0, %v2327_v32  ;;  %v1258_v24 = vmul.f32 0.7978846, %v1201_v61  ;;  %v1088_v8 = vmul.f32 %v1031_v35, %v2966_v57  ;;  %v1426_v26 = vmul.f32 %v1369_v25, %v2932_v40 }
 0x14d   :  { %v2935_v4 = vpop.f32.mrb[44].mxu0  ;;  %v2937_v19 = vpop.f32.mrb[44].mxu1  ;;  %v1229_v23 = vmul.f32 0.7978846, %v1172_v47  ;;  %v1059_v55 = vmul.f32 %v1002_v18, %v2972_v0  ;;  %v942_v30 = vmul.f32 0.5, %v2879_v12  ;;  %v3002_v43 = vadd.f32 %v2962_v60, %v2862_v58 }
 0x14e   :  { %v2149_v28 = vpop.f32.mrb[45].mxu0  ;;  %v2209_v17 = vpop.f32.mrb[45].mxu1  ;;  %v1397_v29 = vmul.f32 %v1340_v45, %v941_v31  ;;  %2336 = vtanh.f32 %v1258_v24  ;;  %v1145_v22 = vmul.f32 %v1088_v8, %v2966_v57  ;;  %v3006_v12 = vadd.f32 %v2962_v60, %v2864_v59 }
 0x14f   :  { %v2946_v7 = vpop.f32.mrb[46].mxu0  ;;  %v2948_v21 = vpop.f32.mrb[46].mxu1  ;;  %2338 = vtanh.f32 %v1229_v23  ;;  %v1116_v5 = vmul.f32 %v1059_v55, %v2972_v0  ;;  %v3021_v51 = vadd.f32 %v2962_v60, %v2867_v52  ;;  %v973_v35 = vmul.f32 0.5, %v2922_v1 }
 0x150   :  { %v2150_v37 = vpop.f32.mrb[47].mxu0  ;;  %v2210_v41 = vpop.f32.mrb[47].mxu1  ;;  %v1916_v33 = vpack.c.bf16 %v1397_v29, %v1396_v11  ;;  %v1202_v36 = vadd.f32 %v1145_v22, %v2966_v57  ;;  %v1033_v63 = vmul.f32 0.044715, %v3006_v12  ;;  %v3037_v1 = vadd.f32 %v2962_v60, %v2871_v13 }
 0x151   :  { %v2329_v10 = vpop.eup %2328  ;;  %v1032_v37 = vmul.f32 0.044715, %v2985_v14  ;;  %v972_v41 = vmul.f32 0.5, %v2906_v53  ;;  %v1173_v31 = vadd.f32 %v1116_v5, %v2972_v0  ;;  %v943_v53 = vmul.f32 0.5, %v2915_v38 }
 0x152   :  { %v1370_v27 = vadd.f32 1.0, %v2329_v10  ;;  %v2331_v42 = vpop.eup %2330  ;;  %2028 = vst [vmem:[%s3255_s3 + $0x30] sm:$0xff] %v1916_v33   ;;  %v1259_v50 = vmul.f32 0.7978846, %v1202_v36  ;;  %v1090_v8 = vmul.f32 %v1033_v63, %v3006_v12  ;;  %v1004_v23 = vmul.f32 0.044715, %v3021_v51 }
 0x153   :  { %v1089_v44 = vmul.f32 %v1032_v37, %v2985_v14  ;;  %v1341_v56 = vadd.f32 1.0, %v2331_v42  ;;  %v1230_v3 = vmul.f32 0.7978846, %v1173_v31  ;;  %v944_v5 = vmul.f32 0.5, %v2926_v2 }
 0x154   :  { %v1427_v34 = vmul.f32 %v1370_v27, %v971_v62  ;;  %v1003_v62 = vmul.f32 0.044715, %v3002_v43  ;;  %v2333_v58 = vpop.eup %2332  ;;  %2340 = vtanh.f32 %v1259_v50  ;;  %v1061_v33 = vmul.f32 %v1004_v23, %v3021_v51 }
 0x155   :  { %v2978_v49 = vpop.f32.mrb[48].mxu0  ;;  %v2980_v9 = vpop.f32.mrb[48].mxu1  ;;  %v1146_v59 = vmul.f32 %v1089_v44, %v2985_v14  ;;  %2342 = vtanh.f32 %v1230_v3  ;;  %v1371_v18 = vadd.f32 1.0, %v2333_v58  ;;  %v1034_v50 = vmul.f32 0.044715, %v3037_v1 }
 0x156   :  { %v2153_v15 = vpop.f32.mrb[49].mxu0  ;;  %v2213_v16 = vpop.f32.mrb[49].mxu1  ;;  %v1991_v40 = vpack.c.bf16 %v1427_v34, %v1426_v26  ;;  %v1060_v32 = vmul.f32 %v1003_v62, %v3002_v43 }
 0x157   :  { %v2988_v39 = vpop.f32.mrb[50].mxu0  ;;  %v2990_v20 = vpop.f32.mrb[50].mxu1  ;;  %v1203_v24 = vadd.f32 %v1146_v59, %v2985_v14  ;;  %v1398_v16 = vmul.f32 %v1341_v56, %v942_v30  ;;  %v1428_v34 = vmul.f32 %v1371_v18, %v972_v41  ;;  %v3053_v41 = vadd.f32 %v2962_v60, %v2892_v6 }
 0x158   :  { %v2154_v28 = vpop.f32.mrb[51].mxu0  ;;  %v2214_v17 = vpop.f32.mrb[51].mxu1  ;;  %2043 = vst [vmem:[%s3255_s3 + $0xa8] sm:$0xff] %v1991_v40   ;;  %v1117_v10 = vmul.f32 %v1060_v32, %v3002_v43  ;;  %v1118_v40 = vmul.f32 %v1061_v33, %v3021_v51  ;;  %v1091_v58 = vmul.f32 %v1034_v50, %v3037_v1  ;;  %v3063_v32 = vadd.f32 %v2962_v60, %v2894_v48 }
 0x159   :  { %v2335_v61 = vpop.eup %2334  ;;  %v1260_v28 = vmul.f32 0.7978846, %v1203_v24  ;;  %v1147_v17 = vmul.f32 %v1090_v8, %v3006_v12  ;;  %v946_v33 = vmul.f32 0.5, %v3002_v43 }
 0x15a   :  { %v1342_v45 = vadd.f32 1.0, %v2335_v61  ;;  %v2337_v27 = vpop.eup %2336  ;;  %v1174_v30 = vadd.f32 %v1117_v10, %v3002_v43  ;;  %v1175_v62 = vadd.f32 %v1118_v40, %v3021_v51  ;;  %v974_v61 = vmul.f32 0.5, %v2966_v57 }
 0x15b   :  { %v2339_v42 = vpop.eup %2338  ;;  %v1372_v26 = vadd.f32 1.0, %v2337_v27  ;;  %2344 = vtanh.f32 %v1260_v28  ;;  %v1204_v13 = vadd.f32 %v1147_v17, %v3006_v12  ;;  %v975_v57 = vmul.f32 0.5, %v2985_v14 }
 0x15c   :  { %v1399_v22 = vmul.f32 %v1342_v45, %v943_v53  ;;  %v1231_v31 = vmul.f32 0.7978846, %v1174_v30  ;;  %v1343_v2 = vadd.f32 1.0, %v2339_v42  ;;  %v1232_v18 = vmul.f32 0.7978846, %v1175_v62 }
 0x15d   :  { %v3023_v11 = vpop.f32.mrb[52].mxu0  ;;  %v3025_v38 = vpop.f32.mrb[52].mxu1  ;;  %v1429_v37 = vmul.f32 %v1372_v26, %v973_v35  ;;  %v1261_v56 = vmul.f32 0.7978846, %v1204_v13  ;;  %v1005_v35 = vmul.f32 0.044715, %v3053_v41  ;;  %v1148_v45 = vmul.f32 %v1091_v58, %v3037_v1 }
 0x15e   :  { %v2157_v25 = vpop.f32.mrb[53].mxu0  ;;  %v2217_v47 = vpop.f32.mrb[53].mxu1  ;;  %v1921_v36 = vpack.c.bf16 %v1399_v22, %v1398_v16  ;;  %2346 = vtanh.f32 %v1231_v31  ;;  %v1400_v48 = vmul.f32 %v1343_v2, %v944_v5  ;;  %v3076_v10 = vadd.f32 %v2962_v60, %v2908_v54 }
 0x15f   :  { %v3031_v52 = vpop.f32.mrb[54].mxu0  ;;  %v687_v15 = vpop.f32.mrb[54].mxu1  ;;  %v1996_v3 = vpack.c.bf16 %v1429_v37, %v1428_v34  ;;  %2348 = vtanh.f32 %v1261_v56  ;;  %v945_v47 = vmul.f32 0.5, %v2972_v0  ;;  %v1062_v8 = vmul.f32 %v1005_v35, %v3053_v41 }
 0x160   :  { %v2158_v55 = vpop.f32.mrb[55].mxu0  ;;  %v2218_v29 = vpop.f32.mrb[55].mxu1  ;;  %2029 = vst [vmem:[%s3255_s3 + $0x38] sm:$0xff] %v1921_v36   ;;  %v1035_v15 = vmul.f32 0.044715, %v3063_v32  ;;  %2350 = vtanh.f32 %v1232_v18  ;;  %v1205_v16 = vadd.f32 %v1148_v45, %v3037_v1  ;;  %v3085_v26 = vadd.f32 %v2962_v60, %v2910_v46 }
 0x161   :  { %v2341_v63 = vpop.eup %2340  ;;  %2044 = vst [vmem:[%s3255_s3 + $0xb0] sm:$0xff] %v1996_v3   ;;  %v1119_v0 = vmul.f32 %v1062_v8, %v3053_v41  ;;  %v1006_v14 = vmul.f32 0.044715, %v3076_v10  ;;  %v3090_v30 = vadd.f32 %v2962_v60, %v2935_v4  ;;  %v976_v2 = vmul.f32 0.5, %v3006_v12 }
 0x162   :  { %v2343_v25 = vpop.eup %2342  ;;  %v1092_v55 = vmul.f32 %v1035_v15, %v3063_v32  ;;  %v1373_v29 = vadd.f32 1.0, %v2341_v63  ;;  %v1262_v27 = vmul.f32 0.7978846, %v1205_v16  ;;  %v1036_v46 = vmul.f32 0.044715, %v3085_v26 }
 0x163   :  { %v1344_v24 = vadd.f32 1.0, %v2343_v25  ;;  %v1176_v17 = vadd.f32 %v1119_v0, %v3053_v41  ;;  %v1063_v5 = vmul.f32 %v1006_v14, %v3076_v10  ;;  %v1007_v50 = vmul.f32 0.044715, %v3090_v30 }
 0x164   :  { %v1149_v42 = vmul.f32 %v1092_v55, %v3063_v32  ;;  %2352 = vtanh.f32 %v1262_v27  ;;  %v1430_v37 = vmul.f32 %v1373_v29, %v974_v61  ;;  %v947_v3 = vmul.f32 0.5, %v3021_v51 }
 0x165   :  { %v3046_v44 = vpop.f32.mrb[56].mxu0  ;;  %v1401_v23 = vmul.f32 %v1344_v24, %v945_v47  ;;  %v2345_v22 = vpop.eup %2344  ;;  %v1233_v34 = vmul.f32 0.7978846, %v1176_v17  ;;  %v1120_v40 = vmul.f32 %v1063_v5, %v3076_v10  ;;  %v1064_v58 = vmul.f32 %v1007_v50, %v3090_v30 }
 0x166   :  { %v2161_v53 = vpop.f32.mrb[57].mxu0  ;;  %v1374_v54 = vadd.f32 1.0, %v2345_v22  ;;  %v1206_v36 = vadd.f32 %v1149_v42, %v3063_v32  ;;  %v3113_v18 = vadd.f32 %v2962_v60, %v2937_v19  ;;  %v3118_v24 = vadd.f32 %v2962_v60, %v2946_v7 }
 0x167   :  { %v3057_v59 = vpop.f32.mrb[58].mxu0  ;;  %v1926_v28 = vpack.c.bf16 %v1401_v23, %v1400_v48  ;;  %2354 = vtanh.f32 %v1233_v34  ;;  %v1093_v53 = vmul.f32 %v1036_v46, %v3085_v26  ;;  %v1177_v62 = vadd.f32 %v1120_v40, %v3076_v10 }
 0x168   :  { %v2162_v6 = vpop.f32.mrb[59].mxu0  ;;  %v2347_v13 = vpop.eup %2346  ;;  %v1431_v31 = vmul.f32 %v1374_v54, %v975_v57  ;;  %v1263_v56 = vmul.f32 0.7978846, %v1206_v36  ;;  %v1121_v25 = vmul.f32 %v1064_v58, %v3090_v30  ;;  %v1037_v48 = vmul.f32 0.044715, %v3113_v18 }
 0x169   :  { %2030 = vst [vmem:[%s3255_s3 + $0x40] sm:$0xff] %v1926_v28   ;;  %v2349_v4 = vpop.eup %2348  ;;  %v1345_v63 = vadd.f32 1.0, %v2347_v13  ;;  %v1150_v35 = vmul.f32 %v1093_v53, %v3085_v26  ;;  %v1234_v12 = vmul.f32 0.7978846, %v1177_v62  ;;  %v977_v23 = vmul.f32 0.5, %v3037_v1 }
 0x16a   :  { %v2001_v43 = vpack.c.bf16 %v1431_v31, %v1430_v37  ;;  %v1375_v61 = vadd.f32 1.0, %v2349_v4  ;;  %v2351_v6 = vpop.eup %2350  ;;  %2356 = vtanh.f32 %v1263_v56  ;;  %v1178_v45 = vadd.f32 %v1121_v25, %v3090_v30 }
 0x16b   :  { %v1346_v47 = vadd.f32 1.0, %v2351_v6  ;;  %v1207_v51 = vadd.f32 %v1150_v35, %v3085_v26  ;;  %2358 = vtanh.f32 %v1234_v12  ;;  %v1402_v57 = vmul.f32 %v1345_v63, %v946_v33 }
 0x16c   :  { %2045 = vst [vmem:[%s3255_s3 + $0xb8] sm:$0xff] %v2001_v43   ;;  %v1235_v0 = vmul.f32 0.7978846, %v1178_v45  ;;  %v1008_v55 = vmul.f32 0.044715, %v3118_v24  ;;  %v3125_v19 = vadd.f32 %v2962_v60, %v2948_v21  ;;  %v1094_v7 = vmul.f32 %v1037_v48, %v3113_v18 }
 0x16d   :  { %v1403_v8 = vmul.f32 %v1346_v47, %v947_v3  ;;  %v1264_v15 = vmul.f32 0.7978846, %v1207_v51  ;;  %v1432_v14 = vmul.f32 %v1375_v61, %v976_v2  ;;  %v3136_v42 = vadd.f32 %v2962_v60, %v2978_v49 }
 0x16e   :  { %v2353_v16 = vpop.eup %2352  ;;  %v1065_v22 = vmul.f32 %v1008_v55, %v3118_v24  ;;  %v1038_v28 = vmul.f32 0.044715, %v3125_v19  ;;  %v1151_v21 = vmul.f32 %v1094_v7, %v3113_v18  ;;  %v948_v54 = vmul.f32 0.5, %v3053_v41 }
 0x16f   :  { %v1931_v29 = vpack.c.bf16 %v1403_v8, %v1402_v57  ;;  %v1376_v27 = vadd.f32 1.0, %v2353_v16  ;;  %2360 = vtanh.f32 %v1264_v15  ;;  %v1009_v13 = vmul.f32 0.044715, %v3136_v42  ;;  %v132_v15 = vld [vmem:[#allocation2 + $0x1c0] sm:$0x3] }
 0x170   :  { %2362 = vtanh.f32 %v1235_v0  ;;  %v1122_v5 = vmul.f32 %v1065_v22, %v3118_v24  ;;  %v1095_v33 = vmul.f32 %v1038_v28, %v3125_v19  ;;  %v1208_v46 = vadd.f32 %v1151_v21, %v3113_v18 }
 0x171   :  { %v2355_v17 = vpop.eup %2354  ;;  %2031 = vst [vmem:[%s3255_s3 + $0x48] sm:$0xff] %v1931_v29   ;;  %v1433_v1 = vmul.f32 %v1376_v27, %v977_v23  ;;  %v978_v31 = vmul.f32 0.5, %v3063_v32  ;;  %v949_v40 = vmul.f32 0.5, %v3076_v10  ;;  %v1066_v4 = vmul.f32 %v1009_v13, %v3136_v42 }
 0x172   :  { %v1347_v36 = vadd.f32 1.0, %v2355_v17  ;;  %v1179_v49 = vadd.f32 %v1122_v5, %v3118_v24  ;;  %v1152_v50 = vmul.f32 %v1095_v33, %v3125_v19  ;;  %v1265_v41 = vmul.f32 0.7978846, %v1208_v46 }
 0x173   :  { %v2006_v34 = vpack.c.bf16 %v1433_v1, %v1432_v14  ;;  %v3153_v2 = vadd.f32 %v2962_v60, %v2980_v9  ;;  %v3157_v32 = vadd.f32 %v2962_v60, %v2988_v39  ;;  %v979_v56 = vmul.f32 0.5, %v3085_v26 }
 0x174   :  { %v2357_v37 = vpop.eup %2356  ;;  %v1236_v53 = vmul.f32 0.7978846, %v1179_v49  ;;  %v1209_v43 = vadd.f32 %v1152_v50, %v3125_v19  ;;  %v1404_v3 = vmul.f32 %v1347_v36, %v948_v54  ;;  %2364 = vtanh.f32 %v1265_v41 }
 0x175   :  { %2046 = vst [vmem:[%s3255_s3 + $0xc0] sm:$0xff] %v2006_v34   ;;  %v2359_v10 = vpop.eup %2358  ;;  %v1123_v58 = vmul.f32 %v1066_v4, %v3136_v42  ;;  %v1377_v63 = vadd.f32 1.0, %v2357_v37  ;;  %v1039_v9 = vmul.f32 0.044715, %v3153_v2  ;;  %v1010_v12 = vmul.f32 0.044715, %v3157_v32 }
 0x176   :  { %v1348_v62 = vadd.f32 1.0, %v2359_v10  ;;  %2366 = vtanh.f32 %v1236_v53  ;;  %v1266_v61 = vmul.f32 0.7978846, %v1209_v43  ;;  %v3167_v26 = vadd.f32 %v2962_v60, %v2990_v20 }
 0x177   :  { %v1180_v39 = vadd.f32 %v1123_v58, %v3136_v42  ;;  %v1096_v51 = vmul.f32 %v1039_v9, %v3153_v2  ;;  %v1067_v8 = vmul.f32 %v1010_v12, %v3157_v32  ;;  %v1434_v48 = vmul.f32 %v1377_v63, %v978_v31 }
 0x178   :  { %v1405_v6 = vmul.f32 %v1348_v62, %v949_v40  ;;  %2368 = vtanh.f32 %v1266_v61  ;;  %v1040_v0 = vmul.f32 0.044715, %v3167_v26  ;;  %v950_v20 = vmul.f32 0.5, %v3090_v30 }
 0x179   :  { %v2361_v35 = vpop.eup %2360  ;;  %v1237_v57 = vmul.f32 0.7978846, %v1180_v39  ;;  %v1153_v23 = vmul.f32 %v1096_v51, %v3153_v2  ;;  %v1124_v29 = vmul.f32 %v1067_v8, %v3157_v32  ;;  %v3180_v27 = vadd.f32 %v2962_v60, %v3023_v11 }
 0x17a   :  { %v2363_v25 = vpop.eup %2362  ;;  %v1378_v47 = vadd.f32 1.0, %v2361_v35  ;;  %v1936_v45 = vpack.c.bf16 %v1405_v6, %v1404_v3  ;;  %v1097_v22 = vmul.f32 %v1040_v0, %v3167_v26  ;;  %v746_v28 = vadd.f32 %v3025_v38, %v132_v15 }
 0x17b   :  { %v1349_v55 = vadd.f32 1.0, %v2363_v25  ;;  %v1210_v14 = vadd.f32 %v1153_v23, %v3153_v2  ;;  %2370 = vtanh.f32 %v1237_v57  ;;  %v1181_v17 = vadd.f32 %v1124_v29, %v3157_v32 }
 0x17c   :  { %v1435_v16 = vmul.f32 %v1378_v47, %v979_v56  ;;  %2032 = vst [vmem:[%s3255_s3 + $0x50] sm:$0xff] %v1936_v45   ;;  %v1011_v1 = vmul.f32 0.044715, %v3180_v27  ;;  %v1154_v11 = vmul.f32 %v1097_v22, %v3167_v26  ;;  %803 = vst [vmem:[#allocation2 + $0x1c0] sm:$0x3] %v746_v28  ;;  %v980_v54 = vmul.f32 0.5, %v3113_v18 }
 0x17d   :  { %v1267_v30 = vmul.f32 0.7978846, %v1210_v14  ;;  %v1238_v5 = vmul.f32 0.7978846, %v1181_v17  ;;  %v3195_v38 = vadd.f32 %v2962_v60, %v3031_v52  ;;  %v3200_v13 = vadd.f32 %v2962_v60, %v3046_v44 }
 0x17e   :  { %v2011_v7 = vpack.c.bf16 %v1435_v16, %v1434_v48  ;;  %v2365_v21 = vpop.eup %2364  ;;  %v1068_v33 = vmul.f32 %v1011_v1, %v3180_v27  ;;  %v1211_v46 = vadd.f32 %v1154_v11, %v3167_v26  ;;  %v951_v37 = vmul.f32 0.5, %v3118_v24 }
 0x17f   :  { %v1379_v36 = vadd.f32 1.0, %v2365_v21  ;;  %2372 = vtanh.f32 %v1267_v30  ;;  %v1406_v49 = vmul.f32 %v1349_v55, %v950_v20  ;;  %v981_v52 = vmul.f32 0.5, %v3125_v19 }
 0x180   :  { %2047 = vst [vmem:[%s3255_s3 + $0xc8] sm:$0xff] %v2011_v7   ;;  %v2367_v34 = vpop.eup %2366  ;;  %2374 = vtanh.f32 %v1238_v5  ;;  %v1125_v18 = vmul.f32 %v1068_v33, %v3180_v27  ;;  %v1268_v50 = vmul.f32 0.7978846, %v1211_v46  ;;  %v1012_v41 = vmul.f32 0.044715, %v3195_v38 }
 0x181   :  { %v1350_v31 = vadd.f32 1.0, %v2367_v34  ;;  %v1013_v44 = vmul.f32 0.044715, %v3200_v13  ;;  %v1436_v53 = vmul.f32 %v1379_v36, %v980_v54  ;;  %v3211_v43 = vadd.f32 %v2962_v60, %v3057_v59 }
 0x182   :  { %v2369_v40 = vpop.eup %2368  ;;  %v1182_v56 = vadd.f32 %v1125_v18, %v3180_v27  ;;  %2376 = vtanh.f32 %v1268_v50  ;;  %v1069_v24 = vmul.f32 %v1012_v41, %v3195_v38  ;;  %v952_v48 = vmul.f32 0.5, %v3136_v42 }
 0x183   :  { %v1407_v4 = vmul.f32 %v1350_v31, %v951_v37  ;;  %v1380_v10 = vadd.f32 1.0, %v2369_v40  ;;  %v863_v58 = vld [vmem:[#allocation2 + $0x1c0] sm:$0x3]  ;;  %v1070_v63 = vmul.f32 %v1013_v44, %v3200_v13  ;;  %v1014_v59 = vmul.f32 0.044715, %v3211_v43 }
 0x184   :  { %v1239_v19 = vmul.f32 0.7978846, %v1182_v56  ;;  %v927_v61 = vadd.f32 %v2962_v60, %v863_v58  ;;  %v1126_v9 = vmul.f32 %v1069_v24, %v3195_v38  ;;  %v953_v0 = vmul.f32 0.5, %v3157_v32 }
 0x185   :  { %v1941_v3 = vpack.c.bf16 %v1407_v4, %v1406_v49  ;;  %v1437_v62 = vmul.f32 %v1380_v10, %v981_v52  ;;  %v2371_v35 = vpop.eup %2370  ;;  %v1127_v39 = vmul.f32 %v1070_v63, %v3200_v13  ;;  %v1071_v47 = vmul.f32 %v1014_v59, %v3211_v43 }
 0x186   :  { %2378 = vtanh.f32 %v1239_v19  ;;  %v1041_v12 = vmul.f32 0.044715, %v927_v61  ;;  %v1183_v25 = vadd.f32 %v1126_v9, %v3195_v38  ;;  %v1351_v45 = vadd.f32 1.0, %v2371_v35 }
 0x187   :  { %2033 = vst [vmem:[%s3255_s3 + $0x58] sm:$0xff] %v1941_v3   ;;  %v2016_v6 = vpack.c.bf16 %v1437_v62, %v1436_v53  ;;  %v1184_v60 = vadd.f32 %v1127_v39, %v3200_v13  ;;  %v1128_v23 = vmul.f32 %v1071_v47, %v3211_v43  ;;  %v982_v1 = vmul.f32 0.5, %v3153_v2 }
 0x188   :  { %v1098_v57 = vmul.f32 %v1041_v12, %v927_v61  ;;  %v1240_v8 = vmul.f32 0.7978846, %v1183_v25  ;;  %v1408_v22 = vmul.f32 %v1351_v45, %v952_v48  ;;  %v983_v42 = vmul.f32 0.5, %v3167_v26 }
 0x189   :  { %2048 = vst [vmem:[%s3255_s3 + $0xd0] sm:$0xff] %v2016_v6   ;;  %v2373_v51 = vpop.eup %2372  ;;  %v1241_v16 = vmul.f32 0.7978846, %v1184_v60  ;;  %v1185_v7 = vadd.f32 %v1128_v23, %v3211_v43  ;;  %v954_v46 = vmul.f32 0.5, %v3180_v27  ;;  %v955_v37 = vmul.f32 0.5, %v3195_v38 }
 0x18a   :  { %v2375_v15 = vpop.eup %2374  ;;  %v1155_v55 = vmul.f32 %v1098_v57, %v927_v61  ;;  %2380 = vtanh.f32 %v1240_v8  ;;  %v1381_v29 = vadd.f32 1.0, %v2373_v51  ;;  %v956_v4 = vmul.f32 0.5, %v3200_v13 }
 0x18b   :  { %v1352_v20 = vadd.f32 1.0, %v2375_v15  ;;  %2382 = vtanh.f32 %v1241_v16  ;;  %v1242_v11 = vmul.f32 0.7978846, %v1185_v7  ;;  %v957_v10 = vmul.f32 0.5, %v3211_v43 }
 0x18c   :  { %v2377_v14 = vpop.eup %2376  ;;  %v1212_v17 = vadd.f32 %v1155_v55, %v927_v61  ;;  %v1438_v32 = vmul.f32 %v1381_v29, %v982_v1  ;;  %v984_v44 = vmul.f32 0.5, %v927_v61 }
 0x18d   :  { %v1409_v28 = vmul.f32 %v1352_v20, %v953_v0  ;;  %v1382_v30 = vadd.f32 1.0, %v2377_v14  ;;  %2384 = vtanh.f32 %v1242_v11 }
 0x18e   :  { %v1269_v54 = vmul.f32 0.7978846, %v1212_v17 }
 0x18f   :  { %v1946_v21 = vpack.c.bf16 %v1409_v28, %v1408_v22  ;;  %v1439_v5 = vmul.f32 %v1382_v30, %v983_v42 }
 0x190   :  { %v2379_v33 = vpop.eup %2378  ;;  %2386 = vtanh.f32 %v1269_v54 }
 0x191   :  { %2034 = vst [vmem:[%s3255_s3 + $0x60] sm:$0xff] %v1946_v21   ;;  %v2021_v34 = vpack.c.bf16 %v1439_v5, %v1438_v32  ;;  %v1353_v2 = vadd.f32 1.0, %v2379_v33 }
 0x193   :  { %2049 = vst [vmem:[%s3255_s3 + $0xd8] sm:$0xff] %v2021_v34   ;;  %v1410_v18 = vmul.f32 %v1353_v2, %v954_v46 }
 0x194   :  { %v2381_v26 = vpop.eup %2380 }
 0x195   :  { %v2383_v36 = vpop.eup %2382  ;;  %v1354_v31 = vadd.f32 1.0, %v2381_v26 }
 0x196   :  { %v1355_v49 = vadd.f32 1.0, %v2383_v36 }
 0x197   :  { %v1411_v40 = vmul.f32 %v1354_v31, %v955_v37  ;;  %v2385_v52 = vpop.eup %2384 }
 0x198   :  { %v1356_v56 = vadd.f32 1.0, %v2385_v52  ;;  %v1412_v27 = vmul.f32 %v1355_v49, %v956_v4 }
 0x199   :  { %v1951_v50 = vpack.c.bf16 %v1411_v40, %v1410_v18 }
 0x19a   :  { %v2387_v41 = vpop.eup %2386  ;;  %v1413_v38 = vmul.f32 %v1356_v56, %v957_v10 }
 0x19b   :  { %v1383_v53 = vadd.f32 1.0, %v2387_v41  ;;  %2035 = vst [vmem:[%s3255_s3 + $0x68] sm:$0xff] %v1951_v50  }
 0x19c   :  { %v1956_v3 = vpack.c.bf16 %v1413_v38, %v1412_v27 }
 0x19d   :  { %v1440_v24 = vmul.f32 %v1383_v53, %v984_v44 }
 0x19e   :  { %2036 = vst [vmem:[%s3255_s3 + $0x70] sm:$0xff] %v1956_v3  }
 0x19f   :  { %v1882_v62 = vpack.c.bf16 %v1440_v24, %v1440_v24 }
 0x1a1   :  { %1726 = vst [vmem:[%s3255_s3 + $0xe0] sm:$0x1] %v1882_v62 }

// kernel: encoder_forward.7
= control target key start
LH: loop header
LB: loop body
LE: loop exit
PB: predicated region body
PF: predicated region fallthrough
CT: control target
= control target key end

     0   :  { %v829_v0 = vmov 0.0   ;;  %vm830_vm0 = vmmov 0   ;;  %vm329_vm1 = vcmask 1041408   ;;  %s1121_s1 = inlined_call_operand.vmem [shape: bf16[128,128], index: 1, kind: input, shape index: {}]   ;;  %s1122_s0 = inlined_call_operand.vmem [shape: bf16[98,128], index: 0, kind: input, shape index: {}]   ;;  %s1123_s2 = inlined_call_operand.vmem [shape: f32[1,128], index: 2, kind: input, shape index: {}]   ;;  %s1124_s3 = inlined_call_operand.vmem [shape: f32[1,128], index: 3, kind: input, shape index: {}]   ;;  %s1125_s4 = inlined_call_operand.vmem [shape: f32[1,128], index: 4, kind: input, shape index: {}]   ;;  %s1126_s5 = inlined_call_operand.vmem [shape: bf16[98,128], index: 5, kind: output, shape index: {}]  }
   0x1   :  { %724 = vmatprep.subr.bf16.mxu0 %v829_v0  ;;  %37 = vst [vmem:[#allocation2 + $0x60] sm:$0x3] %v829_v0  ;;  %v786_v1 = vld [vmem:[%s1121_s1] sm:$0xff]   ;;  %768 = vmatprep.subr.bf16.mxu1 %v829_v0  ;;  %v787_v2 = vld [vmem:[%s1121_s1 + $0x8] sm:$0xff]   ;;  %v788_v3 = vld [vmem:[%s1121_s1 + $0x10] sm:$0xff]  }
   0x2   :  { %740 = vmatprep.mubr.msk.bf16.mxu0 %vm830_vm0, %v829_v0  ;;  %756 = vmatprep.mubr.msk.bf16.mxu1 %vm830_vm0, %v829_v0  ;;  %v789_v4 = vld [vmem:[%s1121_s1 + $0x18] sm:$0xff]   ;;  %v790_v5 = vld [vmem:[%s1121_s1 + $0x20] sm:$0xff]   ;;  %v791_v6 = vld [vmem:[%s1121_s1 + $0x28] sm:$0xff]  }
   0x3   :  { %725 = vmatpush3.bf16.msra.mxu0 %v786_v1  ;;  %776 = vmatpush3.bf16.msra.mxu1 %v786_v1  ;;  %v792_v7 = vld [vmem:[%s1121_s1 + $0x30] sm:$0xff]   ;;  %v793_v8 = vld [vmem:[%s1121_s1 + $0x38] sm:$0xff]   ;;  %v794_v9 = vld [vmem:[%s1122_s0] sm:$0xff]  }
   0x4   :  { %726 = vmatprep.subr.bf16.mxu0 %v829_v0  ;;  %769 = vmatprep.subr.bf16.mxu1 %v829_v0  ;;  %v797_v10 = vld [vmem:[%s1122_s0 + $0x20] sm:$0xff]   ;;  %v795_v11 = vld [vmem:[%s1122_s0 + $0x8] sm:$0xff]   ;;  %v796_v13 = vld [vmem:[%s1122_s0 + $0x10] sm:$0xff]  }
   0x5   :  { %v799_v12 = vld [vmem:[%s1122_s0 + $0x28] sm:$0xff]   ;;  %v800_v14 = vld [vmem:[%s1122_s0 + $0x30] ss:$0 sps:$4 sm:$0x11]   ;;  %v798_v15 = vld [vmem:[%s1122_s0 + $0x18] sm:$0xff]  }
   0x6   :  { %v916_v17 = vld [vmem:[%s1123_s2] ss:$0 sm:$0xff] }
   0x7   :  { %727 = vmatpush3.bf16.msra.mxu0 %v787_v2  ;;  %777 = vmatpush3.bf16.msra.mxu1 %v787_v2 }
   0x8   :  { %728 = vmatprep.subr.bf16.mxu0 %v829_v0  ;;  %770 = vmatprep.subr.bf16.mxu1 %v829_v0  ;;  %v50_v43 = vld [vmem:[#allocation2 + $0x60] sm:$0x3] }
   0xb   :  { %729 = vmatpush3.bf16.msra.mxu0 %v788_v3  ;;  %778 = vmatpush3.bf16.msra.mxu1 %v788_v3 }
   0xc   :  { %730 = vmatprep.subr.bf16.mxu0 %v829_v0  ;;  %771 = vmatprep.subr.bf16.mxu1 %v829_v0 }
   0xf   :  { %731 = vmatpush3.bf16.msra.mxu0 %v789_v4  ;;  %779 = vmatpush3.bf16.msra.mxu1 %v789_v4 }
  0x10   :  { %732 = vmatprep.subr.bf16.mxu0 %v829_v0  ;;  %772 = vmatprep.subr.bf16.mxu1 %v829_v0 }
  0x13   :  { %733 = vmatpush3.bf16.msra.mxu0 %v790_v5  ;;  %780 = vmatpush3.bf16.msra.mxu1 %v790_v5 }
  0x14   :  { %734 = vmatprep.subr.bf16.mxu0 %v829_v0  ;;  %773 = vmatprep.subr.bf16.mxu1 %v829_v0 }
  0x17   :  { %735 = vmatpush3.bf16.msra.mxu0 %v791_v6  ;;  %781 = vmatpush3.bf16.msra.mxu1 %v791_v6 }
  0x18   :  { %736 = vmatprep.subr.bf16.mxu0 %v829_v0  ;;  %774 = vmatprep.subr.bf16.mxu1 %v829_v0 }
  0x1b   :  { %737 = vmatpush3.bf16.msra.mxu0 %v792_v7  ;;  %782 = vmatpush3.bf16.msra.mxu1 %v792_v7 }
  0x1c   :  { %738 = vmatprep.subr.bf16.mxu0 %v829_v0  ;;  %775 = vmatprep.subr.bf16.mxu1 %v829_v0 }
  0x1f   :  { %739 = vmatpush3.bf16.msra.mxu0 %v793_v8  ;;  %783 = vmatpush3.bf16.msra.mxu1 %v793_v8 }
  0x22   :  { %741 = vmatmul.mubr.bf16.vlgmr.msra.gmra.mrb[0].mxu0 %v794_v9  ;;  %757 = vmatmul.mubr.bf16.vlgmr.msra.gmra.mrb[0].mxu1 %v797_v10 }
  0x23   :  { %744 = vmatprep.mubr.msk.bf16.mxu0 %vm830_vm0, %v829_v0  ;;  %760 = vmatprep.mubr.msk.bf16.mxu1 %vm830_vm0, %v829_v0 }
  0x2a   :  { %745 = vmatmul.mubr.bf16.gmra.mrb[4].mxu0 %v795_v11  ;;  %761 = vmatmul.mubr.bf16.gmra.mrb[4].mxu1 %v799_v12 }
  0x2b   :  { %748 = vmatprep.mubr.msk.bf16.mxu0 %vm830_vm0, %v829_v0  ;;  %764 = vmatprep.mubr.msk.bf16.mxu1 %vm830_vm0, %v829_v0 }
  0x32   :  { %749 = vmatmul.mubr.bf16.gmra.mrb[8].mxu0 %v796_v13  ;;  %765 = vmatmul.mubr.bf16.gmra.mrb[8].mxu1 %v800_v14 }
  0x33   :  { %752 = vmatprep.mubr.msk.bf16.mxu0 %vm830_vm0, %v829_v0 }
  0x3a   :  { %753 = vmatmul.mubr.bf16.gmra.mrb[12].mxu0 %v798_v15 }
  0xf5   :  { %v202_v16 = vpop.f32.mrb[0].mxu0  ;;  %v234_v18 = vpop.f32.mrb[0].mxu1 }
  0xf6   :  { %v742_v19 = vpop.f32.mrb[1].mxu0  ;;  %v758_v20 = vpop.f32.mrb[1].mxu1  ;;  %v919_v23 = vadd.f32 %v916_v17, %v202_v16  ;;  %v958_v6 = vadd.f32 %v916_v17, %v234_v18 }
  0xf7   :  { %v205_v21 = vpop.f32.mrb[2].mxu0  ;;  %v237_v22 = vpop.f32.mrb[2].mxu1 }
  0xf8   :  { %v743_v24 = vpop.f32.mrb[3].mxu0  ;;  %v759_v25 = vpop.f32.mrb[3].mxu1  ;;  %v922_v26 = vadd.f32 %v916_v17, %v205_v21  ;;  %v339_v27 = vmul.f32 %v919_v23, %v919_v23  ;;  %v967_v11 = vadd.f32 %v916_v17, %v237_v22  ;;  %v347_v16 = vmul.f32 %v958_v6, %v958_v6 }
  0xfa   :  { %v318_v28 = vadd.f32 %v922_v26, %v919_v23  ;;  %v340_v29 = vmul.f32 %v922_v26, %v922_v26  ;;  %v348_v21 = vmul.f32 %v967_v11, %v967_v11 }
  0xfc   :  { %v352_v32 = vadd.f32 %v340_v29, %v339_v27 }
  0xfd   :  { %v210_v30 = vpop.f32.mrb[4].mxu0  ;;  %v242_v31 = vpop.f32.mrb[4].mxu1 }
  0xfe   :  { %v746_v33 = vpop.f32.mrb[5].mxu0  ;;  %v762_v34 = vpop.f32.mrb[5].mxu1  ;;  %v931_v37 = vadd.f32 %v916_v17, %v210_v30  ;;  %v978_v18 = vadd.f32 %v916_v17, %v242_v31 }
  0xff   :  { %v213_v35 = vpop.f32.mrb[6].mxu0  ;;  %v245_v36 = vpop.f32.mrb[6].mxu1 }
 0x100   :  { %v747_v38 = vpop.f32.mrb[7].mxu0  ;;  %v763_v39 = vpop.f32.mrb[7].mxu1  ;;  %v319_v40 = vadd.f32 %v318_v28, %v931_v37  ;;  %v341_v41 = vmul.f32 %v931_v37, %v931_v37  ;;  %v937_v42 = vadd.f32 %v916_v17, %v213_v35  ;;  %v316_v24 = vadd.f32 %v916_v17, %v245_v36 }
 0x101   :  { %v349_v28 = vmul.f32 %v978_v18, %v978_v18 }
 0x102   :  { %v353_v44 = vadd.f32 %v352_v32, %v341_v41  ;;  %v320_v45 = vadd.f32 %v319_v40, %v937_v42  ;;  %v342_v46 = vmul.f32 %v937_v42, %v937_v42  ;;  %v350_v33 = vmul.f32 %v316_v24, %v316_v24 }
 0x104   :  { %v354_v49 = vadd.f32 %v353_v44, %v342_v46 }
 0x105   :  { %v218_v47 = vpop.f32.mrb[8].mxu0  ;;  %v250_v48 = vpop.f32.mrb[8].mxu1 }
 0x106   :  { %v750_v50 = vpop.f32.mrb[9].mxu0  ;;  %v268_v51 = vadd.f32 %v250_v48, %v50_v43  ;;  %v766_v52 = vpop.f32.mrb[9].mxu1  ;;  %v943_v55 = vadd.f32 %v916_v17, %v218_v47 }
 0x107   :  { %v221_v53 = vpop.f32.mrb[10].mxu0  ;;  %v253_v54 = vpop.f32.mrb[10].mxu1 }
 0x108   :  { %v751_v56 = vpop.f32.mrb[11].mxu0  ;;  %281 = vst [vmem:[#allocation2 + $0x60] sm:$0x3] %v268_v51  ;;  %v767_v57 = vpop.f32.mrb[11].mxu1  ;;  %v321_v58 = vadd.f32 %v320_v45, %v943_v55  ;;  %v343_v59 = vmul.f32 %v943_v55, %v943_v55  ;;  %v949_v60 = vadd.f32 %v916_v17, %v221_v53 }
 0x10a   :  { %v355_v61 = vadd.f32 %v354_v49, %v343_v59  ;;  %v322_v62 = vadd.f32 %v321_v58, %v949_v60  ;;  %v344_v63 = vmul.f32 %v949_v60, %v949_v60 }
 0x10c   :  { %v356_v1 = vadd.f32 %v355_v61, %v344_v63 }
 0x10d   :  { %v226_v0 = vpop.f32.mrb[12].mxu0 }
 0x10e   :  { %v754_v2 = vpop.f32.mrb[13].mxu0  ;;  %v955_v4 = vadd.f32 %v916_v17, %v226_v0 }
 0x10f   :  { %v229_v3 = vpop.f32.mrb[14].mxu0  ;;  %v297_v10 = vld [vmem:[#allocation2 + $0x60] sm:$0x3] }
 0x110   :  { %v755_v5 = vpop.f32.mrb[15].mxu0  ;;  %v323_v7 = vadd.f32 %v322_v62, %v955_v4  ;;  %v345_v8 = vmul.f32 %v955_v4, %v955_v4  ;;  %v964_v9 = vadd.f32 %v916_v17, %v229_v3  ;;  %v973_v15 = vadd.f32 %v916_v17, %v297_v10 }
 0x112   :  { %v357_v12 = vadd.f32 %v356_v1, %v345_v8  ;;  %v324_v13 = vadd.f32 %v323_v7, %v964_v9  ;;  %v346_v14 = vmul.f32 %v964_v9, %v964_v9  ;;  %v351_v27 = vmul.f32 %v973_v15, %v973_v15 }
 0x113   :  { %v330_v31 = vsel %vm329_vm1, %v973_v15, 0.0 }
 0x114   :  { %v325_v19 = vadd.f32 %v324_v13, %v958_v6  ;;  %v358_v20 = vadd.f32 %v357_v12, %v346_v14  ;;  %v363_v35 = vsel %vm329_vm1, %v351_v27, 0.0  ;;  %v647_v27 = vld [vmem:[%s1125_s4] ss:$0 sm:$0xff] }
 0x116   :  { %v359_v22 = vadd.f32 %v358_v20, %v347_v16  ;;  %v326_v25 = vadd.f32 %v325_v19, %v967_v11 }
 0x118   :  { %v327_v29 = vadd.f32 %v326_v25, %v978_v18  ;;  %v360_v30 = vadd.f32 %v359_v22, %v348_v21 }
 0x11a   :  { %v328_v32 = vadd.f32 %v327_v29, %v316_v24  ;;  %v361_v34 = vadd.f32 %v360_v30, %v349_v28 }
 0x11c   :  { %v362_v38 = vadd.f32 %v361_v34, %v350_v33  ;;  %v331_v39 = vadd.f32 %v330_v31, %v328_v32 }
 0x11e   :  { %v332_v17 = vrot.slane %v331_v39, 4  ;;  %v364_v36 = vadd.f32 %v363_v35, %v362_v38 }
 0x120   :  { %v333_v40 = vadd.f32 %v332_v17, %v331_v39  ;;  %v365_v41 = vrot.slane %v364_v36, 4 }
 0x122   :  { %v334_v43 = vrot.slane %v333_v40, 2  ;;  %v366_v44 = vadd.f32 %v365_v41, %v364_v36 }
 0x124   :  { %v335_v45 = vadd.f32 %v334_v43, %v333_v40  ;;  %v367_v46 = vrot.slane %v366_v44, 2 }
 0x126   :  { %v336_v47 = vrot.slane %v335_v45, 1  ;;  %v368_v48 = vadd.f32 %v367_v46, %v366_v44 }
 0x128   :  { %v337_v49 = vadd.f32 %v336_v47, %v335_v45  ;;  %v369_v50 = vrot.slane %v368_v48, 1 }
 0x12a   :  { %v338_v51 = vmul.f32 0.010204081, %v337_v49  ;;  %v370_v52 = vadd.f32 %v369_v50, %v368_v48 }
 0x12c   :  { %v371_v53 = vmul.f32 0.010204081, %v370_v52  ;;  %v372_v54 = vmul.f32 %v338_v51, %v338_v51  ;;  %v375_v56 = vsub.f32 %v919_v23, %v338_v51  ;;  %v376_v57 = vsub.f32 %v922_v26, %v338_v51 }
 0x12d   :  { %v377_v58 = vsub.f32 %v931_v37, %v338_v51  ;;  %v378_v59 = vsub.f32 %v937_v42, %v338_v51  ;;  %v379_v61 = vsub.f32 %v943_v55, %v338_v51  ;;  %v380_v62 = vsub.f32 %v949_v60, %v338_v51 }
 0x12e   :  { %v373_v63 = vsub.f32 %v371_v53, %v372_v54  ;;  %v381_v0 = vsub.f32 %v955_v4, %v338_v51  ;;  %v382_v1 = vsub.f32 %v964_v9, %v338_v51  ;;  %v383_v2 = vsub.f32 %v958_v6, %v338_v51 }
 0x12f   :  { %v384_v3 = vsub.f32 %v967_v11, %v338_v51  ;;  %v385_v23 = vsub.f32 %v978_v18, %v338_v51  ;;  %v386_v26 = vsub.f32 %v316_v24, %v338_v51  ;;  %v387_v55 = vsub.f32 %v973_v15, %v338_v51  ;;  %v646_v18 = vld [vmem:[%s1124_s3] ss:$0 sm:$0xff] }
 0x130   :  { %v374_v5 = vmax.f32 %v373_v63, 0.0 }
 0x132   :  { %v388_v37 = vadd.f32 1e-05, %v374_v5 }
 0x134   :  { %801 = vrsqrt.f32 %v388_v37 }
 0x13e   :  { %v802_v42 = vpop.eup %801 }
 0x13f   :  { %v390_v7 = vmul.f32 %v802_v42, %v375_v56  ;;  %v391_v60 = vmul.f32 %v802_v42, %v376_v57  ;;  %v392_v8 = vmul.f32 %v802_v42, %v377_v58  ;;  %v393_v10 = vmul.f32 %v802_v42, %v378_v59 }
 0x140   :  { %v394_v4 = vmul.f32 %v802_v42, %v379_v61  ;;  %v395_v12 = vmul.f32 %v802_v42, %v380_v62  ;;  %v396_v9 = vmul.f32 %v802_v42, %v381_v0  ;;  %v397_v13 = vmul.f32 %v802_v42, %v382_v1 }
 0x141   :  { %v398_v6 = vmul.f32 %v802_v42, %v383_v2  ;;  %v399_v14 = vmul.f32 %v802_v42, %v384_v3  ;;  %v400_v11 = vmul.f32 %v802_v42, %v385_v23  ;;  %v401_v16 = vmul.f32 %v802_v42, %v386_v26 }
 0x142   :  { %v402_v19 = vmul.f32 %v802_v42, %v387_v55  ;;  %v410_v20 = vmul.f32 %v646_v18, %v390_v7  ;;  %v411_v21 = vmul.f32 %v646_v18, %v391_v60  ;;  %v412_v15 = vmul.f32 %v646_v18, %v392_v8 }
 0x143   :  { %v413_v22 = vmul.f32 %v646_v18, %v393_v10  ;;  %v414_v24 = vmul.f32 %v646_v18, %v394_v4  ;;  %v415_v25 = vmul.f32 %v646_v18, %v395_v12  ;;  %v416_v28 = vmul.f32 %v646_v18, %v396_v9 }
 0x144   :  { %v417_v29 = vmul.f32 %v646_v18, %v397_v13  ;;  %v418_v30 = vmul.f32 %v646_v18, %v398_v6  ;;  %v419_v31 = vmul.f32 %v646_v18, %v399_v14  ;;  %v420_v32 = vmul.f32 %v646_v18, %v400_v11 }
 0x145   :  { %v1009_v33 = vadd.f32 %v647_v27, %v410_v20  ;;  %v1011_v34 = vadd.f32 %v647_v27, %v411_v21  ;;  %v1013_v35 = vadd.f32 %v647_v27, %v412_v15  ;;  %v421_v38 = vmul.f32 %v646_v18, %v401_v16 }
 0x146   :  { %v1015_v39 = vadd.f32 %v647_v27, %v413_v22  ;;  %v1017_v17 = vadd.f32 %v647_v27, %v414_v24  ;;  %v1019_v36 = vadd.f32 %v647_v27, %v415_v25  ;;  %v422_v40 = vmul.f32 %v646_v18, %v402_v19 }
 0x147   :  { %v1021_v41 = vadd.f32 %v647_v27, %v416_v28  ;;  %v1023_v43 = vadd.f32 %v647_v27, %v417_v29  ;;  %v1025_v44 = vadd.f32 %v647_v27, %v418_v30  ;;  %v1027_v45 = vadd.f32 %v647_v27, %v419_v31 }
 0x148   :  { %v1029_v46 = vadd.f32 %v647_v27, %v420_v32  ;;  %v456_v47 = vmul.f32 0.044715, %v1009_v33  ;;  %v457_v48 = vmul.f32 0.044715, %v1011_v34  ;;  %v458_v49 = vmul.f32 0.044715, %v1013_v35 }
 0x149   :  { %v1034_v50 = vadd.f32 %v647_v27, %v421_v38  ;;  %v459_v51 = vmul.f32 0.044715, %v1015_v39  ;;  %v460_v52 = vmul.f32 0.044715, %v1017_v17  ;;  %v461_v53 = vmul.f32 0.044715, %v1019_v36 }
 0x14a   :  { %v1039_v54 = vadd.f32 %v647_v27, %v422_v40  ;;  %v462_v56 = vmul.f32 0.044715, %v1021_v41  ;;  %v463_v57 = vmul.f32 0.044715, %v1023_v43  ;;  %v464_v58 = vmul.f32 0.044715, %v1025_v44 }
 0x14b   :  { %v469_v59 = vmul.f32 %v456_v47, %v1009_v33  ;;  %v470_v61 = vmul.f32 %v457_v48, %v1011_v34  ;;  %v465_v62 = vmul.f32 0.044715, %v1027_v45  ;;  %v471_v63 = vmul.f32 %v458_v49, %v1013_v35 }
 0x14c   :  { %v472_v0 = vmul.f32 %v459_v51, %v1015_v39  ;;  %v473_v1 = vmul.f32 %v460_v52, %v1017_v17  ;;  %v466_v2 = vmul.f32 0.044715, %v1029_v46  ;;  %v467_v3 = vmul.f32 0.044715, %v1034_v50 }
 0x14d   :  { %v474_v23 = vmul.f32 %v461_v53, %v1019_v36  ;;  %v475_v26 = vmul.f32 %v462_v56, %v1021_v41  ;;  %v468_v5 = vmul.f32 0.044715, %v1039_v54  ;;  %v476_v37 = vmul.f32 %v463_v57, %v1023_v43 }
 0x14e   :  { %v477_v42 = vmul.f32 %v464_v58, %v1025_v44  ;;  %v482_v55 = vmul.f32 %v469_v59, %v1009_v33  ;;  %v483_v7 = vmul.f32 %v470_v61, %v1011_v34  ;;  %v484_v60 = vmul.f32 %v471_v63, %v1013_v35 }
 0x14f   :  { %v485_v8 = vmul.f32 %v472_v0, %v1015_v39  ;;  %v478_v10 = vmul.f32 %v465_v62, %v1027_v45  ;;  %v486_v4 = vmul.f32 %v473_v1, %v1017_v17  ;;  %v487_v12 = vmul.f32 %v474_v23, %v1019_v36 }
 0x150   :  { %v479_v9 = vmul.f32 %v466_v2, %v1029_v46  ;;  %v480_v13 = vmul.f32 %v467_v3, %v1034_v50  ;;  %v488_v6 = vmul.f32 %v475_v26, %v1021_v41  ;;  %v489_v14 = vmul.f32 %v476_v37, %v1023_v43 }
 0x151   :  { %v495_v11 = vadd.f32 %v482_v55, %v1009_v33  ;;  %v496_v16 = vadd.f32 %v483_v7, %v1011_v34  ;;  %v497_v18 = vadd.f32 %v484_v60, %v1013_v35  ;;  %v481_v19 = vmul.f32 %v468_v5, %v1039_v54 }
 0x152   :  { %v490_v20 = vmul.f32 %v477_v42, %v1025_v44  ;;  %v498_v21 = vadd.f32 %v485_v8, %v1015_v39  ;;  %v499_v15 = vadd.f32 %v486_v4, %v1017_v17  ;;  %v491_v22 = vmul.f32 %v478_v10, %v1027_v45 }
 0x153   :  { %v500_v24 = vadd.f32 %v487_v12, %v1019_v36  ;;  %v492_v25 = vmul.f32 %v479_v9, %v1029_v46  ;;  %v501_v27 = vadd.f32 %v488_v6, %v1021_v41  ;;  %v508_v28 = vmul.f32 0.7978846, %v495_v11 }
 0x154   :  { %v509_v29 = vmul.f32 0.7978846, %v496_v16  ;;  %v493_v30 = vmul.f32 %v480_v13, %v1034_v50  ;;  %v502_v31 = vadd.f32 %v489_v14, %v1023_v43  ;;  %v510_v32 = vmul.f32 0.7978846, %v497_v18 }
 0x155   :  { %v511_v38 = vmul.f32 0.7978846, %v498_v21  ;;  %v494_v40 = vmul.f32 %v481_v19, %v1039_v54  ;;  %v503_v47 = vadd.f32 %v490_v20, %v1025_v44  ;;  %v512_v48 = vmul.f32 0.7978846, %v499_v15 }
 0x156   :  { %803 = vtanh.f32 %v508_v28  ;;  %v504_v49 = vadd.f32 %v491_v22, %v1027_v45  ;;  %v513_v51 = vmul.f32 0.7978846, %v500_v24  ;;  %v505_v52 = vadd.f32 %v492_v25, %v1029_v46 }
 0x157   :  { %805 = vtanh.f32 %v509_v29  ;;  %v514_v53 = vmul.f32 0.7978846, %v501_v27  ;;  %v506_v56 = vadd.f32 %v493_v30, %v1034_v50  ;;  %v515_v57 = vmul.f32 0.7978846, %v502_v31 }
 0x158   :  { %807 = vtanh.f32 %v510_v32  ;;  %v507_v58 = vadd.f32 %v494_v40, %v1039_v54  ;;  %v516_v59 = vmul.f32 0.7978846, %v503_v47  ;;  %v517_v61 = vmul.f32 0.7978846, %v504_v49 }
 0x159   :  { %809 = vtanh.f32 %v511_v38  ;;  %v518_v62 = vmul.f32 0.7978846, %v505_v52  ;;  %v519_v63 = vmul.f32 0.7978846, %v506_v56  ;;  %v443_v3 = vmul.f32 0.5, %v1009_v33 }
 0x15a   :  { %811 = vtanh.f32 %v512_v48  ;;  %v520_v0 = vmul.f32 0.7978846, %v507_v58  ;;  %v444_v5 = vmul.f32 0.5, %v1011_v34  ;;  %v445_v55 = vmul.f32 0.5, %v1013_v35 }
 0x15b   :  { %813 = vtanh.f32 %v513_v51  ;;  %v446_v10 = vmul.f32 0.5, %v1015_v39  ;;  %v447_v33 = vmul.f32 0.5, %v1017_v17  ;;  %v448_v34 = vmul.f32 0.5, %v1019_v36 }
 0x15c   :  { %815 = vtanh.f32 %v514_v53  ;;  %v449_v35 = vmul.f32 0.5, %v1021_v41  ;;  %v450_v39 = vmul.f32 0.5, %v1023_v43  ;;  %v451_v36 = vmul.f32 0.5, %v1025_v44 }
 0x15d   :  { %817 = vtanh.f32 %v515_v57  ;;  %v452_v41 = vmul.f32 0.5, %v1027_v45  ;;  %v453_v38 = vmul.f32 0.5, %v1029_v46  ;;  %v454_v44 = vmul.f32 0.5, %v1034_v50 }
 0x15e   :  { %819 = vtanh.f32 %v516_v59  ;;  %v455_v52 = vmul.f32 0.5, %v1039_v54 }
 0x15f   :  { %821 = vtanh.f32 %v517_v61 }
 0x160   :  { %v804_v1 = vpop.eup %803  ;;  %823 = vtanh.f32 %v518_v62 }
 0x161   :  { %v806_v2 = vpop.eup %805  ;;  %825 = vtanh.f32 %v519_v63  ;;  %v534_v23 = vadd.f32 1.0, %v804_v1 }
 0x162   :  { %v808_v26 = vpop.eup %807  ;;  %827 = vtanh.f32 %v520_v0  ;;  %v535_v37 = vadd.f32 1.0, %v806_v2 }
 0x163   :  { %v810_v42 = vpop.eup %809  ;;  %v536_v7 = vadd.f32 1.0, %v808_v26  ;;  %v547_v60 = vmul.f32 %v534_v23, %v443_v3 }
 0x164   :  { %v812_v8 = vpop.eup %811  ;;  %v537_v4 = vadd.f32 1.0, %v810_v42  ;;  %v548_v12 = vmul.f32 %v535_v37, %v444_v5 }
 0x165   :  { %v814_v9 = vpop.eup %813  ;;  %v538_v13 = vadd.f32 1.0, %v812_v8  ;;  %v549_v6 = vmul.f32 %v536_v7, %v445_v55 }
 0x166   :  { %v816_v14 = vpop.eup %815  ;;  %v539_v11 = vadd.f32 1.0, %v814_v9  ;;  %v550_v16 = vmul.f32 %v537_v4, %v446_v10  ;;  %v677_v18 = vpack.c.bf16 %v548_v12, %v547_v60 }
 0x167   :  { %v818_v19 = vpop.eup %817  ;;  %v540_v20 = vadd.f32 1.0, %v816_v14  ;;  %v551_v21 = vmul.f32 %v538_v13, %v447_v33 }
 0x168   :  { %v820_v15 = vpop.eup %819  ;;  %v541_v22 = vadd.f32 1.0, %v818_v19  ;;  %v552_v24 = vmul.f32 %v539_v11, %v448_v34  ;;  %678 = vst [vmem:[%s1126_s5] sm:$0xff] %v677_v18   ;;  %v682_v17 = vpack.c.bf16 %v550_v16, %v549_v6 }
 0x169   :  { %v822_v25 = vpop.eup %821  ;;  %v542_v27 = vadd.f32 1.0, %v820_v15  ;;  %v553_v28 = vmul.f32 %v540_v20, %v449_v35 }
 0x16a   :  { %v824_v29 = vpop.eup %823  ;;  %v543_v30 = vadd.f32 1.0, %v822_v25  ;;  %v554_v31 = vmul.f32 %v541_v22, %v450_v39  ;;  %704 = vst [vmem:[%s1126_s5 + $0x8] sm:$0xff] %v682_v17   ;;  %v687_v43 = vpack.c.bf16 %v552_v24, %v551_v21 }
 0x16b   :  { %v826_v32 = vpop.eup %825  ;;  %v544_v40 = vadd.f32 1.0, %v824_v29  ;;  %v555_v47 = vmul.f32 %v542_v27, %v451_v36 }
 0x16c   :  { %v828_v48 = vpop.eup %827  ;;  %v545_v49 = vadd.f32 1.0, %v826_v32  ;;  %v556_v51 = vmul.f32 %v543_v30, %v452_v41  ;;  %705 = vst [vmem:[%s1126_s5 + $0x10] sm:$0xff] %v687_v43   ;;  %v692_v45 = vpack.c.bf16 %v554_v31, %v553_v28 }
 0x16d   :  { %v546_v53 = vadd.f32 1.0, %v828_v48  ;;  %v557_v56 = vmul.f32 %v544_v40, %v453_v38 }
 0x16e   :  { %v558_v57 = vmul.f32 %v545_v49, %v454_v44  ;;  %706 = vst [vmem:[%s1126_s5 + $0x18] sm:$0xff] %v692_v45   ;;  %v697_v46 = vpack.c.bf16 %v556_v51, %v555_v47 }
 0x16f   :  { %v559_v58 = vmul.f32 %v546_v53, %v455_v52 }
 0x170   :  { %707 = vst [vmem:[%s1126_s5 + $0x20] sm:$0xff] %v697_v46   ;;  %v702_v50 = vpack.c.bf16 %v558_v57, %v557_v56 }
 0x171   :  { %v673_v59 = vpack.c.bf16 %v559_v58, %v559_v58 }
 0x172   :  { %708 = vst [vmem:[%s1126_s5 + $0x28] sm:$0xff] %v702_v50  }
 0x173   :  { %625 = vst [vmem:[%s1126_s5 + $0x30] sm:$0x1] %v673_v59 }

// kernel: encoder_forward.8
= control target key start
LH: loop header
LB: loop body
LE: loop exit
PB: predicated region body
PF: predicated region fallthrough
CT: control target
= control target key end

     0   :  { %v459_v21 = vmov 0.0   ;;  %vm250_vm0 = vcmask 1041408   ;;  %s562_s1 = inlined_call_operand.vmem [shape: bf16[256,128], index: 1, kind: input, shape index: {}]   ;;  %s563_s0 = inlined_call_operand.vmem [shape: bf16[18,256], index: 0, kind: input, shape index: {}]   ;;  %s564_s2 = inlined_call_operand.vmem [shape: f32[1,128], index: 2, kind: input, shape index: {}]   ;;  %s565_s3 = inlined_call_operand.vmem [shape: f32[1,128], index: 3, kind: input, shape index: {}]   ;;  %s566_s4 = inlined_call_operand.vmem [shape: f32[1,128], index: 4, kind: input, shape index: {}]   ;;  %s567_s5 = inlined_call_operand.vmem [shape: bf16[18,128], index: 5, kind: output, shape index: {}]  }
   0x1   :  { %v430_v0 = vld [vmem:[%s562_s1 + $0x40] sm:$0xff]   ;;  %v432_v2 = vld [vmem:[%s562_s1 + $0x48] sm:$0xff]   ;;  %v434_v4 = vld [vmem:[%s562_s1 + $0x50] sm:$0xff]   ;;  %27 = vst [vmem:[#allocation2 + $0x10] sm:$0x3] %v459_v21 }
   0x2   :  { %v431_v1 = vld [vmem:[%s562_s1] sm:$0xff]   ;;  %385 = vmatprep.subr.bf16.mxu0 %v430_v0  ;;  %413 = vmatprep.subr.bf16.mxu1 %v430_v0  ;;  %v433_v3 = vld [vmem:[%s562_s1 + $0x8] sm:$0xff]   ;;  %v435_v5 = vld [vmem:[%s562_s1 + $0x10] sm:$0xff]  }
   0x3   :  { %386 = vmatpush3.bf16.msra.mxu0 %v431_v1  ;;  %421 = vmatpush3.bf16.msra.mxu1 %v431_v1  ;;  %v436_v6 = vld [vmem:[%s562_s1 + $0x58] sm:$0xff]   ;;  %v438_v8 = vld [vmem:[%s562_s1 + $0x60] sm:$0xff]   ;;  %v440_v10 = vld [vmem:[%s562_s1 + $0x68] sm:$0xff]  }
   0x4   :  { %387 = vmatprep.subr.bf16.mxu0 %v432_v2  ;;  %414 = vmatprep.subr.bf16.mxu1 %v432_v2  ;;  %v437_v7 = vld [vmem:[%s562_s1 + $0x18] sm:$0xff]   ;;  %v439_v9 = vld [vmem:[%s562_s1 + $0x20] sm:$0xff]   ;;  %v33_v12 = vld [vmem:[%s563_s0 + $0x10] sm:$0x11] }
   0x5   :  { %v448_v11 = vld [vmem:[%s563_s0 + $0x4] ss:$8 sps:$4 sm:$0xff]   ;;  %v354_v13 = vcombine.high %v33_v12, %v33_v12  ;;  %v442_v15 = vld [vmem:[%s562_s1 + $0x70] sm:$0xff]   ;;  %v444_v17 = vld [vmem:[%s562_s1 + $0x78] sm:$0xff]   ;;  %v353_v20 = vcombine.low %v33_v12, %v33_v12 }
   0x6   :  { %v441_v14 = vld [vmem:[%s562_s1 + $0x28] sm:$0xff]   ;;  %211 = vmatprep.mubr.bf16.mxu0 %v448_v11  ;;  %v443_v16 = vld [vmem:[%s562_s1 + $0x30] sm:$0xff]   ;;  %v445_v18 = vld [vmem:[%s562_s1 + $0x38] sm:$0xff]  }
   0x7   :  { %388 = vmatpush3.bf16.msra.mxu0 %v433_v3  ;;  %422 = vmatpush3.bf16.msra.mxu1 %v433_v3  ;;  %v446_v19 = vld [vmem:[%s563_s0] ss:$8 sps:$4 sm:$0xff]  }
   0x8   :  { %389 = vmatprep.subr.bf16.mxu0 %v434_v4  ;;  %415 = vmatprep.subr.bf16.mxu1 %v434_v4  ;;  %v30_v25 = vld [vmem:[#allocation2 + $0x10] sm:$0x3]  ;;  %v371_v31 = vld [vmem:[%s564_s2] ss:$0 sm:$0xff] }
   0x9   :  { %219 = vmatprep.mubr.bf16.mxu1 %v354_v13  ;;  %v373_v11 = vld [vmem:[%s566_s4] ss:$0 sm:$0xff] }
   0xb   :  { %390 = vmatpush3.bf16.msra.mxu0 %v435_v5  ;;  %423 = vmatpush3.bf16.msra.mxu1 %v435_v5 }
   0xc   :  { %391 = vmatprep.subr.bf16.mxu0 %v436_v6  ;;  %416 = vmatprep.subr.bf16.mxu1 %v436_v6 }
   0xf   :  { %392 = vmatpush3.bf16.msra.mxu0 %v437_v7  ;;  %424 = vmatpush3.bf16.msra.mxu1 %v437_v7  ;;  %v372_v7 = vld [vmem:[%s565_s3] ss:$0 sm:$0xff] }
  0x10   :  { %393 = vmatprep.subr.bf16.mxu0 %v438_v8  ;;  %417 = vmatprep.subr.bf16.mxu1 %v438_v8 }
  0x13   :  { %394 = vmatpush3.bf16.msra.mxu0 %v439_v9  ;;  %425 = vmatpush3.bf16.msra.mxu1 %v439_v9 }
  0x14   :  { %395 = vmatprep.subr.bf16.mxu0 %v440_v10  ;;  %418 = vmatprep.subr.bf16.mxu1 %v440_v10 }
  0x17   :  { %396 = vmatpush3.bf16.msra.mxu0 %v441_v14  ;;  %426 = vmatpush3.bf16.msra.mxu1 %v441_v14 }
  0x18   :  { %397 = vmatprep.subr.bf16.mxu0 %v442_v15  ;;  %419 = vmatprep.subr.bf16.mxu1 %v442_v15 }
  0x1b   :  { %398 = vmatpush3.bf16.msra.mxu0 %v443_v16  ;;  %427 = vmatpush3.bf16.msra.mxu1 %v443_v16 }
  0x1c   :  { %399 = vmatprep.subr.bf16.mxu0 %v444_v17  ;;  %420 = vmatprep.subr.bf16.mxu1 %v444_v17 }
  0x1f   :  { %400 = vmatpush3.bf16.msra.mxu0 %v445_v18  ;;  %428 = vmatpush3.bf16.msra.mxu1 %v445_v18 }
  0x22   :  { %212 = vmatmul.mubr.bf16.vlgmr.msra.gmra.mrb[0].mxu0 %v446_v19  ;;  %220 = vmatmul.mubr.bf16.vlgmr.msra.gmra.mrb[0].mxu1 %v353_v20 }
  0xf5   :  { %v401_v22 = vpop.f32.mrb[0].mxu0  ;;  %v407_v23 = vpop.f32.mrb[0].mxu1 }
  0xf6   :  { %v402_v24 = vpop.f32.mrb[1].mxu0  ;;  %v408_v26 = vpop.f32.mrb[1].mxu1 }
  0xf7   :  { %v403_v27 = vadd.f32 %v402_v24, %v401_v22  ;;  %v409_v28 = vadd.f32 %v408_v26, %v407_v23  ;;  %v404_v29 = vpop.f32.mrb[2].mxu0  ;;  %v410_v30 = vpop.f32.mrb[2].mxu1 }
  0xf8   :  { %v405_v32 = vpop.f32.mrb[3].mxu0  ;;  %v411_v33 = vpop.f32.mrb[3].mxu1 }
  0xf9   :  { %v229_v34 = vadd.f32 %v409_v28, %v30_v25  ;;  %v406_v35 = vadd.f32 %v405_v32, %v404_v29  ;;  %v246_v36 = vadd.f32 %v403_v27, %v371_v31 }
  0xfb   :  { %232 = vst [vmem:[#allocation2 + $0x10] sm:$0x3] %v229_v34  ;;  %v260_v37 = vmul.f32 %v246_v36, %v246_v36  ;;  %v247_v38 = vadd.f32 %v406_v35, %v371_v31 }
  0xfd   :  { %v249_v39 = vadd.f32 %v247_v38, %v246_v36  ;;  %v261_v40 = vmul.f32 %v247_v38, %v247_v38 }
  0xff   :  { %v263_v41 = vadd.f32 %v261_v40, %v260_v37 }
 0x102   :  { %v238_v42 = vld [vmem:[#allocation2 + $0x10] sm:$0x3] }
 0x103   :  { %v248_v43 = vadd.f32 %v371_v31, %v238_v42 }
 0x105   :  { %v251_v44 = vsel %vm250_vm0, %v248_v43, 0.0  ;;  %v262_v45 = vmul.f32 %v248_v43, %v248_v43 }
 0x106   :  { %v252_v46 = vadd.f32 %v251_v44, %v249_v39 }
 0x107   :  { %v264_v47 = vsel %vm250_vm0, %v262_v45, 0.0 }
 0x108   :  { %v253_v48 = vrot.slane %v252_v46, 4  ;;  %v265_v49 = vadd.f32 %v264_v47, %v263_v41 }
 0x10a   :  { %v254_v50 = vadd.f32 %v253_v48, %v252_v46  ;;  %v266_v51 = vrot.slane %v265_v49, 4 }
 0x10c   :  { %v255_v52 = vrot.slane %v254_v50, 2  ;;  %v267_v53 = vadd.f32 %v266_v51, %v265_v49 }
 0x10e   :  { %v256_v54 = vadd.f32 %v255_v52, %v254_v50  ;;  %v268_v55 = vrot.slane %v267_v53, 2 }
 0x110   :  { %v257_v56 = vrot.slane %v256_v54, 1  ;;  %v269_v57 = vadd.f32 %v268_v55, %v267_v53 }
 0x112   :  { %v258_v58 = vadd.f32 %v257_v56, %v256_v54  ;;  %v270_v59 = vrot.slane %v269_v57, 1 }
 0x114   :  { %v259_v60 = vmul.f32 0.055555556, %v258_v58  ;;  %v271_v61 = vadd.f32 %v270_v59, %v269_v57 }
 0x116   :  { %v272_v62 = vmul.f32 0.055555556, %v271_v61  ;;  %v273_v63 = vmul.f32 %v259_v60, %v259_v60  ;;  %v276_v0 = vsub.f32 %v246_v36, %v259_v60  ;;  %v277_v1 = vsub.f32 %v247_v38, %v259_v60 }
 0x117   :  { %v278_v5 = vsub.f32 %v248_v43, %v259_v60 }
 0x118   :  { %v274_v2 = vsub.f32 %v272_v62, %v273_v63 }
 0x11a   :  { %v275_v3 = vmax.f32 %v274_v2, 0.0 }
 0x11c   :  { %v279_v4 = vadd.f32 1e-05, %v275_v3 }
 0x11e   :  { %451 = vrsqrt.f32 %v279_v4 }
 0x128   :  { %v452_v6 = vpop.eup %451 }
 0x129   :  { %v281_v8 = vmul.f32 %v452_v6, %v276_v0  ;;  %v282_v9 = vmul.f32 %v452_v6, %v277_v1  ;;  %v283_v10 = vmul.f32 %v452_v6, %v278_v5 }
 0x12b   :  { %v291_v12 = vmul.f32 %v372_v7, %v281_v8  ;;  %v292_v13 = vmul.f32 %v372_v7, %v282_v9  ;;  %v293_v14 = vmul.f32 %v372_v7, %v283_v10 }
 0x12d   :  { %v301_v15 = vadd.f32 %v373_v11, %v291_v12  ;;  %v302_v16 = vadd.f32 %v373_v11, %v292_v13  ;;  %v303_v17 = vadd.f32 %v373_v11, %v293_v14 }
 0x12f   :  { %v307_v18 = vmul.f32 0.044715, %v301_v15  ;;  %v308_v19 = vmul.f32 0.044715, %v302_v16  ;;  %v309_v20 = vmul.f32 0.044715, %v303_v17 }
 0x130   :  { %v304_v35 = vmul.f32 0.5, %v301_v15  ;;  %v305_v38 = vmul.f32 0.5, %v302_v16  ;;  %v306_v40 = vmul.f32 0.5, %v303_v17 }
 0x131   :  { %v310_v21 = vmul.f32 %v307_v18, %v301_v15  ;;  %v311_v22 = vmul.f32 %v308_v19, %v302_v16  ;;  %v312_v23 = vmul.f32 %v309_v20, %v303_v17 }
 0x133   :  { %v313_v24 = vmul.f32 %v310_v21, %v301_v15  ;;  %v314_v25 = vmul.f32 %v311_v22, %v302_v16  ;;  %v315_v26 = vmul.f32 %v312_v23, %v303_v17 }
 0x135   :  { %v316_v27 = vadd.f32 %v313_v24, %v301_v15  ;;  %v317_v28 = vadd.f32 %v314_v25, %v302_v16  ;;  %v318_v29 = vadd.f32 %v315_v26, %v303_v17 }
 0x137   :  { %v319_v30 = vmul.f32 0.7978846, %v316_v27  ;;  %v320_v31 = vmul.f32 0.7978846, %v317_v28  ;;  %v321_v32 = vmul.f32 0.7978846, %v318_v29 }
 0x139   :  { %453 = vtanh.f32 %v319_v30 }
 0x13a   :  { %455 = vtanh.f32 %v320_v31 }
 0x13b   :  { %457 = vtanh.f32 %v321_v32 }
 0x143   :  { %v454_v33 = vpop.eup %453 }
 0x144   :  { %v456_v34 = vpop.eup %455  ;;  %v325_v36 = vadd.f32 1.0, %v454_v33 }
 0x145   :  { %v458_v37 = vpop.eup %457  ;;  %v326_v39 = vadd.f32 1.0, %v456_v34 }
 0x146   :  { %v327_v41 = vadd.f32 1.0, %v458_v37  ;;  %v328_v42 = vmul.f32 %v325_v36, %v304_v35 }
 0x147   :  { %v329_v43 = vmul.f32 %v326_v39, %v305_v38 }
 0x148   :  { %v330_v44 = vmul.f32 %v327_v41, %v306_v40 }
 0x149   :  { %v383_v45 = vpack.c.bf16 %v329_v43, %v328_v42 }
 0x14a   :  { %v379_v46 = vpack.c.bf16 %v330_v44, %v330_v44 }
 0x14b   :  { %384 = vst [vmem:[%s567_s5] sm:$0xff] %v383_v45  }
 0x14c   :  { %346 = vst [vmem:[%s567_s5 + $0x8] sm:$0x1] %v379_v46 }

// kernel: encoder_forward.9
= control target key start
LH: loop header
LB: loop body
LE: loop exit
PB: predicated region body
PF: predicated region fallthrough
CT: control target
= control target key end

     0   :  { %v507_v1 = vmov 0.0   ;;  %vm508_vm0 = vmmov 0   ;;  %v509_v16 = vmov 1966171168   ;;  %v88_v18 = vlaneseq  ;;  %s637_s1 = inlined_call_operand.vmem [shape: bf16[384,128], index: 1, kind: input, shape index: {}]   ;;  %s638_s0 = inlined_call_operand.vmem [shape: bf16[2,384], index: 0, kind: input, shape index: {}]   ;;  %s639_s2 = inlined_call_operand.vmem [shape: f32[1,128], index: 2, kind: input, shape index: {}]   ;;  %s640_s3 = inlined_call_operand.vmem [shape: f32[1,128], index: 3, kind: input, shape index: {}]   ;;  %s641_s4 = inlined_call_operand.vmem [shape: f32[1,128], index: 4, kind: input, shape index: {}]   ;;  %s642_s5 = inlined_call_operand.vmem [shape: bf16[2,128], index: 5, kind: output, shape index: {}]  }
   0x1   :  { %v479_v0 = vld [vmem:[%s637_s1 + $0x40] sm:$0xff]   ;;  %456 = vmatprep.subr.bf16.mxu1 %v507_v1  ;;  %25 = vst [vmem:[#allocation2] sm:$0x3] %v507_v1  ;;  %472 = vmatprep.mubr.msk.bf16.mxu1 %vm508_vm0, %v507_v1  ;;  %v482_v4 = vld [vmem:[%s637_s1 + $0x48] sm:$0xff]   ;;  %v485_v7 = vld [vmem:[%s637_s1 + $0x50] sm:$0xff]   ;;  %v86_v17 = vunpack.c.l.s4 %v509_v16  ;;  %vm341_vm1 = vcmask 1041408  }
   0x2   :  { %v480_v2 = vld [vmem:[%s637_s1] sm:$0xff]   ;;  %425 = vmatprep.subr.bf16.mxu0 %v479_v0  ;;  %v483_v5 = vld [vmem:[%s637_s1 + $0x8] sm:$0xff]   ;;  %v486_v8 = vld [vmem:[%s637_s1 + $0x10] sm:$0xff]   ;;  %v89_v23 = vshrl.u32 %v88_v18, 7 }
   0x3   :  { %v481_v3 = vld [vmem:[%s637_s1 + $0x80] sm:$0xff]   ;;  %426 = vmatpush3.bf16.msra.mxu0 %v480_v2  ;;  %v484_v6 = vld [vmem:[%s637_s1 + $0x88] sm:$0xff]   ;;  %v487_v9 = vld [vmem:[%s637_s1 + $0x90] sm:$0xff]   ;;  %v87_v22 = vunpack.c.0.s8 %v86_v17 }
   0x4   :  { %457 = vmatpush3.bf16.msra.mxu1 %v481_v3  ;;  %427 = vmatprep.subr.bf16.mxu0 %v482_v4  ;;  %v488_v10 = vld [vmem:[%s637_s1 + $0x58] sm:$0xff]   ;;  %v491_v13 = vld [vmem:[%s637_s1 + $0x60] sm:$0xff]   ;;  %v494_v19 = vld [vmem:[%s637_s1 + $0x68] sm:$0xff]  }
   0x5   :  { %458 = vmatprep.subr.bf16.mxu1 %v507_v1  ;;  %v489_v11 = vld [vmem:[%s637_s1 + $0x18] sm:$0xff]   ;;  %v492_v14 = vld [vmem:[%s637_s1 + $0x20] sm:$0xff]   ;;  %v495_v20 = vld [vmem:[%s637_s1 + $0x28] sm:$0xff]   ;;  %v90_v26 = vsub.s32 %v87_v22, %v89_v23 }
   0x6   :  { %v490_v12 = vld [vmem:[%s637_s1 + $0x98] sm:$0xff]   ;;  %v493_v15 = vld [vmem:[%s637_s1 + $0xa0] sm:$0xff]   ;;  %v496_v21 = vld [vmem:[%s637_s1 + $0xa8] sm:$0xff]  }
   0x7   :  { %428 = vmatpush3.bf16.msra.mxu0 %v483_v5  ;;  %v497_v24 = vld [vmem:[%s637_s1 + $0x70] sm:$0xff]   ;;  %v500_v28 = vld [vmem:[%s637_s1 + $0x78] sm:$0xff]   ;;  %v397_v29 = vld.sshfl [vmem:[%s638_s0] sm:$0x13 pattern:$0x75316420] }
   0x8   :  { %459 = vmatpush3.bf16.msra.mxu1 %v484_v6  ;;  %429 = vmatprep.subr.bf16.mxu0 %v485_v7  ;;  %v498_v25 = vld [vmem:[%s637_s1 + $0x30] sm:$0xff]   ;;  %v84_v30 = vcombine.high %v397_v29, %v397_v29  ;;  %v501_v31 = vld [vmem:[%s637_s1 + $0x38] sm:$0xff]   ;;  %v91_v33 = vrot.slane %v397_v29, %v90_v26  ;;  %v26_v42 = vld [vmem:[#allocation2] sm:$0x3] }
   0x9   :  { %460 = vmatprep.subr.bf16.mxu1 %v507_v1  ;;  %v499_v27 = vld [vmem:[%s637_s1 + $0xb0] sm:$0xff]   ;;  %v502_v34 = vld [vmem:[%s637_s1 + $0xb8] sm:$0xff]   ;;  %v422_v48 = vld [vmem:[%s639_s2] ss:$0 sm:$0xff] }
   0xa   :  { %v98_v32 = vrot.slane %v84_v30, %v90_v26  ;;  %v99_v35 = vcombine.high %v91_v33, %v91_v33 }
   0xb   :  { %430 = vmatpush3.bf16.msra.mxu0 %v486_v8 }
   0xc   :  { %461 = vmatpush3.bf16.msra.mxu1 %v487_v9  ;;  %431 = vmatprep.subr.bf16.mxu0 %v488_v10  ;;  %v423_v10 = vld [vmem:[%s640_s3] ss:$0 sm:$0xff] }
   0xd   :  { %462 = vmatprep.subr.bf16.mxu1 %v507_v1  ;;  %279 = vmatprep.mubr.bf16.mxu0 %v98_v32 }
   0xf   :  { %432 = vmatpush3.bf16.msra.mxu0 %v489_v11 }
  0x10   :  { %463 = vmatpush3.bf16.msra.mxu1 %v490_v12  ;;  %433 = vmatprep.subr.bf16.mxu0 %v491_v13  ;;  %v424_v12 = vld [vmem:[%s641_s4] ss:$0 sm:$0xff] }
  0x11   :  { %464 = vmatprep.subr.bf16.mxu1 %v507_v1 }
  0x13   :  { %434 = vmatpush3.bf16.msra.mxu0 %v492_v14 }
  0x14   :  { %465 = vmatpush3.bf16.msra.mxu1 %v493_v15  ;;  %435 = vmatprep.subr.bf16.mxu0 %v494_v19 }
  0x15   :  { %466 = vmatprep.subr.bf16.mxu1 %v507_v1 }
  0x17   :  { %436 = vmatpush3.bf16.msra.mxu0 %v495_v20 }
  0x18   :  { %467 = vmatpush3.bf16.msra.mxu1 %v496_v21  ;;  %437 = vmatprep.subr.bf16.mxu0 %v497_v24 }
  0x19   :  { %468 = vmatprep.subr.bf16.mxu1 %v507_v1 }
  0x1b   :  { %438 = vmatpush3.bf16.msra.mxu0 %v498_v25 }
  0x1c   :  { %469 = vmatpush3.bf16.msra.mxu1 %v499_v27  ;;  %439 = vmatprep.subr.bf16.mxu0 %v500_v28 }
  0x1d   :  { %470 = vmatprep.subr.bf16.mxu1 %v507_v1 }
  0x1f   :  { %440 = vmatpush3.bf16.msra.mxu0 %v501_v31 }
  0x20   :  { %471 = vmatpush3.bf16.msra.mxu1 %v502_v34 }
  0x22   :  { %280 = vmatmul.mubr.bf16.vlgmr.msra.gmra.mrb[0].mxu0 %v91_v33 }
  0x23   :  { %473 = vmatmul.mubr.bf16.vlgmr.msra.gmra.mrb[0].mxu1 %v99_v35 }
  0xf5   :  { %v441_v36 = vpop.f32.mrb[0].mxu0 }
  0xf6   :  { %v321_v37 = vpop.f32.mrb[0].mxu1  ;;  %v442_v38 = vpop.f32.mrb[1].mxu0 }
  0xf7   :  { %v443_v39 = vadd.f32 %v442_v38, %v441_v36  ;;  %v474_v40 = vpop.f32.mrb[1].mxu1  ;;  %v444_v41 = vpop.f32.mrb[2].mxu0 }
  0xf8   :  { %v324_v43 = vpop.f32.mrb[2].mxu1  ;;  %v445_v44 = vpop.f32.mrb[3].mxu0 }
  0xf9   :  { %v322_v45 = vadd.f32 %v443_v39, %v321_v37  ;;  %v475_v46 = vpop.f32.mrb[3].mxu1 }
  0xfb   :  { %v327_v47 = vadd.f32 %v322_v45, %v26_v42 }
  0xfd   :  { %328 = vst [vmem:[#allocation2] sm:$0x3] %v327_v47 }
 0x104   :  { %v332_v49 = vld [vmem:[#allocation2] sm:$0x3] }
 0x105   :  { %v340_v50 = vadd.f32 %v422_v48, %v332_v49 }
 0x107   :  { %v342_v51 = vsel %vm341_vm1, %v340_v50, 0.0  ;;  %v350_v52 = vmul.f32 %v340_v50, %v340_v50 }
 0x108   :  { %v343_v53 = vrot.slane %v342_v51, 4 }
 0x109   :  { %v351_v54 = vsel %vm341_vm1, %v350_v52, 0.0 }
 0x10a   :  { %v344_v55 = vadd.f32 %v343_v53, %v342_v51  ;;  %v352_v56 = vrot.slane %v351_v54, 4 }
 0x10c   :  { %v345_v57 = vrot.slane %v344_v55, 2  ;;  %v353_v58 = vadd.f32 %v352_v56, %v351_v54 }
 0x10e   :  { %v346_v59 = vadd.f32 %v345_v57, %v344_v55  ;;  %v354_v60 = vrot.slane %v353_v58, 2 }
 0x110   :  { %v347_v61 = vrot.slane %v346_v59, 1  ;;  %v355_v62 = vadd.f32 %v354_v60, %v353_v58 }
 0x112   :  { %v348_v63 = vadd.f32 %v347_v61, %v346_v59  ;;  %v356_v0 = vrot.slane %v355_v62, 1 }
 0x114   :  { %v349_v1 = vmul.f32 0.5, %v348_v63  ;;  %v357_v2 = vadd.f32 %v356_v0, %v355_v62 }
 0x116   :  { %v358_v3 = vmul.f32 0.5, %v357_v2  ;;  %v359_v4 = vmul.f32 %v349_v1, %v349_v1  ;;  %v362_v8 = vsub.f32 %v340_v50, %v349_v1 }
 0x118   :  { %v360_v5 = vsub.f32 %v358_v3, %v359_v4 }
 0x11a   :  { %v361_v6 = vmax.f32 %v360_v5, 0.0 }
 0x11c   :  { %v363_v7 = vadd.f32 1e-05, %v361_v6 }
 0x11e   :  { %503 = vrsqrt.f32 %v363_v7 }
 0x128   :  { %v504_v9 = vpop.eup %503 }
 0x129   :  { %v365_v11 = vmul.f32 %v504_v9, %v362_v8 }
 0x12b   :  { %v373_v13 = vmul.f32 %v423_v10, %v365_v11 }
 0x12d   :  { %v381_v14 = vadd.f32 %v424_v12, %v373_v13 }
 0x12f   :  { %v383_v15 = vmul.f32 0.044715, %v381_v14  ;;  %v382_v21 = vmul.f32 0.5, %v381_v14 }
 0x131   :  { %v384_v16 = vmul.f32 %v383_v15, %v381_v14 }
 0x133   :  { %v385_v17 = vmul.f32 %v384_v16, %v381_v14 }
 0x135   :  { %v386_v18 = vadd.f32 %v385_v17, %v381_v14 }
 0x137   :  { %v387_v19 = vmul.f32 0.7978846, %v386_v18 }
 0x139   :  { %505 = vtanh.f32 %v387_v19 }
 0x143   :  { %v506_v20 = vpop.eup %505 }
 0x144   :  { %v389_v22 = vadd.f32 1.0, %v506_v20 }
 0x146   :  { %v390_v23 = vmul.f32 %v389_v22, %v382_v21 }
 0x148   :  { %v391_v24 = vpack.c.bf16 %v390_v23, %v390_v23 }
 0x14a   :  { %392 = vst [vmem:[%s642_s5] sm:$0x1] %v391_v24 }

// kernel: encoder_forward.10
= control target key start
LH: loop header
LB: loop body
LE: loop exit
PB: predicated region body
PF: predicated region fallthrough
CT: control target
= control target key end

     0   :  { %s1391_s18 = smov 0   ;;  %s1393_s19 = smov 0   ;;  %s1640_s0 = inlined_call_operand.vmem [shape: bf16[2,128], index: 0, kind: input, shape index: {}]   ;;  %s1641_s1 = inlined_call_operand.vmem [shape: bf16[128,4096], index: 1, kind: input, shape index: {}]   ;;  %s1642_s2 = inlined_call_operand.vmem [shape: f32[1,4096], index: 2, kind: input, shape index: {}]   ;;  %s1643_s3 = inlined_call_operand.vmem [shape: f32[1,4096], index: 3, kind: input, shape index: {}]   ;;  %s1644_s4 = inlined_call_operand.vmem [shape: f32[1,4096], index: 4, kind: input, shape index: {}]   ;;  %s1645_s5 = inlined_call_operand.vmem [shape: bf16[2,4096], index: 5, kind: output, shape index: {}]  }
   0x1   :  { %s1395_s20 = smov 0   ;;  %s1397_s21 = smov 0  }
   0x2   :  { %s1399_s22 = smov 0  }
   0x3 LB: > { %s27_s23 = sadd.s32 1, %s1352_s21  ;;  %p69_p1 = scmp.ne.s32.totalorder %s1344_s19, %s1340_s18  ;;  %s1356_s22 = sphi %s1399_s22, %s15_s22   ;;  %s1352_s21 = sphi %s1397_s21, %s1649_s21   ;;  %s1348_s20 = sphi %s1395_s20, %s1648_s20   ;;  %s1344_s19 = sphi %s1393_s19, %s1647_s19   ;;  %s1340_s18 = sphi %s1391_s18, %s1646_s18  }
   0x4   : > { %p29_p0 = scmp.ge.s32.totalorder %s27_s23, 8  ;;  %p70_p2 = scmp.eq.s32.totalorder %s1356_s22, 0 }
   0x5   : > { %s62_s25 = sadd.s32 1, %s1344_s19  ;;  %p1169_p5 = scmp.ge.s32.totalorder %s1356_s22, 8 }
   0x6   : > { %s1651_s23 = smov (%p29_p0, %s27_s23), 0  ;;  %p71_p3 = por %p70_p2, %p69_p1 }
   0x7   : > { %s58_s24 = ssub.s32 %s1352_s21, %s1651_s23  ;;  %205 = sbr.rel (%p1169_p5) target bundleno = 34 (0x22), region = 20 }
   0x8   : > { %p60_p4 = scmp.eq.s32.totalorder %s58_s24, 0 }
   0xa   : > { %s1426_s26 = scalar_select %p60_p4, %s1344_s19, %s62_s25  }
   0xe   : > { %208 = sbr.rel (!%p71_p3) target bundleno = 34 (0x22), region = 24  ;;  %s210_s27 = sand.u32 (%p71_p3), 1, %s1344_s19  }
   0xf   : > { %s1216_s28 = sshll.u32 (%p71_p3), %s1352_s21, 4  ;;  %s1170_s29 = sshll.u32 (%p71_p3), %s210_s27, 8 }
  0x10   : > { %s1434_s7 = scalar_lea.vmem (%p71_p3), %s1641_s1, %s1216_s28  ;;  %s1439_s8 = scalar_lea.vmem (%p71_p3), [#allocation3], %s1170_s29 }
  0x11   : > { %v231_v0 = vld [vmem:[%s1434_s7] sm:$0xff] (%p71_p3)  ;;  %v233_v1 = vld [vmem:[%s1434_s7 + $0x8] sm:$0xff] (%p71_p3) }
  0x12   : > { %v235_v2 = vld [vmem:[%s1434_s7 + $0x80] sm:$0xff] (%p71_p3)  ;;  %232 = vst [vmem:[%s1439_s8] sm:$0xff] (%p71_p3), %v231_v0  ;;  %234 = vst [vmem:[%s1439_s8 + $0x8] sm:$0xff] (%p71_p3), %v233_v1  ;;  %v237_v3 = vld [vmem:[%s1434_s7 + $0x88] sm:$0xff] (%p71_p3) }
  0x13   : > { %236 = vst [vmem:[%s1439_s8 + $0x10] sm:$0xff] (%p71_p3), %v235_v2  ;;  %v239_v4 = vld [vmem:[%s1434_s7 + $0x100] sm:$0xff] (%p71_p3)  ;;  %v241_v5 = vld [vmem:[%s1434_s7 + $0x108] sm:$0xff] (%p71_p3)  ;;  %238 = vst [vmem:[%s1439_s8 + $0x18] sm:$0xff] (%p71_p3), %v237_v3 }
  0x14   : > { %240 = vst [vmem:[%s1439_s8 + $0x20] sm:$0xff] (%p71_p3), %v239_v4  ;;  %242 = vst [vmem:[%s1439_s8 + $0x28] sm:$0xff] (%p71_p3), %v241_v5  ;;  %v243_v6 = vld [vmem:[%s1434_s7 + $0x180] sm:$0xff] (%p71_p3)  ;;  %v245_v7 = vld [vmem:[%s1434_s7 + $0x188] sm:$0xff] (%p71_p3) }
  0x15   : > { %v247_v8 = vld [vmem:[%s1434_s7 + $0x200] sm:$0xff]  ;;  %244 = vst [vmem:[%s1439_s8 + $0x30] sm:$0xff] %v243_v6  ;;  %246 = vst [vmem:[%s1439_s8 + $0x38] sm:$0xff] %v245_v7  ;;  %v249_v9 = vld [vmem:[%s1434_s7 + $0x208] sm:$0xff] }
  0x16   : > { %248 = vst [vmem:[%s1439_s8 + $0x40] sm:$0xff] %v247_v8  ;;  %v251_v10 = vld [vmem:[%s1434_s7 + $0x280] sm:$0xff]  ;;  %v253_v11 = vld [vmem:[%s1434_s7 + $0x288] sm:$0xff]  ;;  %250 = vst [vmem:[%s1439_s8 + $0x48] sm:$0xff] %v249_v9 }
  0x17   : > { %252 = vst [vmem:[%s1439_s8 + $0x50] sm:$0xff] %v251_v10  ;;  %254 = vst [vmem:[%s1439_s8 + $0x58] sm:$0xff] %v253_v11  ;;  %v255_v12 = vld [vmem:[%s1434_s7 + $0x300] sm:$0xff]  ;;  %v257_v13 = vld [vmem:[%s1434_s7 + $0x308] sm:$0xff] }
  0x18   : > { %v259_v14 = vld [vmem:[%s1434_s7 + $0x380] sm:$0xff]  ;;  %256 = vst [vmem:[%s1439_s8 + $0x60] sm:$0xff] %v255_v12  ;;  %258 = vst [vmem:[%s1439_s8 + $0x68] sm:$0xff] %v257_v13  ;;  %v261_v15 = vld [vmem:[%s1434_s7 + $0x388] sm:$0xff] }
  0x19   : > { %260 = vst [vmem:[%s1439_s8 + $0x70] sm:$0xff] %v259_v14  ;;  %v263_v16 = vld [vmem:[%s1434_s7 + $0x400] sm:$0xff]  ;;  %v265_v17 = vld [vmem:[%s1434_s7 + $0x408] sm:$0xff]  ;;  %262 = vst [vmem:[%s1439_s8 + $0x78] sm:$0xff] %v261_v15 }
  0x1a   : > { %264 = vst [vmem:[%s1439_s8 + $0x80] sm:$0xff] %v263_v16  ;;  %266 = vst [vmem:[%s1439_s8 + $0x88] sm:$0xff] %v265_v17  ;;  %v267_v18 = vld [vmem:[%s1434_s7 + $0x480] sm:$0xff]  ;;  %v269_v19 = vld [vmem:[%s1434_s7 + $0x488] sm:$0xff] }
  0x1b   : > { %v271_v20 = vld [vmem:[%s1434_s7 + $0x500] sm:$0xff]  ;;  %268 = vst [vmem:[%s1439_s8 + $0x90] sm:$0xff] %v267_v18  ;;  %270 = vst [vmem:[%s1439_s8 + $0x98] sm:$0xff] %v269_v19  ;;  %v273_v21 = vld [vmem:[%s1434_s7 + $0x508] sm:$0xff] }
  0x1c   : > { %272 = vst [vmem:[%s1439_s8 + $0xa0] sm:$0xff] %v271_v20  ;;  %v275_v22 = vld [vmem:[%s1434_s7 + $0x580] sm:$0xff]  ;;  %v277_v23 = vld [vmem:[%s1434_s7 + $0x588] sm:$0xff]  ;;  %274 = vst [vmem:[%s1439_s8 + $0xa8] sm:$0xff] %v273_v21 }
  0x1d   : > { %276 = vst [vmem:[%s1439_s8 + $0xb0] sm:$0xff] %v275_v22  ;;  %278 = vst [vmem:[%s1439_s8 + $0xb8] sm:$0xff] %v277_v23  ;;  %v279_v24 = vld [vmem:[%s1434_s7 + $0x600] sm:$0xff]  ;;  %v281_v25 = vld [vmem:[%s1434_s7 + $0x608] sm:$0xff] }
  0x1e   : > { %v283_v26 = vld [vmem:[%s1434_s7 + $0x680] sm:$0xff]  ;;  %280 = vst [vmem:[%s1439_s8 + $0xc0] sm:$0xff] %v279_v24  ;;  %282 = vst [vmem:[%s1439_s8 + $0xc8] sm:$0xff] %v281_v25  ;;  %v285_v27 = vld [vmem:[%s1434_s7 + $0x688] sm:$0xff] }
  0x1f   : > { %284 = vst [vmem:[%s1439_s8 + $0xd0] sm:$0xff] %v283_v26  ;;  %v287_v28 = vld [vmem:[%s1434_s7 + $0x700] sm:$0xff]  ;;  %v289_v29 = vld [vmem:[%s1434_s7 + $0x708] sm:$0xff]  ;;  %286 = vst [vmem:[%s1439_s8 + $0xd8] sm:$0xff] %v285_v27 }
  0x20   : > { %288 = vst [vmem:[%s1439_s8 + $0xe0] sm:$0xff] %v287_v28  ;;  %290 = vst [vmem:[%s1439_s8 + $0xe8] sm:$0xff] %v289_v29  ;;  %v291_v30 = vld [vmem:[%s1434_s7 + $0x780] sm:$0xff]  ;;  %v293_v31 = vld [vmem:[%s1434_s7 + $0x788] sm:$0xff] }
  0x21   : > { %292 = vst [vmem:[%s1439_s8 + $0xf0] sm:$0xff] %v291_v30  ;;  %294 = vst [vmem:[%s1439_s8 + $0xf8] sm:$0xff] %v293_v31 }
  0x22 PF: > { %p1173_p6 = scmp.ge.s32.totalorder %s1356_s22, 1  ;;  %p323_p7 = scmp.lt.s32.totalorder %s1356_s22, 9 }
  0x24   : > { %p324_p8 = pnand %p1173_p6, %p323_p7 }
  0x25   : > { %s330_s9 = sand.u32 (!%p324_p8), 1, %s1340_s18   ;;  %v1358_v32 = vmov (!%p324_p8), 0   ;;  %v403_v1 = vld [vmem:[%s1640_s0] sm:$0x1] (!%p324_p8)  ;;  %s1175_s14 = sshll.u32 (!%p324_p8), %s1348_s20, 2  ;;  %v687_v2 = vlaneseq (!%p324_p8)  ;;  %vm765_vm0 = vcmask (!%p324_p8), 1041408  }
  0x26   : > { %327 = sbr.rel (%p324_p8) target bundleno = 386 (0x182), region = 59  ;;  %s1174_s10 = sshll.u32 (!%p324_p8), %s330_s9, 8  ;;  %628 = vmatprep.mubr.bf16.mxu0 (!%p324_p8), %v1358_v32  ;;  %669 = vmatprep.mubr.bf16.mxu1 (!%p324_p8), %v1358_v32  ;;  %v1359_v4 = vmov (!%p324_p8), 1983009808  }
  0x27   : > { %s1505_s11 = scalar_lea.vmem (!%p324_p8), [#allocation3], %s1174_s10  ;;  %p377_p9 = scmp.lt.s32.totalorder (!%p324_p8), %s1175_s14, 31  ;;  %v1545_v3 = vshrl.u32 (!%p324_p8), %v687_v2, 7  ;;  %v685_v5 = vunpack.c.l.s4 (!%p324_p8), %v1359_v4 }
  0x28   : > { %v1260_v33 = vld [vmem:[%s1505_s11 + $0x4] ss:$16 sps:$4 sm:$0xff] (!%p324_p8)   ;;  %v1262_v34 = vld [vmem:[%s1505_s11 + $0xc] ss:$16 sps:$4 sm:$0xff] (!%p324_p8)   ;;  %v1264_v35 = vld [vmem:[%s1505_s11] ss:$16 sps:$4 sm:$0xff] (!%p324_p8)  }
  0x29   : > { %596 = vmatprep.subr.bf16.mxu0 (!%p324_p8), %v1260_v33  ;;  %v1265_v36 = vld [vmem:[%s1505_s11 + $0x8] ss:$16 sps:$4 sm:$0xff] (!%p324_p8)   ;;  %637 = vmatprep.subr.bf16.mxu1 (!%p324_p8), %v1262_v34  ;;  %v1266_v37 = vld [vmem:[%s1505_s11 + $0x24] ss:$16 sps:$4 sm:$0xff] (!%p324_p8)   ;;  %v1268_v38 = vld [vmem:[%s1505_s11 + $0x2c] ss:$16 sps:$4 sm:$0xff] (!%p324_p8)   ;;  %v686_v11 = vunpack.c.0.s8 (!%p324_p8), %v685_v5 }
  0x2a   : > { %597 = vmatpush1.bf16.msra.mxu0 (!%p324_p8), %v1264_v35  ;;  %638 = vmatpush1.bf16.msra.mxu1 (!%p324_p8), %v1265_v36  ;;  %v1270_v39 = vld [vmem:[%s1505_s11 + $0x20] ss:$16 sps:$4 sm:$0xff] (!%p324_p8)   ;;  %v1271_v40 = vld [vmem:[%s1505_s11 + $0x28] ss:$16 sps:$4 sm:$0xff] (!%p324_p8)   ;;  %v1272_v41 = vld [vmem:[%s1505_s11 + $0x44] ss:$16 sps:$4 sm:$0xff] (!%p324_p8)  }
  0x2b   : > { %598 = vmatprep.subr.bf16.mxu0 (!%p324_p8), %v1266_v37  ;;  %639 = vmatprep.subr.bf16.mxu1 (!%p324_p8), %v1268_v38  ;;  %v1274_v42 = vld [vmem:[%s1505_s11 + $0x4c] ss:$16 sps:$4 sm:$0xff] (!%p324_p8)   ;;  %v1276_v43 = vld [vmem:[%s1505_s11 + $0x40] ss:$16 sps:$4 sm:$0xff] (!%p324_p8)   ;;  %v1277_v44 = vld [vmem:[%s1505_s11 + $0x48] ss:$16 sps:$4 sm:$0xff] (!%p324_p8)   ;;  %v1568_v16 = vsub.s32 (!%p324_p8), %v686_v11, %v1545_v3 }
  0x2c   : > { %v1278_v45 = vld [vmem:[%s1505_s11 + $0x64] ss:$16 sps:$4 sm:$0xff] (!%p324_p8)   ;;  %v1280_v46 = vld [vmem:[%s1505_s11 + $0x6c] ss:$16 sps:$4 sm:$0xff] (!%p324_p8)   ;;  %v1282_v47 = vld [vmem:[%s1505_s11 + $0x60] ss:$16 sps:$4 sm:$0xff] (!%p324_p8)  }
  0x2d   : > { %v1283_v48 = vld [vmem:[%s1505_s11 + $0x68] ss:$16 sps:$4 sm:$0xff]   ;;  %v1284_v49 = vld [vmem:[%s1505_s11 + $0x84] ss:$16 sps:$4 sm:$0xff]   ;;  %v1286_v50 = vld [vmem:[%s1505_s11 + $0x8c] ss:$16 sps:$4 sm:$0xff]  }
  0x2e   : > { %599 = vmatpush1.bf16.msra.mxu0 %v1270_v39  ;;  %640 = vmatpush1.bf16.msra.mxu1 %v1271_v40  ;;  %v1288_v51 = vld [vmem:[%s1505_s11 + $0x80] ss:$16 sps:$4 sm:$0xff]   ;;  %v1289_v52 = vld [vmem:[%s1505_s11 + $0x88] ss:$16 sps:$4 sm:$0xff]   ;;  %v1290_v53 = vld [vmem:[%s1505_s11 + $0xa4] ss:$16 sps:$4 sm:$0xff]  }
  0x2f   : > { %600 = vmatprep.subr.bf16.mxu0 %v1272_v41  ;;  %641 = vmatprep.subr.bf16.mxu1 %v1274_v42  ;;  %v1292_v54 = vld [vmem:[%s1505_s11 + $0xac] ss:$16 sps:$4 sm:$0xff]   ;;  %v1294_v55 = vld [vmem:[%s1505_s11 + $0xa0] ss:$16 sps:$4 sm:$0xff]   ;;  %v1295_v56 = vld [vmem:[%s1505_s11 + $0xa8] ss:$16 sps:$4 sm:$0xff]  }
  0x30   : > { %v1296_v57 = vld [vmem:[%s1505_s11 + $0xc4] ss:$16 sps:$4 sm:$0xff]   ;;  %v1298_v58 = vld [vmem:[%s1505_s11 + $0xcc] ss:$16 sps:$4 sm:$0xff]   ;;  %v1300_v59 = vld [vmem:[%s1505_s11 + $0xc0] ss:$16 sps:$4 sm:$0xff]  }
  0x31   : > { %v1301_v60 = vld [vmem:[%s1505_s11 + $0xc8] ss:$16 sps:$4 sm:$0xff]   ;;  %v1302_v61 = vld [vmem:[%s1505_s11 + $0xe4] ss:$16 sps:$4 sm:$0xff]   ;;  %v1304_v62 = vld [vmem:[%s1505_s11 + $0xec] ss:$16 sps:$4 sm:$0xff]  }
  0x32   : > { %601 = vmatpush1.bf16.msra.mxu0 %v1276_v43  ;;  %642 = vmatpush1.bf16.msra.mxu1 %v1277_v44  ;;  %v1306_v63 = vld [vmem:[%s1505_s11 + $0xe0] ss:$16 sps:$4 sm:$0xff]   ;;  %v1307_v0 = vld [vmem:[%s1505_s11 + $0xe8] ss:$16 sps:$4 sm:$0xff]   ;;  %s1653_s14 = smov (!%p377_p9, %s1175_s14), 31  ;;  %v1552_v6 = vsub.s32 0, %v1545_v3 }
  0x33   : > { %602 = vmatprep.subr.bf16.mxu0 %v1278_v45  ;;  %643 = vmatprep.subr.bf16.mxu1 %v1280_v46  ;;  %s379_s17 = scalar_lea.vmem %s1642_s2, %s1653_s14  ;;  %v1555_v7 = vsub.s32 1, %v1545_v3  ;;  %v1558_v8 = vsub.s32 2, %v1545_v3  ;;  %v1561_v9 = vsub.s32 3, %v1545_v3  ;;  %s384_s24 = scalar_lea.vmem %s1643_s3, %s1653_s14 }
  0x34   : > { %v706_v10 = vld [vmem:[%s379_s17] sm:$0xf]  ;;  %s389_s28 = scalar_lea.vmem %s1644_s4, %s1653_s14  ;;  %s394_s6 = scalar_lea.vmem %s1645_s5, %s1653_s14 }
  0x35   : > { %v711_v12 = vrot.slane %v706_v10, %v1552_v6  ;;  %v715_v13 = vrot.slane %v706_v10, %v1555_v7  ;;  %v719_v14 = vrot.slane %v706_v10, %v1558_v8  ;;  %v723_v15 = vrot.slane %v706_v10, %v1561_v9 }
  0x36   : > { %603 = vmatpush1.bf16.msra.mxu0 %v1282_v47  ;;  %644 = vmatpush1.bf16.msra.mxu1 %v1283_v48 }
  0x37   : > { %604 = vmatprep.subr.bf16.mxu0 %v1284_v49  ;;  %645 = vmatprep.subr.bf16.mxu1 %v1286_v50  ;;  %v724_v17 = vcombine.low %v711_v12, %v715_v13  ;;  %v725_v18 = vcombine.low %v719_v14, %v723_v15 }
  0x39   : > { %v732_v21 = vrot.slane %v724_v17, %v1568_v16  ;;  %v739_v22 = vrot.slane %v725_v18, %v1568_v16 }
  0x3a   : > { %605 = vmatpush1.bf16.msra.mxu0 %v1288_v51  ;;  %646 = vmatpush1.bf16.msra.mxu1 %v1289_v52 }
  0x3b   : > { %606 = vmatprep.subr.bf16.mxu0 %v1290_v53  ;;  %647 = vmatprep.subr.bf16.mxu1 %v1292_v54  ;;  %v740_v33 = vcombine.low %v732_v21, %v739_v22 }
  0x3e   : > { %607 = vmatpush1.bf16.msra.mxu0 %v1294_v55  ;;  %648 = vmatpush1.bf16.msra.mxu1 %v1295_v56 }
  0x3f   : > { %608 = vmatprep.subr.bf16.mxu0 %v1296_v57  ;;  %649 = vmatprep.subr.bf16.mxu1 %v1298_v58 }
  0x42   : > { %609 = vmatpush1.bf16.msra.mxu0 %v1300_v59  ;;  %650 = vmatpush1.bf16.msra.mxu1 %v1301_v60 }
  0x43   : > { %610 = vmatprep.subr.bf16.mxu0 %v1302_v61  ;;  %651 = vmatprep.subr.bf16.mxu1 %v1304_v62 }
  0x46   : > { %611 = vmatpush1.bf16.msra.mxu0 %v1306_v63  ;;  %652 = vmatpush1.bf16.msra.mxu1 %v1307_v0 }
  0x49   : > { %629 = vmatmul.mubr.bf16.vlgmr.msra.gmra.mrb[0].mxu0 %v403_v1  ;;  %670 = vmatmul.mubr.bf16.vlgmr.msra.gmra.mrb[0].mxu1 %v403_v1 }
 0x11c   : > { %v630_v19 = vpop.f32.mrb[0].mxu0  ;;  %v671_v20 = vpop.f32.mrb[0].mxu1 }
 0x11d   : > { %v632_v23 = vpop.f32.mrb[1].mxu0  ;;  %v673_v24 = vpop.f32.mrb[1].mxu1 }
 0x11e   : > { %v682_v25 = vcombine.low %v630_v19, %v632_v23  ;;  %v683_v26 = vcombine.low %v671_v20, %v673_v24  ;;  %v634_v27 = vpop.f32.mrb[2].mxu0  ;;  %v675_v28 = vpop.f32.mrb[2].mxu1 }
 0x11f   : > { %v635_v29 = vpop.f32.mrb[3].mxu0  ;;  %v676_v30 = vpop.f32.mrb[3].mxu1 }
 0x120   : > { %v690_v31 = vrot.slane %v682_v25, %v1568_v16  ;;  %v697_v32 = vrot.slane %v683_v26, %v1568_v16 }
 0x122   : > { %v698_v34 = vcombine.low %v690_v31, %v697_v32 }
 0x124   : > { %v1574_v35 = vadd.f32 %v740_v33, %v698_v34 }
 0x126   : > { %v744_v36 = vcombine.high %v1574_v35, %v1574_v35  ;;  %v751_v37 = vrot.slane %v1574_v35, %v1568_v16  ;;  %v798_v38 = vmul.f32 %v1574_v35, %v1574_v35 }
 0x128   : > { %v758_v39 = vrot.slane %v744_v36, %v1568_v16  ;;  %v759_v40 = vcombine.high %v751_v37, %v751_v37  ;;  %v766_v41 = vsel %vm765_vm0, %v751_v37, 0.0  ;;  %v800_v42 = vcombine.high %v798_v38, %v798_v38 }
 0x129   : > { %v767_v43 = vrot.slane %v766_v41, 4  ;;  %v807_v44 = vrot.slane %v798_v38, %v1568_v16 }
 0x12a   : > { %v760_v45 = vcombine.high %v758_v39, %v758_v39  ;;  %v773_v46 = vsel %vm765_vm0, %v759_v40, 0.0  ;;  %v780_v47 = vsel %vm765_vm0, %v758_v39, 0.0  ;;  %v814_v48 = vrot.slane %v800_v42, %v1568_v16 }
 0x12b   : > { %v768_v49 = vadd.f32 %v767_v43, %v766_v41  ;;  %v774_v50 = vrot.slane %v773_v46, 4  ;;  %v781_v51 = vrot.slane %v780_v47, 4  ;;  %v815_v52 = vcombine.high %v807_v44, %v807_v44 }
 0x12c   : > { %v787_v53 = vsel %vm765_vm0, %v760_v45, 0.0  ;;  %v816_v54 = vcombine.high %v814_v48, %v814_v48  ;;  %v821_v55 = vsel %vm765_vm0, %v807_v44, 0.0  ;;  %v835_v56 = vsel %vm765_vm0, %v814_v48, 0.0 }
 0x12d   : > { %v769_v57 = vrot.slane %v768_v49, 2  ;;  %v775_v58 = vadd.f32 %v774_v50, %v773_v46  ;;  %v782_v59 = vadd.f32 %v781_v51, %v780_v47  ;;  %v788_v60 = vrot.slane %v787_v53, 4 }
 0x12e   : > { %v822_v61 = vrot.slane %v821_v55, 4  ;;  %v828_v62 = vsel %vm765_vm0, %v815_v52, 0.0  ;;  %v836_v63 = vrot.slane %v835_v56, 4  ;;  %v842_v0 = vsel %vm765_vm0, %v816_v54, 0.0 }
 0x12f   : > { %v770_v1 = vadd.f32 %v769_v57, %v768_v49  ;;  %v776_v2 = vrot.slane %v775_v58, 2  ;;  %v783_v4 = vrot.slane %v782_v59, 2  ;;  %v789_v5 = vadd.f32 %v788_v60, %v787_v53 }
 0x130   : > { %v823_v10 = vadd.f32 %v822_v61, %v821_v55  ;;  %v829_v11 = vrot.slane %v828_v62, 4  ;;  %v837_v12 = vadd.f32 %v836_v63, %v835_v56  ;;  %v843_v13 = vrot.slane %v842_v0, 4 }
 0x131   : > { %v771_v14 = vrot.slane %v770_v1, 1  ;;  %v777_v15 = vadd.f32 %v776_v2, %v775_v58  ;;  %v784_v17 = vadd.f32 %v783_v4, %v782_v59  ;;  %v790_v18 = vrot.slane %v789_v5, 2 }
 0x132   : > { %v824_v19 = vrot.slane %v823_v10, 2  ;;  %v830_v20 = vadd.f32 %v829_v11, %v828_v62  ;;  %v838_v21 = vrot.slane %v837_v12, 2  ;;  %v844_v22 = vadd.f32 %v843_v13, %v842_v0  ;;  %v919_v11 = vld [vmem:[%s384_s24] sm:$0xf] }
 0x133   : > { %v772_v23 = vadd.f32 %v771_v14, %v770_v1  ;;  %v778_v24 = vrot.slane %v777_v15, 1  ;;  %v785_v25 = vrot.slane %v784_v17, 1  ;;  %v791_v26 = vadd.f32 %v790_v18, %v789_v5 }
 0x134   : > { %v825_v27 = vadd.f32 %v824_v19, %v823_v10  ;;  %v831_v28 = vrot.slane %v830_v20, 2  ;;  %v839_v29 = vadd.f32 %v838_v21, %v837_v12  ;;  %v845_v30 = vrot.slane %v844_v22, 2  ;;  %v956_v12 = vld [vmem:[%s389_s28] sm:$0xf] }
 0x135   : > { %v779_v31 = vadd.f32 %v778_v24, %v777_v15  ;;  %v786_v32 = vadd.f32 %v785_v25, %v784_v17  ;;  %v792_v33 = vrot.slane %v791_v26, 1  ;;  %v794_v34 = vmul.f32 0.5, %v772_v23 }
 0x136   : > { %v826_v36 = vrot.slane %v825_v27, 1  ;;  %v832_v37 = vadd.f32 %v831_v28, %v830_v20  ;;  %v840_v38 = vrot.slane %v839_v29, 1  ;;  %v846_v39 = vadd.f32 %v845_v30, %v844_v22 }
 0x137   : > { %v793_v40 = vadd.f32 %v792_v33, %v791_v26  ;;  %v795_v41 = vmul.f32 0.5, %v779_v31  ;;  %v796_v42 = vmul.f32 0.5, %v786_v32  ;;  %v853_v43 = vmul.f32 %v794_v34, %v794_v34 }
 0x138   : > { %v827_v44 = vadd.f32 %v826_v36, %v825_v27  ;;  %v833_v45 = vrot.slane %v832_v37, 1  ;;  %v841_v46 = vadd.f32 %v840_v38, %v839_v29  ;;  %v847_v47 = vrot.slane %v846_v39, 1 }
 0x139   : > { %v797_v48 = vmul.f32 0.5, %v793_v40  ;;  %v854_v49 = vmul.f32 %v795_v41, %v795_v41  ;;  %v855_v50 = vmul.f32 %v796_v42, %v796_v42  ;;  %v924_v13 = vrot.slane %v919_v11, %v1552_v6 }
 0x13a   : > { %v834_v51 = vadd.f32 %v833_v45, %v832_v37  ;;  %v848_v52 = vadd.f32 %v847_v47, %v846_v39  ;;  %v849_v53 = vmul.f32 0.5, %v827_v44  ;;  %v851_v54 = vmul.f32 0.5, %v841_v46 }
 0x13b   : > { %v856_v55 = vmul.f32 %v797_v48, %v797_v48  ;;  %v870_v14 = vcombine.low %v796_v42, %v797_v48  ;;  %v928_v15 = vrot.slane %v919_v11, %v1555_v7  ;;  %v932_v17 = vrot.slane %v919_v11, %v1558_v8 }
 0x13c   : > { %v850_v56 = vmul.f32 0.5, %v834_v51  ;;  %v852_v57 = vmul.f32 0.5, %v848_v52  ;;  %v857_v58 = vsub.f32 %v849_v53, %v853_v43  ;;  %v859_v59 = vsub.f32 %v851_v54, %v855_v50 }
 0x13d   : > { %v936_v18 = vrot.slane %v919_v11, %v1561_v9  ;;  %v961_v19 = vrot.slane %v956_v12, %v1552_v6  ;;  %v869_v20 = vcombine.low %v794_v34, %v795_v41  ;;  %v965_v21 = vrot.slane %v956_v12, %v1555_v7 }
 0x13e   : > { %v858_v60 = vsub.f32 %v850_v56, %v854_v49  ;;  %v860_v61 = vsub.f32 %v852_v57, %v856_v55  ;;  %v861_v62 = vmax.f32 %v857_v58, 0.0  ;;  %v863_v63 = vmax.f32 %v859_v59, 0.0 }
 0x13f   : > { %v969_v22 = vrot.slane %v956_v12, %v1558_v8  ;;  %v973_v23 = vrot.slane %v956_v12, %v1561_v9  ;;  %v884_v25 = vrot.slane %v870_v14, %v1568_v16  ;;  %v937_v26 = vcombine.low %v924_v13, %v928_v15 }
 0x140   : > { %v862_v0 = vmax.f32 %v858_v60, 0.0  ;;  %v864_v1 = vmax.f32 %v860_v61, 0.0  ;;  %v888_v2 = vadd.f32 1e-05, %v861_v62  ;;  %v890_v4 = vadd.f32 1e-05, %v863_v63 }
 0x141   : > { %v938_v27 = vcombine.low %v932_v17, %v936_v18  ;;  %v877_v30 = vrot.slane %v869_v20, %v1568_v16  ;;  %v974_v31 = vcombine.low %v961_v19, %v965_v21  ;;  %v975_v32 = vcombine.low %v969_v22, %v973_v23 }
 0x142   : > { %v889_v5 = vadd.f32 1e-05, %v862_v0  ;;  %v891_v10 = vadd.f32 1e-05, %v864_v1  ;;  %1308 = vrsqrt.f32 %v888_v2  ;;  %v945_v7 = vrot.slane %v937_v26, %v1568_v16 }
 0x143   : > { %1310 = vrsqrt.f32 %v890_v4  ;;  %v885_v34 = vcombine.low %v877_v30, %v884_v25  ;;  %v952_v8 = vrot.slane %v938_v27, %v1568_v16  ;;  %v982_v38 = vrot.slane %v974_v31, %v1568_v16 }
 0x144   : > { %1312 = vrsqrt.f32 %v889_v5  ;;  %v989_v39 = vrot.slane %v975_v32, %v1568_v16  ;;  %v1360_v55 = vmov 1966171168  }
 0x145   : > { %1314 = vrsqrt.f32 %v891_v10  ;;  %v887_v40 = vsub.f32 %v1574_v35, %v885_v34  ;;  %v953_v42 = vcombine.low %v945_v7, %v952_v8  ;;  %v1035_v56 = vunpack.c.l.s4 %v1360_v55 }
 0x146   : > { %v990_v44 = vcombine.low %v982_v38, %v989_v39 }
 0x147   : > { %v1036_v59 = vunpack.c.0.s8 %v1035_v56 }
 0x149   : > { %v1039_v0 = vsub.s32 %v1036_v59, %v1545_v3 }
 0x14c   : > { %v1309_v24 = vpop.eup %1308 }
 0x14d   : > { %v1311_v28 = vpop.eup %1310 }
 0x14e   : > { %v1313_v29 = vpop.eup %1312 }
 0x14f   : > { %v1315_v33 = vpop.eup %1314  ;;  %v900_v6 = vcombine.low %v1309_v24, %v1313_v29 }
 0x150   : > { %v901_v36 = vcombine.low %v1311_v28, %v1315_v33 }
 0x151   : > { %v908_v9 = vrot.slane %v900_v6, %v1568_v16 }
 0x152   : > { %v915_v37 = vrot.slane %v901_v36, %v1568_v16 }
 0x154   : > { %v916_v41 = vcombine.low %v908_v9, %v915_v37 }
 0x156   : > { %v918_v43 = vmul.f32 %v916_v41, %v887_v40 }
 0x158   : > { %v955_v45 = vmul.f32 %v953_v42, %v918_v43 }
 0x15a   : > { %v992_v46 = vadd.f32 %v990_v44, %v955_v45 }
 0x15c   : > { %v994_v47 = vmul.f32 0.044715, %v992_v46  ;;  %v993_v53 = vmul.f32 0.5, %v992_v46 }
 0x15e   : > { %v995_v48 = vmul.f32 %v994_v47, %v992_v46 }
 0x160   : > { %v996_v49 = vmul.f32 %v995_v48, %v992_v46 }
 0x162   : > { %v997_v50 = vadd.f32 %v996_v49, %v992_v46 }
 0x164   : > { %v998_v51 = vmul.f32 0.7978846, %v997_v50 }
 0x166   : > { %1316 = vtanh.f32 %v998_v51 }
 0x170   : > { %v1317_v52 = vpop.eup %1316 }
 0x171   : > { %v1000_v54 = vadd.f32 1.0, %v1317_v52 }
 0x173   : > { %v1001_v57 = vmul.f32 %v1000_v54, %v993_v53 }
 0x175   : > { %v1003_v35 = vcombine.high %v1001_v57, %v1001_v57  ;;  %v1010_v58 = vrot.slane %v1001_v57, %v1568_v16 }
 0x177   : > { %v1017_v60 = vrot.slane %v1003_v35, %v1568_v16  ;;  %v1018_v61 = vcombine.high %v1010_v58, %v1010_v58 }
 0x179   : > { %v1019_v62 = vcombine.high %v1017_v60, %v1017_v60  ;;  %v1211_v63 = vpack.c.bf16 %v1018_v61, %v1010_v58 }
 0x17b   : > { %v1212_v1 = vpack.c.bf16 %v1019_v62, %v1017_v60  ;;  %v1040_v2 = vrot.slane %v1211_v63, %v1039_v0 }
 0x17d   : > { %v1047_v4 = vrot.slane %v1212_v1, %v1039_v0 }
 0x17f   : > { %v1048_v5 = vcombine.low %v1040_v2, %v1047_v4 }
 0x181   : > { %1213 = vst.sshfl [vmem:[%s394_s6] sm:$0x55 pattern:$0x73625140] %v1048_v5 }
 0x182 PF: > { %s15_s22 = sadd.s32 1, %s1356_s22   ;;  %s1646_s18 = smov %s1344_s19 }
 0x183   : > { %p12_p10 = scmp.ge.s32.totalorder %s15_s22, 10   ;;  %s1647_s19 = smov %s1426_s26 }
 0x184   : > { %s1648_s20 = smov %s1352_s21  ;;  %s1649_s21 = smov %s1651_s23 }
 0x185   :  { %14 = sbr.rel (!%p12_p10) target bundleno = 3 (0x3), region = 118 }

// kernel: encoder_forward.11
= control target key start
LH: loop header
LB: loop body
LE: loop exit
PB: predicated region body
PF: predicated region fallthrough
CT: control target
= control target key end

     0   :  { %8 = vsyncpa [#allocation4], 0  ;;  %s926_s12 = smov 0   ;;  %s928_s13 = smov 0   ;;  %s1039_s0 = inlined_call_operand.vmem [shape: bf16[2,4096], index: 0, kind: input, shape index: {}]   ;;  %s1040_s1 = inlined_call_operand.vmem [shape: bf16[4096,128], index: 1, kind: input, shape index: {}]   ;;  %s1041_s2 = inlined_call_operand.vmem [shape: f32[1,128], index: 2, kind: input, shape index: {}]   ;;  %s1042_s3 = inlined_call_operand.hbm [shape: f32[2,128], index: 3, kind: output, shape index: {}]  }
   0x1   :  { %s930_s14 = smov 0  }
   0x2 LB: > { %s692_s15 = sadd.s32 4294967295, %s901_s14   ;;  %s23_s16 = sadd.s32 1, %s897_s13  ;;  %s901_s14 = sphi %s930_s14, %s14_s14   ;;  %s897_s13 = sphi %s928_s13, %s1045_s13   ;;  %s893_s12 = sphi %s926_s12, %s1044_s12  }
   0x3   : > { %p24_p0 = scmp.ge.s32.totalorder %s23_s16, 8  ;;  %p696_p1 = scmp.ge.s32.totalorder %s901_s14, 1 }
   0x4   : > { %p174_p2 = scmp.lt.s32.totalorder %s901_s14, 9 }
   0x5   : > { %s1047_s16 = smov (%p24_p0, %s23_s16), 0 }
   0x6   : > { %p175_p3 = pnand %p696_p1, %p174_p2 }
   0x7   : > { %s697_s17 = sshll.u32 (!%p175_p3), %s893_s12, 2  ;;  %s698_s18 = sshll.u32 (!%p175_p3), %s893_s12, 6 }
   0x8   : > { %178 = sbr.rel (%p175_p3) target bundleno = 314 (0x13a), region = 32  ;;  %p204_p4 = scmp.lt.s32.totalorder (!%p175_p3), %s697_s17, 31 }
   0x9   : > { %p209_p5 = scmp.lt.s32.totalorder (!%p175_p3), %s698_s18, 511  ;;  %p700_p6 = scmp.ne.s32.totalorder (!%p175_p3), %s893_s12, 0 }
   0xf   : > { %s1049_s17 = smov (!%p204_p4, %s697_s17), 31  ;;  %s1051_s18 = smov (!%p209_p5, %s698_s18), 511 }
  0x10   : > { %s206_s21 = scalar_lea.vmem %s1039_s0, %s1049_s17  ;;  %s699_s22 = sshll.u32 %s1051_s18, 2  ;;  %v903_v0 = vmov (!%p700_p6), 0.0  }
  0x11   : > { %s958_s25 = scalar_lea.vmem %s1040_s1, %s699_s22  ;;  %224 = sbr.rel (%p700_p6) target bundleno = 24 (0x18), region = 36  ;;  %225 = vst [vmem:[#allocation2] sm:$0x3] (!%p700_p6), %v903_v0 }
  0x18 PF: > { %v817_v1 = vld [vmem:[%s958_s25 + $0x40] sm:$0xff]   ;;  %v821_v5 = vld [vmem:[%s958_s25 + $0x48] sm:$0xff]   ;;  %v825_v9 = vld [vmem:[%s958_s25 + $0x50] sm:$0xff]   ;;  %v304_v31 = vlaneseq  ;;  %v904_v35 = vmov 1966171168   ;;  %p734_p7 = scmp.ne.s32.totalorder %s893_s12, 7 }
  0x19   : > { %v818_v2 = vld [vmem:[%s958_s25 + $0xc0] sm:$0xff]   ;;  %740 = vmatprep.subr.bf16.mxu0 %v817_v1  ;;  %v822_v6 = vld [vmem:[%s958_s25 + $0xc8] sm:$0xff]   ;;  %v826_v10 = vld [vmem:[%s958_s25 + $0xd0] sm:$0xff]   ;;  %v302_v36 = vunpack.c.l.s4 %v904_v35 }
  0x1a   : > { %v819_v3 = vld [vmem:[%s958_s25] sm:$0xff]   ;;  %762 = vmatprep.subr.bf16.mxu1 %v818_v2  ;;  %v823_v7 = vld [vmem:[%s958_s25 + $0x8] sm:$0xff]   ;;  %v827_v11 = vld [vmem:[%s958_s25 + $0x10] sm:$0xff]   ;;  %v305_v37 = vshrl.u32 %v304_v31, 7 }
  0x1b   : > { %v820_v4 = vld [vmem:[%s958_s25 + $0x80] sm:$0xff]   ;;  %741 = vmatpush3.bf16.msra.mxu0 %v819_v3  ;;  %v824_v8 = vld [vmem:[%s958_s25 + $0x88] sm:$0xff]   ;;  %v828_v12 = vld [vmem:[%s958_s25 + $0x90] sm:$0xff]   ;;  %v303_v39 = vunpack.c.0.s8 %v302_v36 }
  0x1c   : > { %763 = vmatpush3.bf16.msra.mxu1 %v820_v4  ;;  %742 = vmatprep.subr.bf16.mxu0 %v821_v5  ;;  %v829_v13 = vld [vmem:[%s958_s25 + $0x58] sm:$0xff]   ;;  %v833_v17 = vld [vmem:[%s958_s25 + $0x60] sm:$0xff]   ;;  %v837_v21 = vld [vmem:[%s958_s25 + $0x68] sm:$0xff]  }
  0x1d   : > { %764 = vmatprep.subr.bf16.mxu1 %v822_v6  ;;  %v830_v14 = vld [vmem:[%s958_s25 + $0xd8] sm:$0xff]   ;;  %v834_v18 = vld [vmem:[%s958_s25 + $0xe0] sm:$0xff]   ;;  %v838_v22 = vld [vmem:[%s958_s25 + $0xe8] sm:$0xff]   ;;  %v306_v40 = vsub.s32 %v303_v39, %v305_v37 }
  0x1e   : > { %v831_v15 = vld [vmem:[%s958_s25 + $0x18] sm:$0xff]   ;;  %v835_v19 = vld [vmem:[%s958_s25 + $0x20] sm:$0xff]   ;;  %v839_v23 = vld [vmem:[%s958_s25 + $0x28] sm:$0xff]  }
  0x1f   : > { %743 = vmatpush3.bf16.msra.mxu0 %v823_v7  ;;  %v832_v16 = vld [vmem:[%s958_s25 + $0x98] sm:$0xff]   ;;  %v836_v20 = vld [vmem:[%s958_s25 + $0xa0] sm:$0xff]   ;;  %v840_v24 = vld [vmem:[%s958_s25 + $0xa8] sm:$0xff]  }
  0x20   : > { %765 = vmatpush3.bf16.msra.mxu1 %v824_v8  ;;  %744 = vmatprep.subr.bf16.mxu0 %v825_v9  ;;  %v841_v25 = vld [vmem:[%s958_s25 + $0x70] sm:$0xff]   ;;  %v845_v29 = vld [vmem:[%s958_s25 + $0x78] sm:$0xff]   ;;  %v701_v34 = vld.sshfl [vmem:[%s206_s21] sm:$0x33 pattern:$0x75316420] }
  0x21   : > { %766 = vmatprep.subr.bf16.mxu1 %v826_v10  ;;  %v842_v26 = vld [vmem:[%s958_s25 + $0xf0] sm:$0xff]   ;;  %v846_v30 = vld [vmem:[%s958_s25 + $0xf8] sm:$0xff]   ;;  %v300_v38 = vcombine.high %v701_v34, %v701_v34  ;;  %v307_v42 = vrot.slane %v701_v34, %v306_v40  ;;  %v226_v54 = vld [vmem:[#allocation2] sm:$0x3] }
  0x22   : > { %v843_v27 = vld [vmem:[%s958_s25 + $0x30] sm:$0xff]   ;;  %v847_v32 = vld [vmem:[%s958_s25 + $0x38] sm:$0xff]   ;;  %v735_v59 = vld [vmem:[%s1041_s2] ss:$0 sm:$0xff] (!%p734_p7) }
  0x23   : > { %745 = vmatpush3.bf16.msra.mxu0 %v827_v11  ;;  %v844_v28 = vld [vmem:[%s958_s25 + $0xb0] sm:$0xff]   ;;  %v848_v33 = vld [vmem:[%s958_s25 + $0xb8] sm:$0xff]   ;;  %v314_v41 = vrot.slane %v300_v38, %v306_v40  ;;  %v315_v44 = vcombine.high %v307_v42, %v307_v42 }
  0x24   : > { %767 = vmatpush3.bf16.msra.mxu1 %v828_v12  ;;  %746 = vmatprep.subr.bf16.mxu0 %v829_v13 }
  0x25   : > { %768 = vmatprep.subr.bf16.mxu1 %v830_v14  ;;  %545 = vmatprep.mubr.bf16.mxu0 %v314_v41  ;;  %v316_v43 = vcombine.high %v314_v41, %v314_v41 }
  0x27   : > { %747 = vmatpush3.bf16.msra.mxu0 %v831_v15  ;;  %585 = vmatprep.mubr.bf16.mxu1 %v316_v43 }
  0x28   : > { %769 = vmatpush3.bf16.msra.mxu1 %v832_v16  ;;  %748 = vmatprep.subr.bf16.mxu0 %v833_v17 }
  0x29   : > { %770 = vmatprep.subr.bf16.mxu1 %v834_v18 }
  0x2b   : > { %749 = vmatpush3.bf16.msra.mxu0 %v835_v19 }
  0x2c   : > { %771 = vmatpush3.bf16.msra.mxu1 %v836_v20  ;;  %750 = vmatprep.subr.bf16.mxu0 %v837_v21 }
  0x2d   : > { %772 = vmatprep.subr.bf16.mxu1 %v838_v22 }
  0x2f   : > { %751 = vmatpush3.bf16.msra.mxu0 %v839_v23 }
  0x30   : > { %773 = vmatpush3.bf16.msra.mxu1 %v840_v24  ;;  %752 = vmatprep.subr.bf16.mxu0 %v841_v25 }
  0x31   : > { %774 = vmatprep.subr.bf16.mxu1 %v842_v26 }
  0x33   : > { %753 = vmatpush3.bf16.msra.mxu0 %v843_v27 }
  0x34   : > { %775 = vmatpush3.bf16.msra.mxu1 %v844_v28  ;;  %754 = vmatprep.subr.bf16.mxu0 %v845_v29 }
  0x35   : > { %776 = vmatprep.subr.bf16.mxu1 %v846_v30 }
  0x37   : > { %755 = vmatpush3.bf16.msra.mxu0 %v847_v32 }
  0x38   : > { %777 = vmatpush3.bf16.msra.mxu1 %v848_v33 }
  0x3a   : > { %546 = vmatmul.mubr.bf16.vlgmr.msra.gmra.mrb[0].mxu0 %v307_v42 }
  0x3b   : > { %586 = vmatmul.mubr.bf16.vlgmr.msra.gmra.mrb[0].mxu1 %v315_v44 }
 0x10d   : > { %v756_v45 = vpop.f32.mrb[0].mxu0 }
 0x10e   : > { %v757_v46 = vpop.f32.mrb[1].mxu0  ;;  %v778_v47 = vpop.f32.mrb[0].mxu1 }
 0x10f   : > { %v758_v48 = vadd.f32 %v757_v46, %v756_v45  ;;  %v759_v49 = vpop.f32.mrb[2].mxu0  ;;  %v779_v50 = vpop.f32.mrb[1].mxu1 }
 0x110   : > { %v760_v51 = vpop.f32.mrb[3].mxu0  ;;  %v780_v52 = vadd.f32 %v779_v50, %v778_v47  ;;  %v781_v53 = vpop.f32.mrb[2].mxu1  ;;  %598 = sbr.rel (%p734_p7) target bundleno = 289 (0x121), region = 40 }
 0x111   : > { %v782_v55 = vpop.f32.mrb[3].mxu1 }
 0x112   : > { %v588_v56 = vadd.f32 %v780_v52, %v758_v48 }
 0x114   : > { %v593_v57 = vadd.f32 %v588_v56, %v226_v54 }
 0x116   : > { %594 = vst [vmem:[#allocation2] sm:$0x3] %v593_v57 }
 0x11d   : > { %v599_v58 = vld [vmem:[#allocation2] sm:$0x3] }
 0x11e   : > { %v607_v60 = vadd.f32 %v735_v59, %v599_v58 }
 0x120   : > { %608 = vst [vmem:[#allocation3] sm:$0x3] %v607_v60 }
 0x121 PF: > { %p1004_p8 = scmp.eq.s32.totalorder %s692_s15, 7  ;;  %s905_s4 = smov [#allocation3]  }
 0x122   : > { %s618_s5 = sshll.u32 %s905_s4, 4  ;;  %s619_s5 = int_to_ptr.vmem [resolvable:$true] %s618_s5 }
 0x123   : > { %s849_s6 = scalar_lea.vmem %s619_s5, 32  ;;  %p856_p12 = scmp.lt.s32.totalorder %s619_s5, %s619_s5 }
 0x124   : > { %p850_p9 = scmp.ne.s32.totalorder %s619_s5, %s849_s6  ;;  %p857_p13 = scmp.lt.s32.totalorder %s849_s6, %s849_s6 }
 0x126   : > { %p851_p10 = pnand %p850_p9, %p1004_p8  ;;  %p858_p0 = por %p857_p13, %p856_p12 }
 0x128   : > { %p852_p11 = pneg %p851_p10 }
 0x12a   : > { %p859_p1 = pnand %p858_p0, %p852_p11 }
 0x12c   : > { %862 = shalt.err (!%p859_p1)
}
 0x12d   : > { %s863_s9 = scalar_lea.hbm %s1042_s3, 32 }
 0x12e   : > { %p864_p2 = scmp.ne.s32.totalorder %s1042_s3, %s863_s9  ;;  %p869_p5 = scmp.lt.u32.totalorder %s863_s9, %s1042_s3 }
 0x130   : > { %p865_p3 = pnand %p864_p2, %p1004_p8 }
 0x132   : > { %p866_p4 = pneg %p865_p3 }
 0x134   : > { %p871_p6 = pnand %p869_p5, %p866_p4 }
 0x136   : > { %874 = shalt.err (!%p871_p6)
}
 0x137   : > { %785 = dma.vmem_to_hbm [thread:$0]  (%p1004_p8), %s619_s5, 32, %s1042_s3, [#allocation4]  }
 0x138   : > { %888 = dma.done.wait (%p1004_p8), [#allocation4], 32  }
 0x139   : > { %890 = vsyncadd (%p1004_p8), [#allocation4], 4294967264 }
 0x13a PF: > { %s14_s14 = sadd.s32 1, %s901_s14   ;;  %s1044_s12 = smov %s897_s13 }
 0x13b   : > { %p11_p7 = scmp.ge.s32.totalorder %s14_s14, 10   ;;  %s1045_s13 = smov %s1047_s16 }
 0x13d   :  { %13 = sbr.rel (!%p11_p7) target bundleno = 2 (0x2), region = 74 }
 0x144   :  { %631 = vsyncpa [#allocation4], 1 }
 0x145   :  { %633 = vsyncpa [#allocation4 + $0x1], 1 }

</bundles_post_ra>
